<compile_context>
chip_gen: v7x
topology: tpu7x:2x2x1
jax: 0.10.0
libtpu: 0.0.40
codegen_flags: <defaults>
</compile_context>

<pallas_src>
import math

import jax
import jax.numpy as jnp
from jax import lax
from jax.experimental import pallas as pl
from jax.experimental.pallas import tpu as pltpu

# ---------------- small config consistent with the module ----------------
VOCAB = 50
B = 2
T_DST = 8                 # target (decoder) sequence length
T_SRC = 16                # source (encoder memory) sequence length
D_MODEL = 32              # hsz (module default 768, scaled down)
NUM_HEADS = 4
D_K = D_MODEL // NUM_HEADS
D_FF = 4 * D_MODEL        # d_ff = 4 * hsz (module default)
NUM_LAYERS = 2
LN_EPS = 1e-6
NEG_INF = -1e9
F32 = jnp.float32
MM = jnp.bfloat16                                 # MXU operand dtype (f32 accumulation)
V_PAD = ((VOCAB + 127) // 128) * 128              # lane-dense padded vocab (= 128)


# ---------------- in-kernel helpers ----------------
def _layer_norm(x, g, b):
    mu = jnp.mean(x, axis=-1, keepdims=True)
    var = jnp.mean(jnp.square(x - mu), axis=-1, keepdims=True)
    return (x - mu) * lax.rsqrt(var + LN_EPS) * g + b


def _gelu(x):
    # TODO(synk): PyTorch nn.GELU defaults to the exact erf GELU; tanh approximation used here.
    c = 0.7978845608028654  # sqrt(2/pi)
    return 0.5 * x * (1.0 + jnp.tanh(c * (x + 0.044715 * x * x * x)))


def _softmax_last(x):
    m = jnp.max(x, axis=-1, keepdims=True)
    e = jnp.exp(x - m)
    return e * pl.reciprocal(jnp.sum(e, axis=-1, keepdims=True), approx=True)


def _mha_proj(q, k, v, bias, scale, w_o_heads):
    """Multi-head attention fused with the output projection (no concat).

    q: [B, Tq, D] bf16; k, v: [B, Tk, D] bf16; bias: [B, Tq, Tk] f32 additive mask.
    w_o_heads: [H, Dk, D] bf16 -- rows h*Dk:(h+1)*Dk of Wo, split per head in the wrapper.
    Returns sum_h (softmax(Q_h K_h^T * scale + bias) V_h) @ Wo_h  as [B*Tq, D] f32
    (output-projection bias NOT included).
    """
    Bq, Tq, _ = q.shape
    out = None
    for h in range(NUM_HEADS):
        sl = slice(h * D_K, (h + 1) * D_K)
        sc = jnp.einsum("bqd,bkd->bqk", q[:, :, sl], k[:, :, sl],
                        preferred_element_type=jnp.float32) * scale
        p = _softmax_last(sc + bias)
        ctx = jnp.einsum("bqk,bkd->bqd", p.astype(MM), v[:, :, sl],
                         preferred_element_type=jnp.float32)          # [B, Tq, Dk] f32
        contrib = jnp.dot(ctx.reshape(Bq * Tq, D_K).astype(MM), w_o_heads[h],
                          preferred_element_type=jnp.float32)          # [B*Tq, D] f32
        out = contrib if out is None else out + contrib
    return out


# ---------------- Pallas kernel: fused decoder stack + tied output head ----------------
def _decoder_stack_kernel(x0_ref, mem_ref, src_bias_ref, dst_bias_ref,
                          ln_g_ref, ln_b_ref,
                          w_sa_qkv_ref, b_sa_qkv_ref, w_sa_o_ref, b_sa_o_ref,
                          w_ca_q_ref, b_ca_q_ref, w_ca_kv_ref, b_ca_kv_ref,
                          w_ca_o_ref, b_ca_o_ref,
                          w_ff1_ref, b_ff1_ref, w_ff2_ref, b_ff2_ref,
                          lnf_g_ref, lnf_b_ref, w_out_ref, out_bias_ref,
                          o_ref):
    Bq, Tq, D = x0_ref.shape
    BS = mem_ref.shape[0]
    Tk = BS // Bq
    BT = Bq * Tq

    x = x0_ref[...].reshape(BT, D)                 # residual stream, f32
    src_bias = src_bias_ref[...]                   # [B, Tq, S]  additive (0 / -1e9), f32
    dst_bias = dst_bias_ref[...]                   # [B, Tq, Tq] causal & padding, f32
    ln_g = ln_g_ref[...]                           # [L, 3, 1, D]
    ln_b = ln_b_ref[...]
    scale = 1.0 / math.sqrt(D_K)                   # scale=True in the module

    # Cross-attention K/V of the layer-invariant memory for ALL layers at once:
    # one lane-dense [B*S, D] @ [D, L*2*D] matmul, sliced per layer below.
    kv_all = (jnp.dot(mem_ref[...], w_ca_kv_ref[...],
                      preferred_element_type=jnp.float32)
              + b_ca_kv_ref[...]).astype(MM)       # [B*S, L*2*D]

    for l in range(NUM_LAYERS):
        # --- masked causal self-attention sub-block (pre-LN) ---
        h = _layer_norm(x, ln_g[l, 0], ln_b[l, 0])
        qkv = (jnp.dot(h.astype(MM), w_sa_qkv_ref[l],
                       preferred_element_type=jnp.float32)
               + b_sa_qkv_ref[l]).astype(MM)       # fused QKV projection [BT, 3D]
        q = qkv[:, 0 * D:1 * D].reshape(Bq, Tq, D)
        k = qkv[:, 1 * D:2 * D].reshape(Bq, Tq, D)
        v = qkv[:, 2 * D:3 * D].reshape(Bq, Tq, D)
        x = x + _mha_proj(q, k, v, dst_bias, scale, w_sa_o_ref[l]) + b_sa_o_ref[l]

        # --- encoder-decoder cross-attention sub-block (pre-LN query, raw memory K/V) ---
        h = _layer_norm(x, ln_g[l, 1], ln_b[l, 1])
        q = (jnp.dot(h.astype(MM), w_ca_q_ref[l],
                     preferred_element_type=jnp.float32)
             + b_ca_q_ref[l]).astype(MM).reshape(Bq, Tq, D)
        k = kv_all[:, l * 2 * D:l * 2 * D + D].reshape(Bq, Tk, D)
        v = kv_all[:, l * 2 * D + D:(l + 1) * 2 * D].reshape(Bq, Tk, D)
        x = x + _mha_proj(q, k, v, src_bias, scale, w_ca_o_ref[l]) + b_ca_o_ref[l]

        # --- position-wise FFN sub-block (pre-LN, gelu) ---
        h = _layer_norm(x, ln_g[l, 2], ln_b[l, 2])
        f = _gelu(jnp.dot(h.astype(MM), w_ff1_ref[l],
                          preferred_element_type=jnp.float32) + b_ff1_ref[l])
        x = x + jnp.dot(f.astype(MM), w_ff2_ref[l],
                        preferred_element_type=jnp.float32) + b_ff2_ref[l]

    # final stack LayerNorm, weight-tied projection (lane-dense 128-padded vocab),
    # exact log-softmax; padded lanes carry -1e9 bias so they do not perturb the normalizer.
    xe = _layer_norm(x, lnf_g_ref[...], lnf_b_ref[...])
    logits = (jnp.dot(xe.astype(MM), w_out_ref[...],
                      preferred_element_type=jnp.float32)
              + out_bias_ref[...])                                     # [BT, V_PAD]
    m = jnp.max(logits, axis=-1, keepdims=True)
    z = logits - m
    lse = jnp.log(jnp.sum(jnp.exp(z), axis=-1, keepdims=True))
    o_ref[...] = z - lse


# ---------------- full forward ----------------
def text_transformer_decoder(encoder_output, src_mask, dst, dst_mask, params):
    Bq, Tq = dst.shape
    Tk = encoder_output.shape[1]
    L, D, H, Dk = NUM_LAYERS, D_MODEL, NUM_HEADS, D_K

    # 1) tgt_embeddings(dst): token lookup + learned positional (gather kept in plain-JAX glue)
    x0 = (params["tok_emb"][dst] + params["pos_emb"][:Tq][None, :, :]).astype(F32)   # [B, T, D]

    # 2) additive attention biases, fully materialized ONCE (no in-kernel broadcasts)
    causal = jnp.tril(jnp.ones((Tq, Tq), dtype=bool))                                 # subsequent_mask
    dst_allowed = jnp.logical_and(causal[None, :, :], dst_mask.astype(bool)[:, None, :])
    dst_bias = jnp.where(dst_allowed, 0.0, NEG_INF).astype(F32)                        # [B, T, T]
    src_bias = jnp.where(src_mask.astype(bool)[:, None, :], 0.0, NEG_INF)
    src_bias = jnp.broadcast_to(src_bias, (Bq, Tq, Tk)).astype(F32)                    # [B, T, S]

    # 3) kernel-friendly weight layout: bf16 MXU operands, per-head output projections,
    #    layer-concatenated cross K/V, lane-dense (128-padded) weight-tied output head.
    w_sa_qkv = params["w_sa_qkv"].astype(MM)
    w_sa_o = params["w_sa_o"].reshape(L, H, Dk, D).astype(MM)
    w_ca_q = params["w_ca_q"].astype(MM)
    w_ca_kv = jnp.moveaxis(params["w_ca_kv"], 0, 1).reshape(D, L * 2 * D).astype(MM)    # [D, 128]
    b_ca_kv = jnp.moveaxis(params["b_ca_kv"], 0, 1).reshape(1, L * 2 * D).astype(F32)
    w_ca_o = params["w_ca_o"].reshape(L, H, Dk, D).astype(MM)
    w_ff1 = params["w_ff1"].astype(MM)
    w_ff2 = params["w_ff2"].astype(MM)
    w_out = jnp.pad(jnp.transpose(params["tok_emb"]),
                    ((0, 0), (0, V_PAD - VOCAB))).astype(MM)                            # [D, 128]
    out_bias = jnp.where(jnp.arange(V_PAD) < VOCAB, 0.0, NEG_INF).astype(F32)[None, :]  # [1, 128]

    operands = (x0, encoder_output.reshape(Bq * Tk, D).astype(MM), src_bias, dst_bias,
                params["ln_g"], params["ln_b"],
                w_sa_qkv, params["b_sa_qkv"], w_sa_o, params["b_sa_o"],
                w_ca_q, params["b_ca_q"], w_ca_kv, b_ca_kv, w_ca_o, params["b_ca_o"],
                w_ff1, params["b_ff1"], w_ff2, params["b_ff2"],
                params["lnf_g"], params["lnf_b"], w_out, out_bias)

    # explicit VMEM residency contract + visible VMEM budget (generous headroom for
    # (8,128) tile padding and compiler temporaries; tiny vs the 32 MiB scoped default)
    out_bytes = Bq * Tq * V_PAD * 4
    io_bytes = sum(int(a.size) * a.dtype.itemsize for a in operands) + out_bytes
    vmem_limit = int(max(16 * io_bytes, 8 * 1024 * 1024))

    vmem_spec = pl.BlockSpec(memory_space=pltpu.MemorySpace.VMEM)
    out = pl.pallas_call(
        _decoder_stack_kernel,
        out_shape=jax.ShapeDtypeStruct((Bq * Tq, V_PAD), F32),
        in_specs=[vmem_spec] * len(operands),
        out_specs=vmem_spec,
        compiler_params=pltpu.CompilerParams(vmem_limit_bytes=vmem_limit),
    )(*operands)

    return out[:, :VOCAB].reshape(Bq, Tq, VOCAB)


# ---------------- deterministic parameter init (per-layer weights stacked on L) ----------------
def init_params(key):
    keys = jax.random.split(key, 16)
    kit = iter(keys)

    def nrm(shape, s=0.02):
        return (s * jax.random.normal(next(kit), shape)).astype(F32)

    L, D, Dff = NUM_LAYERS, D_MODEL, D_FF
    return {
        "tok_emb": nrm((VOCAB, D), 1.0 / math.sqrt(D)),
        "pos_emb": nrm((T_DST, D), 0.02),
        "ln_g": jnp.ones((L, 3, 1, D), F32),
        "ln_b": jnp.zeros((L, 3, 1, D), F32),
        "w_sa_qkv": nrm((L, D, 3 * D)), "b_sa_qkv": jnp.zeros((L, 1, 3 * D), F32),
        "w_sa_o": nrm((L, D, D)),       "b_sa_o": jnp.zeros((L, 1, D), F32),
        "w_ca_q": nrm((L, D, D)),       "b_ca_q": jnp.zeros((L, 1, D), F32),
        "w_ca_kv": nrm((L, D, 2 * D)),  "b_ca_kv": jnp.zeros((L, 1, 2 * D), F32),
        "w_ca_o": nrm((L, D, D)),       "b_ca_o": jnp.zeros((L, 1, D), F32),
        "w_ff1": nrm((L, D, Dff)),      "b_ff1": jnp.zeros((L, 1, Dff), F32),
        "w_ff2": nrm((L, Dff, D)),      "b_ff2": jnp.zeros((L, 1, D), F32),
        "lnf_g": jnp.ones((1, D), F32),
        "lnf_b": jnp.zeros((1, D), F32),
    }


if __name__ == "__main__":
    key = jax.random.PRNGKey(0)
    pkey, ekey, dkey = jax.random.split(key, 3)
    params = init_params(pkey)

    encoder_output = (0.1 * jax.random.normal(ekey, (B, T_SRC, D_MODEL))).astype(F32)
    dst = jax.random.randint(dkey, (B, T_DST), 0, VOCAB, dtype=jnp.int32)

    src_lengths = jnp.array([T_SRC, 11], dtype=jnp.int32)
    dst_lengths = jnp.array([T_DST, 5], dtype=jnp.int32)
    src_mask = jnp.arange(T_SRC)[None, :] < src_lengths[:, None]   # [B, S] bool
    dst_mask = jnp.arange(T_DST)[None, :] < dst_lengths[:, None]   # [B, T] bool

    fwd = jax.jit(text_transformer_decoder)
    logp = jax.block_until_ready(fwd(encoder_output, src_mask, dst, dst_mask, params))

    assert logp.shape == (B, T_DST, VOCAB), logp.shape
    assert logp.dtype == jnp.float32
    assert bool(jnp.all(jnp.isfinite(logp)))
    # log-softmax rows must be valid log-probabilities
    assert bool(jnp.allclose(jnp.sum(jnp.exp(logp), axis=-1), 1.0, atol=1e-3))
    print("KERNEL_OK")
</pallas_src>

<mosaic_0001>
module attributes {stable_mosaic.version = 11 : i64} {
  func.func @_decoder_stack_kernel(%arg0: memref<2x8x32xf32, #tpu.memory_space<vmem>>, %arg1: memref<32x32xbf16, #tpu.memory_space<vmem>>, %arg2: memref<2x8x16xf32, #tpu.memory_space<vmem>>, %arg3: memref<2x8x8xf32, #tpu.memory_space<vmem>>, %arg4: memref<2x3x1x32xf32, #tpu.memory_space<vmem>>, %arg5: memref<2x3x1x32xf32, #tpu.memory_space<vmem>>, %arg6: memref<2x32x96xbf16, #tpu.memory_space<vmem>>, %arg7: memref<2x1x96xf32, #tpu.memory_space<vmem>>, %arg8: memref<2x4x8x32xbf16, #tpu.memory_space<vmem>>, %arg9: memref<2x1x32xf32, #tpu.memory_space<vmem>>, %arg10: memref<2x32x32xbf16, #tpu.memory_space<vmem>>, %arg11: memref<2x1x32xf32, #tpu.memory_space<vmem>>, %arg12: memref<32x128xbf16, #tpu.memory_space<vmem>>, %arg13: memref<1x128xf32, #tpu.memory_space<vmem>>, %arg14: memref<2x4x8x32xbf16, #tpu.memory_space<vmem>>, %arg15: memref<2x1x32xf32, #tpu.memory_space<vmem>>, %arg16: memref<2x32x128xbf16, #tpu.memory_space<vmem>>, %arg17: memref<2x1x128xf32, #tpu.memory_space<vmem>>, %arg18: memref<2x128x32xbf16, #tpu.memory_space<vmem>>, %arg19: memref<2x1x32xf32, #tpu.memory_space<vmem>>, %arg20: memref<1x32xf32, #tpu.memory_space<vmem>>, %arg21: memref<1x32xf32, #tpu.memory_space<vmem>>, %arg22: memref<32x128xbf16, #tpu.memory_space<vmem>>, %arg23: memref<1x128xf32, #tpu.memory_space<vmem>>, %arg24: memref<16x128xf32, #tpu.memory_space<vmem>>) attributes {dimension_semantics = [], scalar_prefetch = 0 : i64, scratch_operands = 0 : i64, tpu.core_type = #tpu.core_type<tc>} {
    %c0 = arith.constant 0 : index
    %c0_0 = arith.constant 0 : index
    %c0_1 = arith.constant 0 : index
    %0 = vector.load %arg0[%c0, %c0_0, %c0_1] : memref<2x8x32xf32, #tpu.memory_space<vmem>>, vector<2x8x32xf32>
    %1 = vector.shape_cast %0 : vector<2x8x32xf32> to vector<16x32xf32>
    %c0_2 = arith.constant 0 : index
    %c0_3 = arith.constant 0 : index
    %c0_4 = arith.constant 0 : index
    %2 = vector.load %arg2[%c0_2, %c0_3, %c0_4] : memref<2x8x16xf32, #tpu.memory_space<vmem>>, vector<2x8x16xf32>
    %c0_5 = arith.constant 0 : index
    %c0_6 = arith.constant 0 : index
    %c0_7 = arith.constant 0 : index
    %3 = vector.load %arg3[%c0_5, %c0_6, %c0_7] : memref<2x8x8xf32, #tpu.memory_space<vmem>>, vector<2x8x8xf32>
    %c0_8 = arith.constant 0 : index
    %c0_9 = arith.constant 0 : index
    %c0_10 = arith.constant 0 : index
    %c0_11 = arith.constant 0 : index
    %4 = vector.load %arg4[%c0_8, %c0_9, %c0_10, %c0_11] : memref<2x3x1x32xf32, #tpu.memory_space<vmem>>, vector<2x3x1x32xf32>
    %c0_12 = arith.constant 0 : index
    %c0_13 = arith.constant 0 : index
    %c0_14 = arith.constant 0 : index
    %c0_15 = arith.constant 0 : index
    %5 = vector.load %arg5[%c0_12, %c0_13, %c0_14, %c0_15] : memref<2x3x1x32xf32, #tpu.memory_space<vmem>>, vector<2x3x1x32xf32>
    %c0_16 = arith.constant 0 : index
    %c0_17 = arith.constant 0 : index
    %6 = vector.load %arg1[%c0_16, %c0_17] : memref<32x32xbf16, #tpu.memory_space<vmem>>, vector<32x32xbf16>
    %c0_18 = arith.constant 0 : index
    %c0_19 = arith.constant 0 : index
    %7 = vector.load %arg12[%c0_18, %c0_19] : memref<32x128xbf16, #tpu.memory_space<vmem>>, vector<32x128xbf16>
    %cst = arith.constant dense<0.000000e+00> : vector<32x128xf32>
    %8 = tpu.matmul %6, %7, %cst {dimension_numbers = #tpu.dot_dimension_numbers<[1], [0], [0], [1], [0, 0, 1, 1], [], []>} : vector<32x32xbf16>, vector<32x128xbf16>, vector<32x128xf32> -> vector<32x128xf32>
    %c0_20 = arith.constant 0 : index
    %c0_21 = arith.constant 0 : index
    %9 = vector.load %arg13[%c0_20, %c0_21] : memref<1x128xf32, #tpu.memory_space<vmem>>, vector<1x128xf32>
    %10 = vector.broadcast %9 : vector<1x128xf32> to vector<32x128xf32>
    %11 = arith.addf %8, %10 : vector<32x128xf32>
    %12 = arith.truncf %11 : vector<32x128xf32> to vector<32x128xbf16>
    %13 = vector.extract_strided_slice %4 {offsets = [0, 0, 0, 0], sizes = [1, 1, 1, 32], strides = [1, 1, 1, 1]} : vector<2x3x1x32xf32> to vector<1x1x1x32xf32>
    %14 = vector.shape_cast %13 : vector<1x1x1x32xf32> to vector<1x32xf32>
    %15 = vector.extract_strided_slice %5 {offsets = [0, 0, 0, 0], sizes = [1, 1, 1, 32], strides = [1, 1, 1, 1]} : vector<2x3x1x32xf32> to vector<1x1x1x32xf32>
    %16 = vector.shape_cast %15 : vector<1x1x1x32xf32> to vector<1x32xf32>
    %cst_22 = arith.constant dense<0.000000e+00> : vector<16xf32>
    %17 = vector.multi_reduction <add>, %1, %cst_22 [1] : vector<16x32xf32> to vector<16xf32>
    %18 = vector.shape_cast %17 : vector<16xf32> to vector<16x1xf32>
    %cst_23 = arith.constant 3.200000e+01 : f32
    %19 = vector.broadcast %cst_23 : f32 to vector<16x1xf32>
    %20 = arith.divf %18, %19 : vector<16x1xf32>
    %21 = vector.broadcast %20 : vector<16x1xf32> to vector<16x32xf32>
    %22 = arith.subf %1, %21 : vector<16x32xf32>
    %23 = arith.mulf %22, %22 : vector<16x32xf32>
    %cst_24 = arith.constant dense<0.000000e+00> : vector<16xf32>
    %24 = vector.multi_reduction <add>, %23, %cst_24 [1] : vector<16x32xf32> to vector<16xf32>
    %25 = vector.shape_cast %24 : vector<16xf32> to vector<16x1xf32>
    %cst_25 = arith.constant 3.200000e+01 : f32
    %26 = vector.broadcast %cst_25 : f32 to vector<16x1xf32>
    %27 = arith.divf %25, %26 : vector<16x1xf32>
    %28 = vector.broadcast %20 : vector<16x1xf32> to vector<16x32xf32>
    %29 = arith.subf %1, %28 : vector<16x32xf32>
    %cst_26 = arith.constant 9.99999997E-7 : f32
    %30 = vector.broadcast %cst_26 : f32 to vector<16x1xf32>
    %31 = arith.addf %27, %30 : vector<16x1xf32>
    %32 = math.rsqrt %31 : vector<16x1xf32>
    %33 = vector.broadcast %32 : vector<16x1xf32> to vector<16x32xf32>
    %34 = arith.mulf %29, %33 : vector<16x32xf32>
    %35 = vector.broadcast %14 : vector<1x32xf32> to vector<16x32xf32>
    %36 = arith.mulf %34, %35 : vector<16x32xf32>
    %37 = vector.broadcast %16 : vector<1x32xf32> to vector<16x32xf32>
    %38 = arith.addf %36, %37 : vector<16x32xf32>
    %39 = arith.truncf %38 : vector<16x32xf32> to vector<16x32xbf16>
    %c0_27 = arith.constant 0 : index
    %c0_28 = arith.constant 0 : index
    %c0_29 = arith.constant 0 : index
    %40 = vector.load %arg6[%c0_27, %c0_28, %c0_29] : memref<2x32x96xbf16, #tpu.memory_space<vmem>>, vector<1x32x96xbf16>
    %41 = vector.shape_cast %40 : vector<1x32x96xbf16> to vector<32x96xbf16>
    %cst_30 = arith.constant dense<0.000000e+00> : vector<16x96xf32>
    %42 = tpu.matmul %39, %41, %cst_30 {dimension_numbers = #tpu.dot_dimension_numbers<[1], [0], [0], [1], [0, 0, 1, 1], [], []>} : vector<16x32xbf16>, vector<32x96xbf16>, vector<16x96xf32> -> vector<16x96xf32>
    %c0_31 = arith.constant 0 : index
    %c0_32 = arith.constant 0 : index
    %c0_33 = arith.constant 0 : index
    %43 = vector.load %arg7[%c0_31, %c0_32, %c0_33] : memref<2x1x96xf32, #tpu.memory_space<vmem>>, vector<1x1x96xf32>
    %44 = vector.shape_cast %43 : vector<1x1x96xf32> to vector<1x96xf32>
    %45 = vector.broadcast %44 : vector<1x96xf32> to vector<16x96xf32>
    %46 = arith.addf %42, %45 : vector<16x96xf32>
    %47 = arith.truncf %46 : vector<16x96xf32> to vector<16x96xbf16>
    %48 = vector.extract_strided_slice %47 {offsets = [0, 0], sizes = [16, 32], strides = [1, 1]} : vector<16x96xbf16> to vector<16x32xbf16>
    %49 = vector.shape_cast %48 : vector<16x32xbf16> to vector<2x8x32xbf16>
    %50 = vector.extract_strided_slice %47 {offsets = [0, 32], sizes = [16, 32], strides = [1, 1]} : vector<16x96xbf16> to vector<16x32xbf16>
    %51 = vector.shape_cast %50 : vector<16x32xbf16> to vector<2x8x32xbf16>
    %52 = vector.extract_strided_slice %47 {offsets = [0, 64], sizes = [16, 32], strides = [1, 1]} : vector<16x96xbf16> to vector<16x32xbf16>
    %53 = vector.shape_cast %52 : vector<16x32xbf16> to vector<2x8x32xbf16>
    %c0_34 = arith.constant 0 : index
    %c0_35 = arith.constant 0 : index
    %c0_36 = arith.constant 0 : index
    %c0_37 = arith.constant 0 : index
    %54 = vector.load %arg8[%c0_34, %c0_35, %c0_36, %c0_37] : memref<2x4x8x32xbf16, #tpu.memory_space<vmem>>, vector<1x4x8x32xbf16>
    %55 = vector.shape_cast %54 : vector<1x4x8x32xbf16> to vector<4x8x32xbf16>
    %56 = vector.extract_strided_slice %49 {offsets = [0, 0, 0], sizes = [2, 8, 8], strides = [1, 1, 1]} : vector<2x8x32xbf16> to vector<2x8x8xbf16>
    %57 = vector.extract_strided_slice %51 {offsets = [0, 0, 0], sizes = [2, 8, 8], strides = [1, 1, 1]} : vector<2x8x32xbf16> to vector<2x8x8xbf16>
    "tpu.trace_start"() <{level = 10 : i32, message = "bqd,bkd->bqk"}> : () -> ()
    %cst_38 = arith.constant dense<0.000000e+00> : vector<2x8x8xf32>
    %58 = tpu.matmul %56, %57, %cst_38 {dimension_numbers = #tpu.dot_dimension_numbers<[2], [2], [1], [1], [0, 0, 0, 1, 1, 1], [0], [0]>} : vector<2x8x8xbf16>, vector<2x8x8xbf16>, vector<2x8x8xf32> -> vector<2x8x8xf32>
    "tpu.trace_stop"() : () -> ()
    %cst_39 = arith.constant 0.353553385 : f32
    %59 = vector.broadcast %cst_39 : f32 to vector<2x8x8xf32>
    %60 = arith.mulf %58, %59 : vector<2x8x8xf32>
    %61 = arith.addf %60, %3 : vector<2x8x8xf32>
    %cst_40 = arith.constant dense<0xFF800000> : vector<2x8xf32>
    %62 = vector.multi_reduction <maximumf>, %61, %cst_40 [2] : vector<2x8x8xf32> to vector<2x8xf32>
    %63 = vector.shape_cast %62 : vector<2x8xf32> to vector<2x8x1xf32>
    %64 = vector.broadcast %63 : vector<2x8x1xf32> to vector<2x8x8xf32>
    %65 = arith.subf %61, %64 : vector<2x8x8xf32>
    %66 = math.exp %65 : vector<2x8x8xf32>
    %cst_41 = arith.constant dense<0.000000e+00> : vector<2x8xf32>
    %67 = vector.multi_reduction <add>, %66, %cst_41 [2] : vector<2x8x8xf32> to vector<2x8xf32>
    %68 = vector.shape_cast %67 : vector<2x8xf32> to vector<2x8x1xf32>
    %69 = tpu.reciprocal %68 {approx = true} : vector<2x8x1xf32> -> vector<2x8x1xf32>
    %70 = vector.broadcast %69 : vector<2x8x1xf32> to vector<2x8x8xf32>
    %71 = arith.mulf %66, %70 : vector<2x8x8xf32>
    %72 = arith.truncf %71 : vector<2x8x8xf32> to vector<2x8x8xbf16>
    %73 = vector.extract_strided_slice %53 {offsets = [0, 0, 0], sizes = [2, 8, 8], strides = [1, 1, 1]} : vector<2x8x32xbf16> to vector<2x8x8xbf16>
    "tpu.trace_start"() <{level = 10 : i32, message = "bqk,bkd->bqd"}> : () -> ()
    %cst_42 = arith.constant dense<0.000000e+00> : vector<2x8x8xf32>
    %74 = tpu.matmul %72, %73, %cst_42 {dimension_numbers = #tpu.dot_dimension_numbers<[2], [1], [1], [2], [0, 0, 0, 1, 1, 2], [0], [0]>} : vector<2x8x8xbf16>, vector<2x8x8xbf16>, vector<2x8x8xf32> -> vector<2x8x8xf32>
    "tpu.trace_stop"() : () -> ()
    %75 = vector.shape_cast %74 : vector<2x8x8xf32> to vector<16x8xf32>
    %76 = arith.truncf %75 : vector<16x8xf32> to vector<16x8xbf16>
    %77 = vector.extract_strided_slice %55 {offsets = [0, 0, 0], sizes = [1, 8, 32], strides = [1, 1, 1]} : vector<4x8x32xbf16> to vector<1x8x32xbf16>
    %78 = vector.shape_cast %77 : vector<1x8x32xbf16> to vector<8x32xbf16>
    %cst_43 = arith.constant dense<0.000000e+00> : vector<16x32xf32>
    %79 = tpu.matmul %76, %78, %cst_43 {dimension_numbers = #tpu.dot_dimension_numbers<[1], [0], [0], [1], [0, 0, 1, 1], [], []>} : vector<16x8xbf16>, vector<8x32xbf16>, vector<16x32xf32> -> vector<16x32xf32>
    %80 = vector.extract_strided_slice %49 {offsets = [0, 0, 8], sizes = [2, 8, 8], strides = [1, 1, 1]} : vector<2x8x32xbf16> to vector<2x8x8xbf16>
    %81 = vector.extract_strided_slice %51 {offsets = [0, 0, 8], sizes = [2, 8, 8], strides = [1, 1, 1]} : vector<2x8x32xbf16> to vector<2x8x8xbf16>
    "tpu.trace_start"() <{level = 10 : i32, message = "bqd,bkd->bqk"}> : () -> ()
    %cst_44 = arith.constant dense<0.000000e+00> : vector<2x8x8xf32>
    %82 = tpu.matmul %80, %81, %cst_44 {dimension_numbers = #tpu.dot_dimension_numbers<[2], [2], [1], [1], [0, 0, 0, 1, 1, 1], [0], [0]>} : vector<2x8x8xbf16>, vector<2x8x8xbf16>, vector<2x8x8xf32> -> vector<2x8x8xf32>
    "tpu.trace_stop"() : () -> ()
    %cst_45 = arith.constant 0.353553385 : f32
    %83 = vector.broadcast %cst_45 : f32 to vector<2x8x8xf32>
    %84 = arith.mulf %82, %83 : vector<2x8x8xf32>
    %85 = arith.addf %84, %3 : vector<2x8x8xf32>
    %cst_46 = arith.constant dense<0xFF800000> : vector<2x8xf32>
    %86 = vector.multi_reduction <maximumf>, %85, %cst_46 [2] : vector<2x8x8xf32> to vector<2x8xf32>
    %87 = vector.shape_cast %86 : vector<2x8xf32> to vector<2x8x1xf32>
    %88 = vector.broadcast %87 : vector<2x8x1xf32> to vector<2x8x8xf32>
    %89 = arith.subf %85, %88 : vector<2x8x8xf32>
    %90 = math.exp %89 : vector<2x8x8xf32>
    %cst_47 = arith.constant dense<0.000000e+00> : vector<2x8xf32>
    %91 = vector.multi_reduction <add>, %90, %cst_47 [2] : vector<2x8x8xf32> to vector<2x8xf32>
    %92 = vector.shape_cast %91 : vector<2x8xf32> to vector<2x8x1xf32>
    %93 = tpu.reciprocal %92 {approx = true} : vector<2x8x1xf32> -> vector<2x8x1xf32>
    %94 = vector.broadcast %93 : vector<2x8x1xf32> to vector<2x8x8xf32>
    %95 = arith.mulf %90, %94 : vector<2x8x8xf32>
    %96 = arith.truncf %95 : vector<2x8x8xf32> to vector<2x8x8xbf16>
    %97 = vector.extract_strided_slice %53 {offsets = [0, 0, 8], sizes = [2, 8, 8], strides = [1, 1, 1]} : vector<2x8x32xbf16> to vector<2x8x8xbf16>
    "tpu.trace_start"() <{level = 10 : i32, message = "bqk,bkd->bqd"}> : () -> ()
    %cst_48 = arith.constant dense<0.000000e+00> : vector<2x8x8xf32>
    %98 = tpu.matmul %96, %97, %cst_48 {dimension_numbers = #tpu.dot_dimension_numbers<[2], [1], [1], [2], [0, 0, 0, 1, 1, 2], [0], [0]>} : vector<2x8x8xbf16>, vector<2x8x8xbf16>, vector<2x8x8xf32> -> vector<2x8x8xf32>
    "tpu.trace_stop"() : () -> ()
    %99 = vector.shape_cast %98 : vector<2x8x8xf32> to vector<16x8xf32>
    %100 = arith.truncf %99 : vector<16x8xf32> to vector<16x8xbf16>
    %101 = vector.extract_strided_slice %55 {offsets = [1, 0, 0], sizes = [1, 8, 32], strides = [1, 1, 1]} : vector<4x8x32xbf16> to vector<1x8x32xbf16>
    %102 = vector.shape_cast %101 : vector<1x8x32xbf16> to vector<8x32xbf16>
    %cst_49 = arith.constant dense<0.000000e+00> : vector<16x32xf32>
    %103 = tpu.matmul %100, %102, %cst_49 {dimension_numbers = #tpu.dot_dimension_numbers<[1], [0], [0], [1], [0, 0, 1, 1], [], []>} : vector<16x8xbf16>, vector<8x32xbf16>, vector<16x32xf32> -> vector<16x32xf32>
    %104 = arith.addf %79, %103 : vector<16x32xf32>
    %105 = vector.extract_strided_slice %49 {offsets = [0, 0, 16], sizes = [2, 8, 8], strides = [1, 1, 1]} : vector<2x8x32xbf16> to vector<2x8x8xbf16>
    %106 = vector.extract_strided_slice %51 {offsets = [0, 0, 16], sizes = [2, 8, 8], strides = [1, 1, 1]} : vector<2x8x32xbf16> to vector<2x8x8xbf16>
    "tpu.trace_start"() <{level = 10 : i32, message = "bqd,bkd->bqk"}> : () -> ()
    %cst_50 = arith.constant dense<0.000000e+00> : vector<2x8x8xf32>
    %107 = tpu.matmul %105, %106, %cst_50 {dimension_numbers = #tpu.dot_dimension_numbers<[2], [2], [1], [1], [0, 0, 0, 1, 1, 1], [0], [0]>} : vector<2x8x8xbf16>, vector<2x8x8xbf16>, vector<2x8x8xf32> -> vector<2x8x8xf32>
    "tpu.trace_stop"() : () -> ()
    %cst_51 = arith.constant 0.353553385 : f32
    %108 = vector.broadcast %cst_51 : f32 to vector<2x8x8xf32>
    %109 = arith.mulf %107, %108 : vector<2x8x8xf32>
    %110 = arith.addf %109, %3 : vector<2x8x8xf32>
    %cst_52 = arith.constant dense<0xFF800000> : vector<2x8xf32>
    %111 = vector.multi_reduction <maximumf>, %110, %cst_52 [2] : vector<2x8x8xf32> to vector<2x8xf32>
    %112 = vector.shape_cast %111 : vector<2x8xf32> to vector<2x8x1xf32>
    %113 = vector.broadcast %112 : vector<2x8x1xf32> to vector<2x8x8xf32>
    %114 = arith.subf %110, %113 : vector<2x8x8xf32>
    %115 = math.exp %114 : vector<2x8x8xf32>
    %cst_53 = arith.constant dense<0.000000e+00> : vector<2x8xf32>
    %116 = vector.multi_reduction <add>, %115, %cst_53 [2] : vector<2x8x8xf32> to vector<2x8xf32>
    %117 = vector.shape_cast %116 : vector<2x8xf32> to vector<2x8x1xf32>
    %118 = tpu.reciprocal %117 {approx = true} : vector<2x8x1xf32> -> vector<2x8x1xf32>
    %119 = vector.broadcast %118 : vector<2x8x1xf32> to vector<2x8x8xf32>
    %120 = arith.mulf %115, %119 : vector<2x8x8xf32>
    %121 = arith.truncf %120 : vector<2x8x8xf32> to vector<2x8x8xbf16>
    %122 = vector.extract_strided_slice %53 {offsets = [0, 0, 16], sizes = [2, 8, 8], strides = [1, 1, 1]} : vector<2x8x32xbf16> to vector<2x8x8xbf16>
    "tpu.trace_start"() <{level = 10 : i32, message = "bqk,bkd->bqd"}> : () -> ()
    %cst_54 = arith.constant dense<0.000000e+00> : vector<2x8x8xf32>
    %123 = tpu.matmul %121, %122, %cst_54 {dimension_numbers = #tpu.dot_dimension_numbers<[2], [1], [1], [2], [0, 0, 0, 1, 1, 2], [0], [0]>} : vector<2x8x8xbf16>, vector<2x8x8xbf16>, vector<2x8x8xf32> -> vector<2x8x8xf32>
    "tpu.trace_stop"() : () -> ()
    %124 = vector.shape_cast %123 : vector<2x8x8xf32> to vector<16x8xf32>
    %125 = arith.truncf %124 : vector<16x8xf32> to vector<16x8xbf16>
    %126 = vector.extract_strided_slice %55 {offsets = [2, 0, 0], sizes = [1, 8, 32], strides = [1, 1, 1]} : vector<4x8x32xbf16> to vector<1x8x32xbf16>
    %127 = vector.shape_cast %126 : vector<1x8x32xbf16> to vector<8x32xbf16>
    %cst_55 = arith.constant dense<0.000000e+00> : vector<16x32xf32>
    %128 = tpu.matmul %125, %127, %cst_55 {dimension_numbers = #tpu.dot_dimension_numbers<[1], [0], [0], [1], [0, 0, 1, 1], [], []>} : vector<16x8xbf16>, vector<8x32xbf16>, vector<16x32xf32> -> vector<16x32xf32>
    %129 = arith.addf %104, %128 : vector<16x32xf32>
    %130 = vector.extract_strided_slice %49 {offsets = [0, 0, 24], sizes = [2, 8, 8], strides = [1, 1, 1]} : vector<2x8x32xbf16> to vector<2x8x8xbf16>
    %131 = vector.extract_strided_slice %51 {offsets = [0, 0, 24], sizes = [2, 8, 8], strides = [1, 1, 1]} : vector<2x8x32xbf16> to vector<2x8x8xbf16>
    "tpu.trace_start"() <{level = 10 : i32, message = "bqd,bkd->bqk"}> : () -> ()
    %cst_56 = arith.constant dense<0.000000e+00> : vector<2x8x8xf32>
    %132 = tpu.matmul %130, %131, %cst_56 {dimension_numbers = #tpu.dot_dimension_numbers<[2], [2], [1], [1], [0, 0, 0, 1, 1, 1], [0], [0]>} : vector<2x8x8xbf16>, vector<2x8x8xbf16>, vector<2x8x8xf32> -> vector<2x8x8xf32>
    "tpu.trace_stop"() : () -> ()
    %cst_57 = arith.constant 0.353553385 : f32
    %133 = vector.broadcast %cst_57 : f32 to vector<2x8x8xf32>
    %134 = arith.mulf %132, %133 : vector<2x8x8xf32>
    %135 = arith.addf %134, %3 : vector<2x8x8xf32>
    %cst_58 = arith.constant dense<0xFF800000> : vector<2x8xf32>
    %136 = vector.multi_reduction <maximumf>, %135, %cst_58 [2] : vector<2x8x8xf32> to vector<2x8xf32>
    %137 = vector.shape_cast %136 : vector<2x8xf32> to vector<2x8x1xf32>
    %138 = vector.broadcast %137 : vector<2x8x1xf32> to vector<2x8x8xf32>
    %139 = arith.subf %135, %138 : vector<2x8x8xf32>
    %140 = math.exp %139 : vector<2x8x8xf32>
    %cst_59 = arith.constant dense<0.000000e+00> : vector<2x8xf32>
    %141 = vector.multi_reduction <add>, %140, %cst_59 [2] : vector<2x8x8xf32> to vector<2x8xf32>
    %142 = vector.shape_cast %141 : vector<2x8xf32> to vector<2x8x1xf32>
    %143 = tpu.reciprocal %142 {approx = true} : vector<2x8x1xf32> -> vector<2x8x1xf32>
    %144 = vector.broadcast %143 : vector<2x8x1xf32> to vector<2x8x8xf32>
    %145 = arith.mulf %140, %144 : vector<2x8x8xf32>
    %146 = arith.truncf %145 : vector<2x8x8xf32> to vector<2x8x8xbf16>
    %147 = vector.extract_strided_slice %53 {offsets = [0, 0, 24], sizes = [2, 8, 8], strides = [1, 1, 1]} : vector<2x8x32xbf16> to vector<2x8x8xbf16>
    "tpu.trace_start"() <{level = 10 : i32, message = "bqk,bkd->bqd"}> : () -> ()
    %cst_60 = arith.constant dense<0.000000e+00> : vector<2x8x8xf32>
    %148 = tpu.matmul %146, %147, %cst_60 {dimension_numbers = #tpu.dot_dimension_numbers<[2], [1], [1], [2], [0, 0, 0, 1, 1, 2], [0], [0]>} : vector<2x8x8xbf16>, vector<2x8x8xbf16>, vector<2x8x8xf32> -> vector<2x8x8xf32>
    "tpu.trace_stop"() : () -> ()
    %149 = vector.shape_cast %148 : vector<2x8x8xf32> to vector<16x8xf32>
    %150 = arith.truncf %149 : vector<16x8xf32> to vector<16x8xbf16>
    %151 = vector.extract_strided_slice %55 {offsets = [3, 0, 0], sizes = [1, 8, 32], strides = [1, 1, 1]} : vector<4x8x32xbf16> to vector<1x8x32xbf16>
    %152 = vector.shape_cast %151 : vector<1x8x32xbf16> to vector<8x32xbf16>
    %cst_61 = arith.constant dense<0.000000e+00> : vector<16x32xf32>
    %153 = tpu.matmul %150, %152, %cst_61 {dimension_numbers = #tpu.dot_dimension_numbers<[1], [0], [0], [1], [0, 0, 1, 1], [], []>} : vector<16x8xbf16>, vector<8x32xbf16>, vector<16x32xf32> -> vector<16x32xf32>
    %154 = arith.addf %129, %153 : vector<16x32xf32>
    %155 = arith.addf %1, %154 : vector<16x32xf32>
    %c0_62 = arith.constant 0 : index
    %c0_63 = arith.constant 0 : index
    %c0_64 = arith.constant 0 : index
    %156 = vector.load %arg9[%c0_62, %c0_63, %c0_64] : memref<2x1x32xf32, #tpu.memory_space<vmem>>, vector<1x1x32xf32>
    %157 = vector.shape_cast %156 : vector<1x1x32xf32> to vector<1x32xf32>
    %158 = vector.broadcast %157 : vector<1x32xf32> to vector<16x32xf32>
    %159 = arith.addf %155, %158 : vector<16x32xf32>
    %160 = vector.extract_strided_slice %4 {offsets = [0, 1, 0, 0], sizes = [1, 1, 1, 32], strides = [1, 1, 1, 1]} : vector<2x3x1x32xf32> to vector<1x1x1x32xf32>
    %161 = vector.shape_cast %160 : vector<1x1x1x32xf32> to vector<1x32xf32>
    %162 = vector.extract_strided_slice %5 {offsets = [0, 1, 0, 0], sizes = [1, 1, 1, 32], strides = [1, 1, 1, 1]} : vector<2x3x1x32xf32> to vector<1x1x1x32xf32>
    %163 = vector.shape_cast %162 : vector<1x1x1x32xf32> to vector<1x32xf32>
    %cst_65 = arith.constant dense<0.000000e+00> : vector<16xf32>
    %164 = vector.multi_reduction <add>, %159, %cst_65 [1] : vector<16x32xf32> to vector<16xf32>
    %165 = vector.shape_cast %164 : vector<16xf32> to vector<16x1xf32>
    %cst_66 = arith.constant 3.200000e+01 : f32
    %166 = vector.broadcast %cst_66 : f32 to vector<16x1xf32>
    %167 = arith.divf %165, %166 : vector<16x1xf32>
    %168 = vector.broadcast %167 : vector<16x1xf32> to vector<16x32xf32>
    %169 = arith.subf %159, %168 : vector<16x32xf32>
    %170 = arith.mulf %169, %169 : vector<16x32xf32>
    %cst_67 = arith.constant dense<0.000000e+00> : vector<16xf32>
    %171 = vector.multi_reduction <add>, %170, %cst_67 [1] : vector<16x32xf32> to vector<16xf32>
    %172 = vector.shape_cast %171 : vector<16xf32> to vector<16x1xf32>
    %cst_68 = arith.constant 3.200000e+01 : f32
    %173 = vector.broadcast %cst_68 : f32 to vector<16x1xf32>
    %174 = arith.divf %172, %173 : vector<16x1xf32>
    %175 = vector.broadcast %167 : vector<16x1xf32> to vector<16x32xf32>
    %176 = arith.subf %159, %175 : vector<16x32xf32>
    %cst_69 = arith.constant 9.99999997E-7 : f32
    %177 = vector.broadcast %cst_69 : f32 to vector<16x1xf32>
    %178 = arith.addf %174, %177 : vector<16x1xf32>
    %179 = math.rsqrt %178 : vector<16x1xf32>
    %180 = vector.broadcast %179 : vector<16x1xf32> to vector<16x32xf32>
    %181 = arith.mulf %176, %180 : vector<16x32xf32>
    %182 = vector.broadcast %161 : vector<1x32xf32> to vector<16x32xf32>
    %183 = arith.mulf %181, %182 : vector<16x32xf32>
    %184 = vector.broadcast %163 : vector<1x32xf32> to vector<16x32xf32>
    %185 = arith.addf %183, %184 : vector<16x32xf32>
    %186 = arith.truncf %185 : vector<16x32xf32> to vector<16x32xbf16>
    %c0_70 = arith.constant 0 : index
    %c0_71 = arith.constant 0 : index
    %c0_72 = arith.constant 0 : index
    %187 = vector.load %arg10[%c0_70, %c0_71, %c0_72] : memref<2x32x32xbf16, #tpu.memory_space<vmem>>, vector<1x32x32xbf16>
    %188 = vector.shape_cast %187 : vector<1x32x32xbf16> to vector<32x32xbf16>
    %cst_73 = arith.constant dense<0.000000e+00> : vector<16x32xf32>
    %189 = tpu.matmul %186, %188, %cst_73 {dimension_numbers = #tpu.dot_dimension_numbers<[1], [0], [0], [1], [0, 0, 1, 1], [], []>} : vector<16x32xbf16>, vector<32x32xbf16>, vector<16x32xf32> -> vector<16x32xf32>
    %c0_74 = arith.constant 0 : index
    %c0_75 = arith.constant 0 : index
    %c0_76 = arith.constant 0 : index
    %190 = vector.load %arg11[%c0_74, %c0_75, %c0_76] : memref<2x1x32xf32, #tpu.memory_space<vmem>>, vector<1x1x32xf32>
    %191 = vector.shape_cast %190 : vector<1x1x32xf32> to vector<1x32xf32>
    %192 = vector.broadcast %191 : vector<1x32xf32> to vector<16x32xf32>
    %193 = arith.addf %189, %192 : vector<16x32xf32>
    %194 = arith.truncf %193 : vector<16x32xf32> to vector<16x32xbf16>
    %195 = vector.shape_cast %194 : vector<16x32xbf16> to vector<2x8x32xbf16>
    %196 = vector.extract_strided_slice %12 {offsets = [0, 0], sizes = [32, 32], strides = [1, 1]} : vector<32x128xbf16> to vector<32x32xbf16>
    %197 = vector.shape_cast %196 : vector<32x32xbf16> to vector<2x16x32xbf16>
    %198 = vector.extract_strided_slice %12 {offsets = [0, 32], sizes = [32, 32], strides = [1, 1]} : vector<32x128xbf16> to vector<32x32xbf16>
    %199 = vector.shape_cast %198 : vector<32x32xbf16> to vector<2x16x32xbf16>
    %c0_77 = arith.constant 0 : index
    %c0_78 = arith.constant 0 : index
    %c0_79 = arith.constant 0 : index
    %c0_80 = arith.constant 0 : index
    %200 = vector.load %arg14[%c0_77, %c0_78, %c0_79, %c0_80] : memref<2x4x8x32xbf16, #tpu.memory_space<vmem>>, vector<1x4x8x32xbf16>
    %201 = vector.shape_cast %200 : vector<1x4x8x32xbf16> to vector<4x8x32xbf16>
    %202 = vector.extract_strided_slice %195 {offsets = [0, 0, 0], sizes = [2, 8, 8], strides = [1, 1, 1]} : vector<2x8x32xbf16> to vector<2x8x8xbf16>
    %203 = vector.extract_strided_slice %197 {offsets = [0, 0, 0], sizes = [2, 16, 8], strides = [1, 1, 1]} : vector<2x16x32xbf16> to vector<2x16x8xbf16>
    "tpu.trace_start"() <{level = 10 : i32, message = "bqd,bkd->bqk"}> : () -> ()
    %cst_81 = arith.constant dense<0.000000e+00> : vector<2x8x16xf32>
    %204 = tpu.matmul %202, %203, %cst_81 {dimension_numbers = #tpu.dot_dimension_numbers<[2], [2], [1], [1], [0, 0, 0, 1, 1, 1], [0], [0]>} : vector<2x8x8xbf16>, vector<2x16x8xbf16>, vector<2x8x16xf32> -> vector<2x8x16xf32>
    "tpu.trace_stop"() : () -> ()
    %cst_82 = arith.constant 0.353553385 : f32
    %205 = vector.broadcast %cst_82 : f32 to vector<2x8x16xf32>
    %206 = arith.mulf %204, %205 : vector<2x8x16xf32>
    %207 = arith.addf %206, %2 : vector<2x8x16xf32>
    %cst_83 = arith.constant dense<0xFF800000> : vector<2x8xf32>
    %208 = vector.multi_reduction <maximumf>, %207, %cst_83 [2] : vector<2x8x16xf32> to vector<2x8xf32>
    %209 = vector.shape_cast %208 : vector<2x8xf32> to vector<2x8x1xf32>
    %210 = vector.broadcast %209 : vector<2x8x1xf32> to vector<2x8x16xf32>
    %211 = arith.subf %207, %210 : vector<2x8x16xf32>
    %212 = math.exp %211 : vector<2x8x16xf32>
    %cst_84 = arith.constant dense<0.000000e+00> : vector<2x8xf32>
    %213 = vector.multi_reduction <add>, %212, %cst_84 [2] : vector<2x8x16xf32> to vector<2x8xf32>
    %214 = vector.shape_cast %213 : vector<2x8xf32> to vector<2x8x1xf32>
    %215 = tpu.reciprocal %214 {approx = true} : vector<2x8x1xf32> -> vector<2x8x1xf32>
    %216 = vector.broadcast %215 : vector<2x8x1xf32> to vector<2x8x16xf32>
    %217 = arith.mulf %212, %216 : vector<2x8x16xf32>
    %218 = arith.truncf %217 : vector<2x8x16xf32> to vector<2x8x16xbf16>
    %219 = vector.extract_strided_slice %199 {offsets = [0, 0, 0], sizes = [2, 16, 8], strides = [1, 1, 1]} : vector<2x16x32xbf16> to vector<2x16x8xbf16>
    "tpu.trace_start"() <{level = 10 : i32, message = "bqk,bkd->bqd"}> : () -> ()
    %cst_85 = arith.constant dense<0.000000e+00> : vector<2x8x8xf32>
    %220 = tpu.matmul %218, %219, %cst_85 {dimension_numbers = #tpu.dot_dimension_numbers<[2], [1], [1], [2], [0, 0, 0, 1, 1, 2], [0], [0]>} : vector<2x8x16xbf16>, vector<2x16x8xbf16>, vector<2x8x8xf32> -> vector<2x8x8xf32>
    "tpu.trace_stop"() : () -> ()
    %221 = vector.shape_cast %220 : vector<2x8x8xf32> to vector<16x8xf32>
    %222 = arith.truncf %221 : vector<16x8xf32> to vector<16x8xbf16>
    %223 = vector.extract_strided_slice %201 {offsets = [0, 0, 0], sizes = [1, 8, 32], strides = [1, 1, 1]} : vector<4x8x32xbf16> to vector<1x8x32xbf16>
    %224 = vector.shape_cast %223 : vector<1x8x32xbf16> to vector<8x32xbf16>
    %cst_86 = arith.constant dense<0.000000e+00> : vector<16x32xf32>
    %225 = tpu.matmul %222, %224, %cst_86 {dimension_numbers = #tpu.dot_dimension_numbers<[1], [0], [0], [1], [0, 0, 1, 1], [], []>} : vector<16x8xbf16>, vector<8x32xbf16>, vector<16x32xf32> -> vector<16x32xf32>
    %226 = vector.extract_strided_slice %195 {offsets = [0, 0, 8], sizes = [2, 8, 8], strides = [1, 1, 1]} : vector<2x8x32xbf16> to vector<2x8x8xbf16>
    %227 = vector.extract_strided_slice %197 {offsets = [0, 0, 8], sizes = [2, 16, 8], strides = [1, 1, 1]} : vector<2x16x32xbf16> to vector<2x16x8xbf16>
    "tpu.trace_start"() <{level = 10 : i32, message = "bqd,bkd->bqk"}> : () -> ()
    %cst_87 = arith.constant dense<0.000000e+00> : vector<2x8x16xf32>
    %228 = tpu.matmul %226, %227, %cst_87 {dimension_numbers = #tpu.dot_dimension_numbers<[2], [2], [1], [1], [0, 0, 0, 1, 1, 1], [0], [0]>} : vector<2x8x8xbf16>, vector<2x16x8xbf16>, vector<2x8x16xf32> -> vector<2x8x16xf32>
    "tpu.trace_stop"() : () -> ()
    %cst_88 = arith.constant 0.353553385 : f32
    %229 = vector.broadcast %cst_88 : f32 to vector<2x8x16xf32>
    %230 = arith.mulf %228, %229 : vector<2x8x16xf32>
    %231 = arith.addf %230, %2 : vector<2x8x16xf32>
    %cst_89 = arith.constant dense<0xFF800000> : vector<2x8xf32>
    %232 = vector.multi_reduction <maximumf>, %231, %cst_89 [2] : vector<2x8x16xf32> to vector<2x8xf32>
    %233 = vector.shape_cast %232 : vector<2x8xf32> to vector<2x8x1xf32>
    %234 = vector.broadcast %233 : vector<2x8x1xf32> to vector<2x8x16xf32>
    %235 = arith.subf %231, %234 : vector<2x8x16xf32>
    %236 = math.exp %235 : vector<2x8x16xf32>
    %cst_90 = arith.constant dense<0.000000e+00> : vector<2x8xf32>
    %237 = vector.multi_reduction <add>, %236, %cst_90 [2] : vector<2x8x16xf32> to vector<2x8xf32>
    %238 = vector.shape_cast %237 : vector<2x8xf32> to vector<2x8x1xf32>
    %239 = tpu.reciprocal %238 {approx = true} : vector<2x8x1xf32> -> vector<2x8x1xf32>
    %240 = vector.broadcast %239 : vector<2x8x1xf32> to vector<2x8x16xf32>
    %241 = arith.mulf %236, %240 : vector<2x8x16xf32>
    %242 = arith.truncf %241 : vector<2x8x16xf32> to vector<2x8x16xbf16>
    %243 = vector.extract_strided_slice %199 {offsets = [0, 0, 8], sizes = [2, 16, 8], strides = [1, 1, 1]} : vector<2x16x32xbf16> to vector<2x16x8xbf16>
    "tpu.trace_start"() <{level = 10 : i32, message = "bqk,bkd->bqd"}> : () -> ()
    %cst_91 = arith.constant dense<0.000000e+00> : vector<2x8x8xf32>
    %244 = tpu.matmul %242, %243, %cst_91 {dimension_numbers = #tpu.dot_dimension_numbers<[2], [1], [1], [2], [0, 0, 0, 1, 1, 2], [0], [0]>} : vector<2x8x16xbf16>, vector<2x16x8xbf16>, vector<2x8x8xf32> -> vector<2x8x8xf32>
    "tpu.trace_stop"() : () -> ()
    %245 = vector.shape_cast %244 : vector<2x8x8xf32> to vector<16x8xf32>
    %246 = arith.truncf %245 : vector<16x8xf32> to vector<16x8xbf16>
    %247 = vector.extract_strided_slice %201 {offsets = [1, 0, 0], sizes = [1, 8, 32], strides = [1, 1, 1]} : vector<4x8x32xbf16> to vector<1x8x32xbf16>
    %248 = vector.shape_cast %247 : vector<1x8x32xbf16> to vector<8x32xbf16>
    %cst_92 = arith.constant dense<0.000000e+00> : vector<16x32xf32>
    %249 = tpu.matmul %246, %248, %cst_92 {dimension_numbers = #tpu.dot_dimension_numbers<[1], [0], [0], [1], [0, 0, 1, 1], [], []>} : vector<16x8xbf16>, vector<8x32xbf16>, vector<16x32xf32> -> vector<16x32xf32>
    %250 = arith.addf %225, %249 : vector<16x32xf32>
    %251 = vector.extract_strided_slice %195 {offsets = [0, 0, 16], sizes = [2, 8, 8], strides = [1, 1, 1]} : vector<2x8x32xbf16> to vector<2x8x8xbf16>
    %252 = vector.extract_strided_slice %197 {offsets = [0, 0, 16], sizes = [2, 16, 8], strides = [1, 1, 1]} : vector<2x16x32xbf16> to vector<2x16x8xbf16>
    "tpu.trace_start"() <{level = 10 : i32, message = "bqd,bkd->bqk"}> : () -> ()
    %cst_93 = arith.constant dense<0.000000e+00> : vector<2x8x16xf32>
    %253 = tpu.matmul %251, %252, %cst_93 {dimension_numbers = #tpu.dot_dimension_numbers<[2], [2], [1], [1], [0, 0, 0, 1, 1, 1], [0], [0]>} : vector<2x8x8xbf16>, vector<2x16x8xbf16>, vector<2x8x16xf32> -> vector<2x8x16xf32>
    "tpu.trace_stop"() : () -> ()
    %cst_94 = arith.constant 0.353553385 : f32
    %254 = vector.broadcast %cst_94 : f32 to vector<2x8x16xf32>
    %255 = arith.mulf %253, %254 : vector<2x8x16xf32>
    %256 = arith.addf %255, %2 : vector<2x8x16xf32>
    %cst_95 = arith.constant dense<0xFF800000> : vector<2x8xf32>
    %257 = vector.multi_reduction <maximumf>, %256, %cst_95 [2] : vector<2x8x16xf32> to vector<2x8xf32>
    %258 = vector.shape_cast %257 : vector<2x8xf32> to vector<2x8x1xf32>
    %259 = vector.broadcast %258 : vector<2x8x1xf32> to vector<2x8x16xf32>
    %260 = arith.subf %256, %259 : vector<2x8x16xf32>
    %261 = math.exp %260 : vector<2x8x16xf32>
    %cst_96 = arith.constant dense<0.000000e+00> : vector<2x8xf32>
    %262 = vector.multi_reduction <add>, %261, %cst_96 [2] : vector<2x8x16xf32> to vector<2x8xf32>
    %263 = vector.shape_cast %262 : vector<2x8xf32> to vector<2x8x1xf32>
    %264 = tpu.reciprocal %263 {approx = true} : vector<2x8x1xf32> -> vector<2x8x1xf32>
    %265 = vector.broadcast %264 : vector<2x8x1xf32> to vector<2x8x16xf32>
    %266 = arith.mulf %261, %265 : vector<2x8x16xf32>
    %267 = arith.truncf %266 : vector<2x8x16xf32> to vector<2x8x16xbf16>
    %268 = vector.extract_strided_slice %199 {offsets = [0, 0, 16], sizes = [2, 16, 8], strides = [1, 1, 1]} : vector<2x16x32xbf16> to vector<2x16x8xbf16>
    "tpu.trace_start"() <{level = 10 : i32, message = "bqk,bkd->bqd"}> : () -> ()
    %cst_97 = arith.constant dense<0.000000e+00> : vector<2x8x8xf32>
    %269 = tpu.matmul %267, %268, %cst_97 {dimension_numbers = #tpu.dot_dimension_numbers<[2], [1], [1], [2], [0, 0, 0, 1, 1, 2], [0], [0]>} : vector<2x8x16xbf16>, vector<2x16x8xbf16>, vector<2x8x8xf32> -> vector<2x8x8xf32>
    "tpu.trace_stop"() : () -> ()
    %270 = vector.shape_cast %269 : vector<2x8x8xf32> to vector<16x8xf32>
    %271 = arith.truncf %270 : vector<16x8xf32> to vector<16x8xbf16>
    %272 = vector.extract_strided_slice %201 {offsets = [2, 0, 0], sizes = [1, 8, 32], strides = [1, 1, 1]} : vector<4x8x32xbf16> to vector<1x8x32xbf16>
    %273 = vector.shape_cast %272 : vector<1x8x32xbf16> to vector<8x32xbf16>
    %cst_98 = arith.constant dense<0.000000e+00> : vector<16x32xf32>
    %274 = tpu.matmul %271, %273, %cst_98 {dimension_numbers = #tpu.dot_dimension_numbers<[1], [0], [0], [1], [0, 0, 1, 1], [], []>} : vector<16x8xbf16>, vector<8x32xbf16>, vector<16x32xf32> -> vector<16x32xf32>
    %275 = arith.addf %250, %274 : vector<16x32xf32>
    %276 = vector.extract_strided_slice %195 {offsets = [0, 0, 24], sizes = [2, 8, 8], strides = [1, 1, 1]} : vector<2x8x32xbf16> to vector<2x8x8xbf16>
    %277 = vector.extract_strided_slice %197 {offsets = [0, 0, 24], sizes = [2, 16, 8], strides = [1, 1, 1]} : vector<2x16x32xbf16> to vector<2x16x8xbf16>
    "tpu.trace_start"() <{level = 10 : i32, message = "bqd,bkd->bqk"}> : () -> ()
    %cst_99 = arith.constant dense<0.000000e+00> : vector<2x8x16xf32>
    %278 = tpu.matmul %276, %277, %cst_99 {dimension_numbers = #tpu.dot_dimension_numbers<[2], [2], [1], [1], [0, 0, 0, 1, 1, 1], [0], [0]>} : vector<2x8x8xbf16>, vector<2x16x8xbf16>, vector<2x8x16xf32> -> vector<2x8x16xf32>
    "tpu.trace_stop"() : () -> ()
    %cst_100 = arith.constant 0.353553385 : f32
    %279 = vector.broadcast %cst_100 : f32 to vector<2x8x16xf32>
    %280 = arith.mulf %278, %279 : vector<2x8x16xf32>
    %281 = arith.addf %280, %2 : vector<2x8x16xf32>
    %cst_101 = arith.constant dense<0xFF800000> : vector<2x8xf32>
    %282 = vector.multi_reduction <maximumf>, %281, %cst_101 [2] : vector<2x8x16xf32> to vector<2x8xf32>
    %283 = vector.shape_cast %282 : vector<2x8xf32> to vector<2x8x1xf32>
    %284 = vector.broadcast %283 : vector<2x8x1xf32> to vector<2x8x16xf32>
    %285 = arith.subf %281, %284 : vector<2x8x16xf32>
    %286 = math.exp %285 : vector<2x8x16xf32>
    %cst_102 = arith.constant dense<0.000000e+00> : vector<2x8xf32>
    %287 = vector.multi_reduction <add>, %286, %cst_102 [2] : vector<2x8x16xf32> to vector<2x8xf32>
    %288 = vector.shape_cast %287 : vector<2x8xf32> to vector<2x8x1xf32>
    %289 = tpu.reciprocal %288 {approx = true} : vector<2x8x1xf32> -> vector<2x8x1xf32>
    %290 = vector.broadcast %289 : vector<2x8x1xf32> to vector<2x8x16xf32>
    %291 = arith.mulf %286, %290 : vector<2x8x16xf32>
    %292 = arith.truncf %291 : vector<2x8x16xf32> to vector<2x8x16xbf16>
    %293 = vector.extract_strided_slice %199 {offsets = [0, 0, 24], sizes = [2, 16, 8], strides = [1, 1, 1]} : vector<2x16x32xbf16> to vector<2x16x8xbf16>
    "tpu.trace_start"() <{level = 10 : i32, message = "bqk,bkd->bqd"}> : () -> ()
    %cst_103 = arith.constant dense<0.000000e+00> : vector<2x8x8xf32>
    %294 = tpu.matmul %292, %293, %cst_103 {dimension_numbers = #tpu.dot_dimension_numbers<[2], [1], [1], [2], [0, 0, 0, 1, 1, 2], [0], [0]>} : vector<2x8x16xbf16>, vector<2x16x8xbf16>, vector<2x8x8xf32> -> vector<2x8x8xf32>
    "tpu.trace_stop"() : () -> ()
    %295 = vector.shape_cast %294 : vector<2x8x8xf32> to vector<16x8xf32>
    %296 = arith.truncf %295 : vector<16x8xf32> to vector<16x8xbf16>
    %297 = vector.extract_strided_slice %201 {offsets = [3, 0, 0], sizes = [1, 8, 32], strides = [1, 1, 1]} : vector<4x8x32xbf16> to vector<1x8x32xbf16>
    %298 = vector.shape_cast %297 : vector<1x8x32xbf16> to vector<8x32xbf16>
    %cst_104 = arith.constant dense<0.000000e+00> : vector<16x32xf32>
    %299 = tpu.matmul %296, %298, %cst_104 {dimension_numbers = #tpu.dot_dimension_numbers<[1], [0], [0], [1], [0, 0, 1, 1], [], []>} : vector<16x8xbf16>, vector<8x32xbf16>, vector<16x32xf32> -> vector<16x32xf32>
    %300 = arith.addf %275, %299 : vector<16x32xf32>
    %301 = arith.addf %159, %300 : vector<16x32xf32>
    %c0_105 = arith.constant 0 : index
    %c0_106 = arith.constant 0 : index
    %c0_107 = arith.constant 0 : index
    %302 = vector.load %arg15[%c0_105, %c0_106, %c0_107] : memref<2x1x32xf32, #tpu.memory_space<vmem>>, vector<1x1x32xf32>
    %303 = vector.shape_cast %302 : vector<1x1x32xf32> to vector<1x32xf32>
    %304 = vector.broadcast %303 : vector<1x32xf32> to vector<16x32xf32>
    %305 = arith.addf %301, %304 : vector<16x32xf32>
    %306 = vector.extract_strided_slice %4 {offsets = [0, 2, 0, 0], sizes = [1, 1, 1, 32], strides = [1, 1, 1, 1]} : vector<2x3x1x32xf32> to vector<1x1x1x32xf32>
    %307 = vector.shape_cast %306 : vector<1x1x1x32xf32> to vector<1x32xf32>
    %308 = vector.extract_strided_slice %5 {offsets = [0, 2, 0, 0], sizes = [1, 1, 1, 32], strides = [1, 1, 1, 1]} : vector<2x3x1x32xf32> to vector<1x1x1x32xf32>
    %309 = vector.shape_cast %308 : vector<1x1x1x32xf32> to vector<1x32xf32>
    %cst_108 = arith.constant dense<0.000000e+00> : vector<16xf32>
    %310 = vector.multi_reduction <add>, %305, %cst_108 [1] : vector<16x32xf32> to vector<16xf32>
    %311 = vector.shape_cast %310 : vector<16xf32> to vector<16x1xf32>
    %cst_109 = arith.constant 3.200000e+01 : f32
    %312 = vector.broadcast %cst_109 : f32 to vector<16x1xf32>
    %313 = arith.divf %311, %312 : vector<16x1xf32>
    %314 = vector.broadcast %313 : vector<16x1xf32> to vector<16x32xf32>
    %315 = arith.subf %305, %314 : vector<16x32xf32>
    %316 = arith.mulf %315, %315 : vector<16x32xf32>
    %cst_110 = arith.constant dense<0.000000e+00> : vector<16xf32>
    %317 = vector.multi_reduction <add>, %316, %cst_110 [1] : vector<16x32xf32> to vector<16xf32>
    %318 = vector.shape_cast %317 : vector<16xf32> to vector<16x1xf32>
    %cst_111 = arith.constant 3.200000e+01 : f32
    %319 = vector.broadcast %cst_111 : f32 to vector<16x1xf32>
    %320 = arith.divf %318, %319 : vector<16x1xf32>
    %321 = vector.broadcast %313 : vector<16x1xf32> to vector<16x32xf32>
    %322 = arith.subf %305, %321 : vector<16x32xf32>
    %cst_112 = arith.constant 9.99999997E-7 : f32
    %323 = vector.broadcast %cst_112 : f32 to vector<16x1xf32>
    %324 = arith.addf %320, %323 : vector<16x1xf32>
    %325 = math.rsqrt %324 : vector<16x1xf32>
    %326 = vector.broadcast %325 : vector<16x1xf32> to vector<16x32xf32>
    %327 = arith.mulf %322, %326 : vector<16x32xf32>
    %328 = vector.broadcast %307 : vector<1x32xf32> to vector<16x32xf32>
    %329 = arith.mulf %327, %328 : vector<16x32xf32>
    %330 = vector.broadcast %309 : vector<1x32xf32> to vector<16x32xf32>
    %331 = arith.addf %329, %330 : vector<16x32xf32>
    %332 = arith.truncf %331 : vector<16x32xf32> to vector<16x32xbf16>
    %c0_113 = arith.constant 0 : index
    %c0_114 = arith.constant 0 : index
    %c0_115 = arith.constant 0 : index
    %333 = vector.load %arg16[%c0_113, %c0_114, %c0_115] : memref<2x32x128xbf16, #tpu.memory_space<vmem>>, vector<1x32x128xbf16>
    %334 = vector.shape_cast %333 : vector<1x32x128xbf16> to vector<32x128xbf16>
    %cst_116 = arith.constant dense<0.000000e+00> : vector<16x128xf32>
    %335 = tpu.matmul %332, %334, %cst_116 {dimension_numbers = #tpu.dot_dimension_numbers<[1], [0], [0], [1], [0, 0, 1, 1], [], []>} : vector<16x32xbf16>, vector<32x128xbf16>, vector<16x128xf32> -> vector<16x128xf32>
    %c0_117 = arith.constant 0 : index
    %c0_118 = arith.constant 0 : index
    %c0_119 = arith.constant 0 : index
    %336 = vector.load %arg17[%c0_117, %c0_118, %c0_119] : memref<2x1x128xf32, #tpu.memory_space<vmem>>, vector<1x1x128xf32>
    %337 = vector.shape_cast %336 : vector<1x1x128xf32> to vector<1x128xf32>
    %338 = vector.broadcast %337 : vector<1x128xf32> to vector<16x128xf32>
    %339 = arith.addf %335, %338 : vector<16x128xf32>
    %cst_120 = arith.constant 5.000000e-01 : f32
    %340 = vector.broadcast %cst_120 : f32 to vector<16x128xf32>
    %341 = arith.mulf %340, %339 : vector<16x128xf32>
    %cst_121 = arith.constant 4.471500e-02 : f32
    %342 = vector.broadcast %cst_121 : f32 to vector<16x128xf32>
    %343 = arith.mulf %342, %339 : vector<16x128xf32>
    %344 = arith.mulf %343, %339 : vector<16x128xf32>
    %345 = arith.mulf %344, %339 : vector<16x128xf32>
    %346 = arith.addf %339, %345 : vector<16x128xf32>
    %cst_122 = arith.constant 0.797884583 : f32
    %347 = vector.broadcast %cst_122 : f32 to vector<16x128xf32>
    %348 = arith.mulf %347, %346 : vector<16x128xf32>
    %349 = math.tanh %348 : vector<16x128xf32>
    %cst_123 = arith.constant 1.000000e+00 : f32
    %350 = vector.broadcast %cst_123 : f32 to vector<16x128xf32>
    %351 = arith.addf %350, %349 : vector<16x128xf32>
    %352 = arith.mulf %341, %351 : vector<16x128xf32>
    %353 = arith.truncf %352 : vector<16x128xf32> to vector<16x128xbf16>
    %c0_124 = arith.constant 0 : index
    %c0_125 = arith.constant 0 : index
    %c0_126 = arith.constant 0 : index
    %354 = vector.load %arg18[%c0_124, %c0_125, %c0_126] : memref<2x128x32xbf16, #tpu.memory_space<vmem>>, vector<1x128x32xbf16>
    %355 = vector.shape_cast %354 : vector<1x128x32xbf16> to vector<128x32xbf16>
    %cst_127 = arith.constant dense<0.000000e+00> : vector<16x32xf32>
    %356 = tpu.matmul %353, %355, %cst_127 {dimension_numbers = #tpu.dot_dimension_numbers<[1], [0], [0], [1], [0, 0, 1, 1], [], []>} : vector<16x128xbf16>, vector<128x32xbf16>, vector<16x32xf32> -> vector<16x32xf32>
    %357 = arith.addf %305, %356 : vector<16x32xf32>
    %c0_128 = arith.constant 0 : index
    %c0_129 = arith.constant 0 : index
    %c0_130 = arith.constant 0 : index
    %358 = vector.load %arg19[%c0_128, %c0_129, %c0_130] : memref<2x1x32xf32, #tpu.memory_space<vmem>>, vector<1x1x32xf32>
    %359 = vector.shape_cast %358 : vector<1x1x32xf32> to vector<1x32xf32>
    %360 = vector.broadcast %359 : vector<1x32xf32> to vector<16x32xf32>
    %361 = arith.addf %357, %360 : vector<16x32xf32>
    %362 = vector.extract_strided_slice %4 {offsets = [1, 0, 0, 0], sizes = [1, 1, 1, 32], strides = [1, 1, 1, 1]} : vector<2x3x1x32xf32> to vector<1x1x1x32xf32>
    %363 = vector.shape_cast %362 : vector<1x1x1x32xf32> to vector<1x32xf32>
    %364 = vector.extract_strided_slice %5 {offsets = [1, 0, 0, 0], sizes = [1, 1, 1, 32], strides = [1, 1, 1, 1]} : vector<2x3x1x32xf32> to vector<1x1x1x32xf32>
    %365 = vector.shape_cast %364 : vector<1x1x1x32xf32> to vector<1x32xf32>
    %cst_131 = arith.constant dense<0.000000e+00> : vector<16xf32>
    %366 = vector.multi_reduction <add>, %361, %cst_131 [1] : vector<16x32xf32> to vector<16xf32>
    %367 = vector.shape_cast %366 : vector<16xf32> to vector<16x1xf32>
    %cst_132 = arith.constant 3.200000e+01 : f32
    %368 = vector.broadcast %cst_132 : f32 to vector<16x1xf32>
    %369 = arith.divf %367, %368 : vector<16x1xf32>
    %370 = vector.broadcast %369 : vector<16x1xf32> to vector<16x32xf32>
    %371 = arith.subf %361, %370 : vector<16x32xf32>
    %372 = arith.mulf %371, %371 : vector<16x32xf32>
    %cst_133 = arith.constant dense<0.000000e+00> : vector<16xf32>
    %373 = vector.multi_reduction <add>, %372, %cst_133 [1] : vector<16x32xf32> to vector<16xf32>
    %374 = vector.shape_cast %373 : vector<16xf32> to vector<16x1xf32>
    %cst_134 = arith.constant 3.200000e+01 : f32
    %375 = vector.broadcast %cst_134 : f32 to vector<16x1xf32>
    %376 = arith.divf %374, %375 : vector<16x1xf32>
    %377 = vector.broadcast %369 : vector<16x1xf32> to vector<16x32xf32>
    %378 = arith.subf %361, %377 : vector<16x32xf32>
    %cst_135 = arith.constant 9.99999997E-7 : f32
    %379 = vector.broadcast %cst_135 : f32 to vector<16x1xf32>
    %380 = arith.addf %376, %379 : vector<16x1xf32>
    %381 = math.rsqrt %380 : vector<16x1xf32>
    %382 = vector.broadcast %381 : vector<16x1xf32> to vector<16x32xf32>
    %383 = arith.mulf %378, %382 : vector<16x32xf32>
    %384 = vector.broadcast %363 : vector<1x32xf32> to vector<16x32xf32>
    %385 = arith.mulf %383, %384 : vector<16x32xf32>
    %386 = vector.broadcast %365 : vector<1x32xf32> to vector<16x32xf32>
    %387 = arith.addf %385, %386 : vector<16x32xf32>
    %388 = arith.truncf %387 : vector<16x32xf32> to vector<16x32xbf16>
    %c1 = arith.constant 1 : index
    %c0_136 = arith.constant 0 : index
    %c0_137 = arith.constant 0 : index
    %389 = vector.load %arg6[%c1, %c0_136, %c0_137] : memref<2x32x96xbf16, #tpu.memory_space<vmem>>, vector<1x32x96xbf16>
    %390 = vector.shape_cast %389 : vector<1x32x96xbf16> to vector<32x96xbf16>
    %cst_138 = arith.constant dense<0.000000e+00> : vector<16x96xf32>
    %391 = tpu.matmul %388, %390, %cst_138 {dimension_numbers = #tpu.dot_dimension_numbers<[1], [0], [0], [1], [0, 0, 1, 1], [], []>} : vector<16x32xbf16>, vector<32x96xbf16>, vector<16x96xf32> -> vector<16x96xf32>
    %c1_139 = arith.constant 1 : index
    %c0_140 = arith.constant 0 : index
    %c0_141 = arith.constant 0 : index
    %392 = vector.load %arg7[%c1_139, %c0_140, %c0_141] : memref<2x1x96xf32, #tpu.memory_space<vmem>>, vector<1x1x96xf32>
    %393 = vector.shape_cast %392 : vector<1x1x96xf32> to vector<1x96xf32>
    %394 = vector.broadcast %393 : vector<1x96xf32> to vector<16x96xf32>
    %395 = arith.addf %391, %394 : vector<16x96xf32>
    %396 = arith.truncf %395 : vector<16x96xf32> to vector<16x96xbf16>
    %397 = vector.extract_strided_slice %396 {offsets = [0, 0], sizes = [16, 32], strides = [1, 1]} : vector<16x96xbf16> to vector<16x32xbf16>
    %398 = vector.shape_cast %397 : vector<16x32xbf16> to vector<2x8x32xbf16>
    %399 = vector.extract_strided_slice %396 {offsets = [0, 32], sizes = [16, 32], strides = [1, 1]} : vector<16x96xbf16> to vector<16x32xbf16>
    %400 = vector.shape_cast %399 : vector<16x32xbf16> to vector<2x8x32xbf16>
    %401 = vector.extract_strided_slice %396 {offsets = [0, 64], sizes = [16, 32], strides = [1, 1]} : vector<16x96xbf16> to vector<16x32xbf16>
    %402 = vector.shape_cast %401 : vector<16x32xbf16> to vector<2x8x32xbf16>
    %c1_142 = arith.constant 1 : index
    %c0_143 = arith.constant 0 : index
    %c0_144 = arith.constant 0 : index
    %c0_145 = arith.constant 0 : index
    %403 = vector.load %arg8[%c1_142, %c0_143, %c0_144, %c0_145] : memref<2x4x8x32xbf16, #tpu.memory_space<vmem>>, vector<1x4x8x32xbf16>
    %404 = vector.shape_cast %403 : vector<1x4x8x32xbf16> to vector<4x8x32xbf16>
    %405 = vector.extract_strided_slice %398 {offsets = [0, 0, 0], sizes = [2, 8, 8], strides = [1, 1, 1]} : vector<2x8x32xbf16> to vector<2x8x8xbf16>
    %406 = vector.extract_strided_slice %400 {offsets = [0, 0, 0], sizes = [2, 8, 8], strides = [1, 1, 1]} : vector<2x8x32xbf16> to vector<2x8x8xbf16>
    "tpu.trace_start"() <{level = 10 : i32, message = "bqd,bkd->bqk"}> : () -> ()
    %cst_146 = arith.constant dense<0.000000e+00> : vector<2x8x8xf32>
    %407 = tpu.matmul %405, %406, %cst_146 {dimension_numbers = #tpu.dot_dimension_numbers<[2], [2], [1], [1], [0, 0, 0, 1, 1, 1], [0], [0]>} : vector<2x8x8xbf16>, vector<2x8x8xbf16>, vector<2x8x8xf32> -> vector<2x8x8xf32>
    "tpu.trace_stop"() : () -> ()
    %cst_147 = arith.constant 0.353553385 : f32
    %408 = vector.broadcast %cst_147 : f32 to vector<2x8x8xf32>
    %409 = arith.mulf %407, %408 : vector<2x8x8xf32>
    %410 = arith.addf %409, %3 : vector<2x8x8xf32>
    %cst_148 = arith.constant dense<0xFF800000> : vector<2x8xf32>
    %411 = vector.multi_reduction <maximumf>, %410, %cst_148 [2] : vector<2x8x8xf32> to vector<2x8xf32>
    %412 = vector.shape_cast %411 : vector<2x8xf32> to vector<2x8x1xf32>
    %413 = vector.broadcast %412 : vector<2x8x1xf32> to vector<2x8x8xf32>
    %414 = arith.subf %410, %413 : vector<2x8x8xf32>
    %415 = math.exp %414 : vector<2x8x8xf32>
    %cst_149 = arith.constant dense<0.000000e+00> : vector<2x8xf32>
    %416 = vector.multi_reduction <add>, %415, %cst_149 [2] : vector<2x8x8xf32> to vector<2x8xf32>
    %417 = vector.shape_cast %416 : vector<2x8xf32> to vector<2x8x1xf32>
    %418 = tpu.reciprocal %417 {approx = true} : vector<2x8x1xf32> -> vector<2x8x1xf32>
    %419 = vector.broadcast %418 : vector<2x8x1xf32> to vector<2x8x8xf32>
    %420 = arith.mulf %415, %419 : vector<2x8x8xf32>
    %421 = arith.truncf %420 : vector<2x8x8xf32> to vector<2x8x8xbf16>
    %422 = vector.extract_strided_slice %402 {offsets = [0, 0, 0], sizes = [2, 8, 8], strides = [1, 1, 1]} : vector<2x8x32xbf16> to vector<2x8x8xbf16>
    "tpu.trace_start"() <{level = 10 : i32, message = "bqk,bkd->bqd"}> : () -> ()
    %cst_150 = arith.constant dense<0.000000e+00> : vector<2x8x8xf32>
    %423 = tpu.matmul %421, %422, %cst_150 {dimension_numbers = #tpu.dot_dimension_numbers<[2], [1], [1], [2], [0, 0, 0, 1, 1, 2], [0], [0]>} : vector<2x8x8xbf16>, vector<2x8x8xbf16>, vector<2x8x8xf32> -> vector<2x8x8xf32>
    "tpu.trace_stop"() : () -> ()
    %424 = vector.shape_cast %423 : vector<2x8x8xf32> to vector<16x8xf32>
    %425 = arith.truncf %424 : vector<16x8xf32> to vector<16x8xbf16>
    %426 = vector.extract_strided_slice %404 {offsets = [0, 0, 0], sizes = [1, 8, 32], strides = [1, 1, 1]} : vector<4x8x32xbf16> to vector<1x8x32xbf16>
    %427 = vector.shape_cast %426 : vector<1x8x32xbf16> to vector<8x32xbf16>
    %cst_151 = arith.constant dense<0.000000e+00> : vector<16x32xf32>
    %428 = tpu.matmul %425, %427, %cst_151 {dimension_numbers = #tpu.dot_dimension_numbers<[1], [0], [0], [1], [0, 0, 1, 1], [], []>} : vector<16x8xbf16>, vector<8x32xbf16>, vector<16x32xf32> -> vector<16x32xf32>
    %429 = vector.extract_strided_slice %398 {offsets = [0, 0, 8], sizes = [2, 8, 8], strides = [1, 1, 1]} : vector<2x8x32xbf16> to vector<2x8x8xbf16>
    %430 = vector.extract_strided_slice %400 {offsets = [0, 0, 8], sizes = [2, 8, 8], strides = [1, 1, 1]} : vector<2x8x32xbf16> to vector<2x8x8xbf16>
    "tpu.trace_start"() <{level = 10 : i32, message = "bqd,bkd->bqk"}> : () -> ()
    %cst_152 = arith.constant dense<0.000000e+00> : vector<2x8x8xf32>
    %431 = tpu.matmul %429, %430, %cst_152 {dimension_numbers = #tpu.dot_dimension_numbers<[2], [2], [1], [1], [0, 0, 0, 1, 1, 1], [0], [0]>} : vector<2x8x8xbf16>, vector<2x8x8xbf16>, vector<2x8x8xf32> -> vector<2x8x8xf32>
    "tpu.trace_stop"() : () -> ()
    %cst_153 = arith.constant 0.353553385 : f32
    %432 = vector.broadcast %cst_153 : f32 to vector<2x8x8xf32>
    %433 = arith.mulf %431, %432 : vector<2x8x8xf32>
    %434 = arith.addf %433, %3 : vector<2x8x8xf32>
    %cst_154 = arith.constant dense<0xFF800000> : vector<2x8xf32>
    %435 = vector.multi_reduction <maximumf>, %434, %cst_154 [2] : vector<2x8x8xf32> to vector<2x8xf32>
    %436 = vector.shape_cast %435 : vector<2x8xf32> to vector<2x8x1xf32>
    %437 = vector.broadcast %436 : vector<2x8x1xf32> to vector<2x8x8xf32>
    %438 = arith.subf %434, %437 : vector<2x8x8xf32>
    %439 = math.exp %438 : vector<2x8x8xf32>
    %cst_155 = arith.constant dense<0.000000e+00> : vector<2x8xf32>
    %440 = vector.multi_reduction <add>, %439, %cst_155 [2] : vector<2x8x8xf32> to vector<2x8xf32>
    %441 = vector.shape_cast %440 : vector<2x8xf32> to vector<2x8x1xf32>
    %442 = tpu.reciprocal %441 {approx = true} : vector<2x8x1xf32> -> vector<2x8x1xf32>
    %443 = vector.broadcast %442 : vector<2x8x1xf32> to vector<2x8x8xf32>
    %444 = arith.mulf %439, %443 : vector<2x8x8xf32>
    %445 = arith.truncf %444 : vector<2x8x8xf32> to vector<2x8x8xbf16>
    %446 = vector.extract_strided_slice %402 {offsets = [0, 0, 8], sizes = [2, 8, 8], strides = [1, 1, 1]} : vector<2x8x32xbf16> to vector<2x8x8xbf16>
    "tpu.trace_start"() <{level = 10 : i32, message = "bqk,bkd->bqd"}> : () -> ()
    %cst_156 = arith.constant dense<0.000000e+00> : vector<2x8x8xf32>
    %447 = tpu.matmul %445, %446, %cst_156 {dimension_numbers = #tpu.dot_dimension_numbers<[2], [1], [1], [2], [0, 0, 0, 1, 1, 2], [0], [0]>} : vector<2x8x8xbf16>, vector<2x8x8xbf16>, vector<2x8x8xf32> -> vector<2x8x8xf32>
    "tpu.trace_stop"() : () -> ()
    %448 = vector.shape_cast %447 : vector<2x8x8xf32> to vector<16x8xf32>
    %449 = arith.truncf %448 : vector<16x8xf32> to vector<16x8xbf16>
    %450 = vector.extract_strided_slice %404 {offsets = [1, 0, 0], sizes = [1, 8, 32], strides = [1, 1, 1]} : vector<4x8x32xbf16> to vector<1x8x32xbf16>
    %451 = vector.shape_cast %450 : vector<1x8x32xbf16> to vector<8x32xbf16>
    %cst_157 = arith.constant dense<0.000000e+00> : vector<16x32xf32>
    %452 = tpu.matmul %449, %451, %cst_157 {dimension_numbers = #tpu.dot_dimension_numbers<[1], [0], [0], [1], [0, 0, 1, 1], [], []>} : vector<16x8xbf16>, vector<8x32xbf16>, vector<16x32xf32> -> vector<16x32xf32>
    %453 = arith.addf %428, %452 : vector<16x32xf32>
    %454 = vector.extract_strided_slice %398 {offsets = [0, 0, 16], sizes = [2, 8, 8], strides = [1, 1, 1]} : vector<2x8x32xbf16> to vector<2x8x8xbf16>
    %455 = vector.extract_strided_slice %400 {offsets = [0, 0, 16], sizes = [2, 8, 8], strides = [1, 1, 1]} : vector<2x8x32xbf16> to vector<2x8x8xbf16>
    "tpu.trace_start"() <{level = 10 : i32, message = "bqd,bkd->bqk"}> : () -> ()
    %cst_158 = arith.constant dense<0.000000e+00> : vector<2x8x8xf32>
    %456 = tpu.matmul %454, %455, %cst_158 {dimension_numbers = #tpu.dot_dimension_numbers<[2], [2], [1], [1], [0, 0, 0, 1, 1, 1], [0], [0]>} : vector<2x8x8xbf16>, vector<2x8x8xbf16>, vector<2x8x8xf32> -> vector<2x8x8xf32>
    "tpu.trace_stop"() : () -> ()
    %cst_159 = arith.constant 0.353553385 : f32
    %457 = vector.broadcast %cst_159 : f32 to vector<2x8x8xf32>
    %458 = arith.mulf %456, %457 : vector<2x8x8xf32>
    %459 = arith.addf %458, %3 : vector<2x8x8xf32>
    %cst_160 = arith.constant dense<0xFF800000> : vector<2x8xf32>
    %460 = vector.multi_reduction <maximumf>, %459, %cst_160 [2] : vector<2x8x8xf32> to vector<2x8xf32>
    %461 = vector.shape_cast %460 : vector<2x8xf32> to vector<2x8x1xf32>
    %462 = vector.broadcast %461 : vector<2x8x1xf32> to vector<2x8x8xf32>
    %463 = arith.subf %459, %462 : vector<2x8x8xf32>
    %464 = math.exp %463 : vector<2x8x8xf32>
    %cst_161 = arith.constant dense<0.000000e+00> : vector<2x8xf32>
    %465 = vector.multi_reduction <add>, %464, %cst_161 [2] : vector<2x8x8xf32> to vector<2x8xf32>
    %466 = vector.shape_cast %465 : vector<2x8xf32> to vector<2x8x1xf32>
    %467 = tpu.reciprocal %466 {approx = true} : vector<2x8x1xf32> -> vector<2x8x1xf32>
    %468 = vector.broadcast %467 : vector<2x8x1xf32> to vector<2x8x8xf32>
    %469 = arith.mulf %464, %468 : vector<2x8x8xf32>
    %470 = arith.truncf %469 : vector<2x8x8xf32> to vector<2x8x8xbf16>
    %471 = vector.extract_strided_slice %402 {offsets = [0, 0, 16], sizes = [2, 8, 8], strides = [1, 1, 1]} : vector<2x8x32xbf16> to vector<2x8x8xbf16>
    "tpu.trace_start"() <{level = 10 : i32, message = "bqk,bkd->bqd"}> : () -> ()
    %cst_162 = arith.constant dense<0.000000e+00> : vector<2x8x8xf32>
    %472 = tpu.matmul %470, %471, %cst_162 {dimension_numbers = #tpu.dot_dimension_numbers<[2], [1], [1], [2], [0, 0, 0, 1, 1, 2], [0], [0]>} : vector<2x8x8xbf16>, vector<2x8x8xbf16>, vector<2x8x8xf32> -> vector<2x8x8xf32>
    "tpu.trace_stop"() : () -> ()
    %473 = vector.shape_cast %472 : vector<2x8x8xf32> to vector<16x8xf32>
    %474 = arith.truncf %473 : vector<16x8xf32> to vector<16x8xbf16>
    %475 = vector.extract_strided_slice %404 {offsets = [2, 0, 0], sizes = [1, 8, 32], strides = [1, 1, 1]} : vector<4x8x32xbf16> to vector<1x8x32xbf16>
    %476 = vector.shape_cast %475 : vector<1x8x32xbf16> to vector<8x32xbf16>
    %cst_163 = arith.constant dense<0.000000e+00> : vector<16x32xf32>
    %477 = tpu.matmul %474, %476, %cst_163 {dimension_numbers = #tpu.dot_dimension_numbers<[1], [0], [0], [1], [0, 0, 1, 1], [], []>} : vector<16x8xbf16>, vector<8x32xbf16>, vector<16x32xf32> -> vector<16x32xf32>
    %478 = arith.addf %453, %477 : vector<16x32xf32>
    %479 = vector.extract_strided_slice %398 {offsets = [0, 0, 24], sizes = [2, 8, 8], strides = [1, 1, 1]} : vector<2x8x32xbf16> to vector<2x8x8xbf16>
    %480 = vector.extract_strided_slice %400 {offsets = [0, 0, 24], sizes = [2, 8, 8], strides = [1, 1, 1]} : vector<2x8x32xbf16> to vector<2x8x8xbf16>
    "tpu.trace_start"() <{level = 10 : i32, message = "bqd,bkd->bqk"}> : () -> ()
    %cst_164 = arith.constant dense<0.000000e+00> : vector<2x8x8xf32>
    %481 = tpu.matmul %479, %480, %cst_164 {dimension_numbers = #tpu.dot_dimension_numbers<[2], [2], [1], [1], [0, 0, 0, 1, 1, 1], [0], [0]>} : vector<2x8x8xbf16>, vector<2x8x8xbf16>, vector<2x8x8xf32> -> vector<2x8x8xf32>
    "tpu.trace_stop"() : () -> ()
    %cst_165 = arith.constant 0.353553385 : f32
    %482 = vector.broadcast %cst_165 : f32 to vector<2x8x8xf32>
    %483 = arith.mulf %481, %482 : vector<2x8x8xf32>
    %484 = arith.addf %483, %3 : vector<2x8x8xf32>
    %cst_166 = arith.constant dense<0xFF800000> : vector<2x8xf32>
    %485 = vector.multi_reduction <maximumf>, %484, %cst_166 [2] : vector<2x8x8xf32> to vector<2x8xf32>
    %486 = vector.shape_cast %485 : vector<2x8xf32> to vector<2x8x1xf32>
    %487 = vector.broadcast %486 : vector<2x8x1xf32> to vector<2x8x8xf32>
    %488 = arith.subf %484, %487 : vector<2x8x8xf32>
    %489 = math.exp %488 : vector<2x8x8xf32>
    %cst_167 = arith.constant dense<0.000000e+00> : vector<2x8xf32>
    %490 = vector.multi_reduction <add>, %489, %cst_167 [2] : vector<2x8x8xf32> to vector<2x8xf32>
    %491 = vector.shape_cast %490 : vector<2x8xf32> to vector<2x8x1xf32>
    %492 = tpu.reciprocal %491 {approx = true} : vector<2x8x1xf32> -> vector<2x8x1xf32>
    %493 = vector.broadcast %492 : vector<2x8x1xf32> to vector<2x8x8xf32>
    %494 = arith.mulf %489, %493 : vector<2x8x8xf32>
    %495 = arith.truncf %494 : vector<2x8x8xf32> to vector<2x8x8xbf16>
    %496 = vector.extract_strided_slice %402 {offsets = [0, 0, 24], sizes = [2, 8, 8], strides = [1, 1, 1]} : vector<2x8x32xbf16> to vector<2x8x8xbf16>
    "tpu.trace_start"() <{level = 10 : i32, message = "bqk,bkd->bqd"}> : () -> ()
    %cst_168 = arith.constant dense<0.000000e+00> : vector<2x8x8xf32>
    %497 = tpu.matmul %495, %496, %cst_168 {dimension_numbers = #tpu.dot_dimension_numbers<[2], [1], [1], [2], [0, 0, 0, 1, 1, 2], [0], [0]>} : vector<2x8x8xbf16>, vector<2x8x8xbf16>, vector<2x8x8xf32> -> vector<2x8x8xf32>
    "tpu.trace_stop"() : () -> ()
    %498 = vector.shape_cast %497 : vector<2x8x8xf32> to vector<16x8xf32>
    %499 = arith.truncf %498 : vector<16x8xf32> to vector<16x8xbf16>
    %500 = vector.extract_strided_slice %404 {offsets = [3, 0, 0], sizes = [1, 8, 32], strides = [1, 1, 1]} : vector<4x8x32xbf16> to vector<1x8x32xbf16>
    %501 = vector.shape_cast %500 : vector<1x8x32xbf16> to vector<8x32xbf16>
    %cst_169 = arith.constant dense<0.000000e+00> : vector<16x32xf32>
    %502 = tpu.matmul %499, %501, %cst_169 {dimension_numbers = #tpu.dot_dimension_numbers<[1], [0], [0], [1], [0, 0, 1, 1], [], []>} : vector<16x8xbf16>, vector<8x32xbf16>, vector<16x32xf32> -> vector<16x32xf32>
    %503 = arith.addf %478, %502 : vector<16x32xf32>
    %504 = arith.addf %361, %503 : vector<16x32xf32>
    %c1_170 = arith.constant 1 : index
    %c0_171 = arith.constant 0 : index
    %c0_172 = arith.constant 0 : index
    %505 = vector.load %arg9[%c1_170, %c0_171, %c0_172] : memref<2x1x32xf32, #tpu.memory_space<vmem>>, vector<1x1x32xf32>
    %506 = vector.shape_cast %505 : vector<1x1x32xf32> to vector<1x32xf32>
    %507 = vector.broadcast %506 : vector<1x32xf32> to vector<16x32xf32>
    %508 = arith.addf %504, %507 : vector<16x32xf32>
    %509 = vector.extract_strided_slice %4 {offsets = [1, 1, 0, 0], sizes = [1, 1, 1, 32], strides = [1, 1, 1, 1]} : vector<2x3x1x32xf32> to vector<1x1x1x32xf32>
    %510 = vector.shape_cast %509 : vector<1x1x1x32xf32> to vector<1x32xf32>
    %511 = vector.extract_strided_slice %5 {offsets = [1, 1, 0, 0], sizes = [1, 1, 1, 32], strides = [1, 1, 1, 1]} : vector<2x3x1x32xf32> to vector<1x1x1x32xf32>
    %512 = vector.shape_cast %511 : vector<1x1x1x32xf32> to vector<1x32xf32>
    %cst_173 = arith.constant dense<0.000000e+00> : vector<16xf32>
    %513 = vector.multi_reduction <add>, %508, %cst_173 [1] : vector<16x32xf32> to vector<16xf32>
    %514 = vector.shape_cast %513 : vector<16xf32> to vector<16x1xf32>
    %cst_174 = arith.constant 3.200000e+01 : f32
    %515 = vector.broadcast %cst_174 : f32 to vector<16x1xf32>
    %516 = arith.divf %514, %515 : vector<16x1xf32>
    %517 = vector.broadcast %516 : vector<16x1xf32> to vector<16x32xf32>
    %518 = arith.subf %508, %517 : vector<16x32xf32>
    %519 = arith.mulf %518, %518 : vector<16x32xf32>
    %cst_175 = arith.constant dense<0.000000e+00> : vector<16xf32>
    %520 = vector.multi_reduction <add>, %519, %cst_175 [1] : vector<16x32xf32> to vector<16xf32>
    %521 = vector.shape_cast %520 : vector<16xf32> to vector<16x1xf32>
    %cst_176 = arith.constant 3.200000e+01 : f32
    %522 = vector.broadcast %cst_176 : f32 to vector<16x1xf32>
    %523 = arith.divf %521, %522 : vector<16x1xf32>
    %524 = vector.broadcast %516 : vector<16x1xf32> to vector<16x32xf32>
    %525 = arith.subf %508, %524 : vector<16x32xf32>
    %cst_177 = arith.constant 9.99999997E-7 : f32
    %526 = vector.broadcast %cst_177 : f32 to vector<16x1xf32>
    %527 = arith.addf %523, %526 : vector<16x1xf32>
    %528 = math.rsqrt %527 : vector<16x1xf32>
    %529 = vector.broadcast %528 : vector<16x1xf32> to vector<16x32xf32>
    %530 = arith.mulf %525, %529 : vector<16x32xf32>
    %531 = vector.broadcast %510 : vector<1x32xf32> to vector<16x32xf32>
    %532 = arith.mulf %530, %531 : vector<16x32xf32>
    %533 = vector.broadcast %512 : vector<1x32xf32> to vector<16x32xf32>
    %534 = arith.addf %532, %533 : vector<16x32xf32>
    %535 = arith.truncf %534 : vector<16x32xf32> to vector<16x32xbf16>
    %c1_178 = arith.constant 1 : index
    %c0_179 = arith.constant 0 : index
    %c0_180 = arith.constant 0 : index
    %536 = vector.load %arg10[%c1_178, %c0_179, %c0_180] : memref<2x32x32xbf16, #tpu.memory_space<vmem>>, vector<1x32x32xbf16>
    %537 = vector.shape_cast %536 : vector<1x32x32xbf16> to vector<32x32xbf16>
    %cst_181 = arith.constant dense<0.000000e+00> : vector<16x32xf32>
    %538 = tpu.matmul %535, %537, %cst_181 {dimension_numbers = #tpu.dot_dimension_numbers<[1], [0], [0], [1], [0, 0, 1, 1], [], []>} : vector<16x32xbf16>, vector<32x32xbf16>, vector<16x32xf32> -> vector<16x32xf32>
    %c1_182 = arith.constant 1 : index
    %c0_183 = arith.constant 0 : index
    %c0_184 = arith.constant 0 : index
    %539 = vector.load %arg11[%c1_182, %c0_183, %c0_184] : memref<2x1x32xf32, #tpu.memory_space<vmem>>, vector<1x1x32xf32>
    %540 = vector.shape_cast %539 : vector<1x1x32xf32> to vector<1x32xf32>
    %541 = vector.broadcast %540 : vector<1x32xf32> to vector<16x32xf32>
    %542 = arith.addf %538, %541 : vector<16x32xf32>
    %543 = arith.truncf %542 : vector<16x32xf32> to vector<16x32xbf16>
    %544 = vector.shape_cast %543 : vector<16x32xbf16> to vector<2x8x32xbf16>
    %545 = vector.extract_strided_slice %12 {offsets = [0, 64], sizes = [32, 32], strides = [1, 1]} : vector<32x128xbf16> to vector<32x32xbf16>
    %546 = vector.shape_cast %545 : vector<32x32xbf16> to vector<2x16x32xbf16>
    %547 = vector.extract_strided_slice %12 {offsets = [0, 96], sizes = [32, 32], strides = [1, 1]} : vector<32x128xbf16> to vector<32x32xbf16>
    %548 = vector.shape_cast %547 : vector<32x32xbf16> to vector<2x16x32xbf16>
    %c1_185 = arith.constant 1 : index
    %c0_186 = arith.constant 0 : index
    %c0_187 = arith.constant 0 : index
    %c0_188 = arith.constant 0 : index
    %549 = vector.load %arg14[%c1_185, %c0_186, %c0_187, %c0_188] : memref<2x4x8x32xbf16, #tpu.memory_space<vmem>>, vector<1x4x8x32xbf16>
    %550 = vector.shape_cast %549 : vector<1x4x8x32xbf16> to vector<4x8x32xbf16>
    %551 = vector.extract_strided_slice %544 {offsets = [0, 0, 0], sizes = [2, 8, 8], strides = [1, 1, 1]} : vector<2x8x32xbf16> to vector<2x8x8xbf16>
    %552 = vector.extract_strided_slice %546 {offsets = [0, 0, 0], sizes = [2, 16, 8], strides = [1, 1, 1]} : vector<2x16x32xbf16> to vector<2x16x8xbf16>
    "tpu.trace_start"() <{level = 10 : i32, message = "bqd,bkd->bqk"}> : () -> ()
    %cst_189 = arith.constant dense<0.000000e+00> : vector<2x8x16xf32>
    %553 = tpu.matmul %551, %552, %cst_189 {dimension_numbers = #tpu.dot_dimension_numbers<[2], [2], [1], [1], [0, 0, 0, 1, 1, 1], [0], [0]>} : vector<2x8x8xbf16>, vector<2x16x8xbf16>, vector<2x8x16xf32> -> vector<2x8x16xf32>
    "tpu.trace_stop"() : () -> ()
    %cst_190 = arith.constant 0.353553385 : f32
    %554 = vector.broadcast %cst_190 : f32 to vector<2x8x16xf32>
    %555 = arith.mulf %553, %554 : vector<2x8x16xf32>
    %556 = arith.addf %555, %2 : vector<2x8x16xf32>
    %cst_191 = arith.constant dense<0xFF800000> : vector<2x8xf32>
    %557 = vector.multi_reduction <maximumf>, %556, %cst_191 [2] : vector<2x8x16xf32> to vector<2x8xf32>
    %558 = vector.shape_cast %557 : vector<2x8xf32> to vector<2x8x1xf32>
    %559 = vector.broadcast %558 : vector<2x8x1xf32> to vector<2x8x16xf32>
    %560 = arith.subf %556, %559 : vector<2x8x16xf32>
    %561 = math.exp %560 : vector<2x8x16xf32>
    %cst_192 = arith.constant dense<0.000000e+00> : vector<2x8xf32>
    %562 = vector.multi_reduction <add>, %561, %cst_192 [2] : vector<2x8x16xf32> to vector<2x8xf32>
    %563 = vector.shape_cast %562 : vector<2x8xf32> to vector<2x8x1xf32>
    %564 = tpu.reciprocal %563 {approx = true} : vector<2x8x1xf32> -> vector<2x8x1xf32>
    %565 = vector.broadcast %564 : vector<2x8x1xf32> to vector<2x8x16xf32>
    %566 = arith.mulf %561, %565 : vector<2x8x16xf32>
    %567 = arith.truncf %566 : vector<2x8x16xf32> to vector<2x8x16xbf16>
    %568 = vector.extract_strided_slice %548 {offsets = [0, 0, 0], sizes = [2, 16, 8], strides = [1, 1, 1]} : vector<2x16x32xbf16> to vector<2x16x8xbf16>
    "tpu.trace_start"() <{level = 10 : i32, message = "bqk,bkd->bqd"}> : () -> ()
    %cst_193 = arith.constant dense<0.000000e+00> : vector<2x8x8xf32>
    %569 = tpu.matmul %567, %568, %cst_193 {dimension_numbers = #tpu.dot_dimension_numbers<[2], [1], [1], [2], [0, 0, 0, 1, 1, 2], [0], [0]>} : vector<2x8x16xbf16>, vector<2x16x8xbf16>, vector<2x8x8xf32> -> vector<2x8x8xf32>
    "tpu.trace_stop"() : () -> ()
    %570 = vector.shape_cast %569 : vector<2x8x8xf32> to vector<16x8xf32>
    %571 = arith.truncf %570 : vector<16x8xf32> to vector<16x8xbf16>
    %572 = vector.extract_strided_slice %550 {offsets = [0, 0, 0], sizes = [1, 8, 32], strides = [1, 1, 1]} : vector<4x8x32xbf16> to vector<1x8x32xbf16>
    %573 = vector.shape_cast %572 : vector<1x8x32xbf16> to vector<8x32xbf16>
    %cst_194 = arith.constant dense<0.000000e+00> : vector<16x32xf32>
    %574 = tpu.matmul %571, %573, %cst_194 {dimension_numbers = #tpu.dot_dimension_numbers<[1], [0], [0], [1], [0, 0, 1, 1], [], []>} : vector<16x8xbf16>, vector<8x32xbf16>, vector<16x32xf32> -> vector<16x32xf32>
    %575 = vector.extract_strided_slice %544 {offsets = [0, 0, 8], sizes = [2, 8, 8], strides = [1, 1, 1]} : vector<2x8x32xbf16> to vector<2x8x8xbf16>
    %576 = vector.extract_strided_slice %546 {offsets = [0, 0, 8], sizes = [2, 16, 8], strides = [1, 1, 1]} : vector<2x16x32xbf16> to vector<2x16x8xbf16>
    "tpu.trace_start"() <{level = 10 : i32, message = "bqd,bkd->bqk"}> : () -> ()
    %cst_195 = arith.constant dense<0.000000e+00> : vector<2x8x16xf32>
    %577 = tpu.matmul %575, %576, %cst_195 {dimension_numbers = #tpu.dot_dimension_numbers<[2], [2], [1], [1], [0, 0, 0, 1, 1, 1], [0], [0]>} : vector<2x8x8xbf16>, vector<2x16x8xbf16>, vector<2x8x16xf32> -> vector<2x8x16xf32>
    "tpu.trace_stop"() : () -> ()
    %cst_196 = arith.constant 0.353553385 : f32
    %578 = vector.broadcast %cst_196 : f32 to vector<2x8x16xf32>
    %579 = arith.mulf %577, %578 : vector<2x8x16xf32>
    %580 = arith.addf %579, %2 : vector<2x8x16xf32>
    %cst_197 = arith.constant dense<0xFF800000> : vector<2x8xf32>
    %581 = vector.multi_reduction <maximumf>, %580, %cst_197 [2] : vector<2x8x16xf32> to vector<2x8xf32>
    %582 = vector.shape_cast %581 : vector<2x8xf32> to vector<2x8x1xf32>
    %583 = vector.broadcast %582 : vector<2x8x1xf32> to vector<2x8x16xf32>
    %584 = arith.subf %580, %583 : vector<2x8x16xf32>
    %585 = math.exp %584 : vector<2x8x16xf32>
    %cst_198 = arith.constant dense<0.000000e+00> : vector<2x8xf32>
    %586 = vector.multi_reduction <add>, %585, %cst_198 [2] : vector<2x8x16xf32> to vector<2x8xf32>
    %587 = vector.shape_cast %586 : vector<2x8xf32> to vector<2x8x1xf32>
    %588 = tpu.reciprocal %587 {approx = true} : vector<2x8x1xf32> -> vector<2x8x1xf32>
    %589 = vector.broadcast %588 : vector<2x8x1xf32> to vector<2x8x16xf32>
    %590 = arith.mulf %585, %589 : vector<2x8x16xf32>
    %591 = arith.truncf %590 : vector<2x8x16xf32> to vector<2x8x16xbf16>
    %592 = vector.extract_strided_slice %548 {offsets = [0, 0, 8], sizes = [2, 16, 8], strides = [1, 1, 1]} : vector<2x16x32xbf16> to vector<2x16x8xbf16>
    "tpu.trace_start"() <{level = 10 : i32, message = "bqk,bkd->bqd"}> : () -> ()
    %cst_199 = arith.constant dense<0.000000e+00> : vector<2x8x8xf32>
    %593 = tpu.matmul %591, %592, %cst_199 {dimension_numbers = #tpu.dot_dimension_numbers<[2], [1], [1], [2], [0, 0, 0, 1, 1, 2], [0], [0]>} : vector<2x8x16xbf16>, vector<2x16x8xbf16>, vector<2x8x8xf32> -> vector<2x8x8xf32>
    "tpu.trace_stop"() : () -> ()
    %594 = vector.shape_cast %593 : vector<2x8x8xf32> to vector<16x8xf32>
    %595 = arith.truncf %594 : vector<16x8xf32> to vector<16x8xbf16>
    %596 = vector.extract_strided_slice %550 {offsets = [1, 0, 0], sizes = [1, 8, 32], strides = [1, 1, 1]} : vector<4x8x32xbf16> to vector<1x8x32xbf16>
    %597 = vector.shape_cast %596 : vector<1x8x32xbf16> to vector<8x32xbf16>
    %cst_200 = arith.constant dense<0.000000e+00> : vector<16x32xf32>
    %598 = tpu.matmul %595, %597, %cst_200 {dimension_numbers = #tpu.dot_dimension_numbers<[1], [0], [0], [1], [0, 0, 1, 1], [], []>} : vector<16x8xbf16>, vector<8x32xbf16>, vector<16x32xf32> -> vector<16x32xf32>
    %599 = arith.addf %574, %598 : vector<16x32xf32>
    %600 = vector.extract_strided_slice %544 {offsets = [0, 0, 16], sizes = [2, 8, 8], strides = [1, 1, 1]} : vector<2x8x32xbf16> to vector<2x8x8xbf16>
    %601 = vector.extract_strided_slice %546 {offsets = [0, 0, 16], sizes = [2, 16, 8], strides = [1, 1, 1]} : vector<2x16x32xbf16> to vector<2x16x8xbf16>
    "tpu.trace_start"() <{level = 10 : i32, message = "bqd,bkd->bqk"}> : () -> ()
    %cst_201 = arith.constant dense<0.000000e+00> : vector<2x8x16xf32>
    %602 = tpu.matmul %600, %601, %cst_201 {dimension_numbers = #tpu.dot_dimension_numbers<[2], [2], [1], [1], [0, 0, 0, 1, 1, 1], [0], [0]>} : vector<2x8x8xbf16>, vector<2x16x8xbf16>, vector<2x8x16xf32> -> vector<2x8x16xf32>
    "tpu.trace_stop"() : () -> ()
    %cst_202 = arith.constant 0.353553385 : f32
    %603 = vector.broadcast %cst_202 : f32 to vector<2x8x16xf32>
    %604 = arith.mulf %602, %603 : vector<2x8x16xf32>
    %605 = arith.addf %604, %2 : vector<2x8x16xf32>
    %cst_203 = arith.constant dense<0xFF800000> : vector<2x8xf32>
    %606 = vector.multi_reduction <maximumf>, %605, %cst_203 [2] : vector<2x8x16xf32> to vector<2x8xf32>
    %607 = vector.shape_cast %606 : vector<2x8xf32> to vector<2x8x1xf32>
    %608 = vector.broadcast %607 : vector<2x8x1xf32> to vector<2x8x16xf32>
    %609 = arith.subf %605, %608 : vector<2x8x16xf32>
    %610 = math.exp %609 : vector<2x8x16xf32>
    %cst_204 = arith.constant dense<0.000000e+00> : vector<2x8xf32>
    %611 = vector.multi_reduction <add>, %610, %cst_204 [2] : vector<2x8x16xf32> to vector<2x8xf32>
    %612 = vector.shape_cast %611 : vector<2x8xf32> to vector<2x8x1xf32>
    %613 = tpu.reciprocal %612 {approx = true} : vector<2x8x1xf32> -> vector<2x8x1xf32>
    %614 = vector.broadcast %613 : vector<2x8x1xf32> to vector<2x8x16xf32>
    %615 = arith.mulf %610, %614 : vector<2x8x16xf32>
    %616 = arith.truncf %615 : vector<2x8x16xf32> to vector<2x8x16xbf16>
    %617 = vector.extract_strided_slice %548 {offsets = [0, 0, 16], sizes = [2, 16, 8], strides = [1, 1, 1]} : vector<2x16x32xbf16> to vector<2x16x8xbf16>
    "tpu.trace_start"() <{level = 10 : i32, message = "bqk,bkd->bqd"}> : () -> ()
    %cst_205 = arith.constant dense<0.000000e+00> : vector<2x8x8xf32>
    %618 = tpu.matmul %616, %617, %cst_205 {dimension_numbers = #tpu.dot_dimension_numbers<[2], [1], [1], [2], [0, 0, 0, 1, 1, 2], [0], [0]>} : vector<2x8x16xbf16>, vector<2x16x8xbf16>, vector<2x8x8xf32> -> vector<2x8x8xf32>
    "tpu.trace_stop"() : () -> ()
    %619 = vector.shape_cast %618 : vector<2x8x8xf32> to vector<16x8xf32>
    %620 = arith.truncf %619 : vector<16x8xf32> to vector<16x8xbf16>
    %621 = vector.extract_strided_slice %550 {offsets = [2, 0, 0], sizes = [1, 8, 32], strides = [1, 1, 1]} : vector<4x8x32xbf16> to vector<1x8x32xbf16>
    %622 = vector.shape_cast %621 : vector<1x8x32xbf16> to vector<8x32xbf16>
    %cst_206 = arith.constant dense<0.000000e+00> : vector<16x32xf32>
    %623 = tpu.matmul %620, %622, %cst_206 {dimension_numbers = #tpu.dot_dimension_numbers<[1], [0], [0], [1], [0, 0, 1, 1], [], []>} : vector<16x8xbf16>, vector<8x32xbf16>, vector<16x32xf32> -> vector<16x32xf32>
    %624 = arith.addf %599, %623 : vector<16x32xf32>
    %625 = vector.extract_strided_slice %544 {offsets = [0, 0, 24], sizes = [2, 8, 8], strides = [1, 1, 1]} : vector<2x8x32xbf16> to vector<2x8x8xbf16>
    %626 = vector.extract_strided_slice %546 {offsets = [0, 0, 24], sizes = [2, 16, 8], strides = [1, 1, 1]} : vector<2x16x32xbf16> to vector<2x16x8xbf16>
    "tpu.trace_start"() <{level = 10 : i32, message = "bqd,bkd->bqk"}> : () -> ()
    %cst_207 = arith.constant dense<0.000000e+00> : vector<2x8x16xf32>
    %627 = tpu.matmul %625, %626, %cst_207 {dimension_numbers = #tpu.dot_dimension_numbers<[2], [2], [1], [1], [0, 0, 0, 1, 1, 1], [0], [0]>} : vector<2x8x8xbf16>, vector<2x16x8xbf16>, vector<2x8x16xf32> -> vector<2x8x16xf32>
    "tpu.trace_stop"() : () -> ()
    %cst_208 = arith.constant 0.353553385 : f32
    %628 = vector.broadcast %cst_208 : f32 to vector<2x8x16xf32>
    %629 = arith.mulf %627, %628 : vector<2x8x16xf32>
    %630 = arith.addf %629, %2 : vector<2x8x16xf32>
    %cst_209 = arith.constant dense<0xFF800000> : vector<2x8xf32>
    %631 = vector.multi_reduction <maximumf>, %630, %cst_209 [2] : vector<2x8x16xf32> to vector<2x8xf32>
    %632 = vector.shape_cast %631 : vector<2x8xf32> to vector<2x8x1xf32>
    %633 = vector.broadcast %632 : vector<2x8x1xf32> to vector<2x8x16xf32>
    %634 = arith.subf %630, %633 : vector<2x8x16xf32>
    %635 = math.exp %634 : vector<2x8x16xf32>
    %cst_210 = arith.constant dense<0.000000e+00> : vector<2x8xf32>
    %636 = vector.multi_reduction <add>, %635, %cst_210 [2] : vector<2x8x16xf32> to vector<2x8xf32>
    %637 = vector.shape_cast %636 : vector<2x8xf32> to vector<2x8x1xf32>
    %638 = tpu.reciprocal %637 {approx = true} : vector<2x8x1xf32> -> vector<2x8x1xf32>
    %639 = vector.broadcast %638 : vector<2x8x1xf32> to vector<2x8x16xf32>
    %640 = arith.mulf %635, %639 : vector<2x8x16xf32>
    %641 = arith.truncf %640 : vector<2x8x16xf32> to vector<2x8x16xbf16>
    %642 = vector.extract_strided_slice %548 {offsets = [0, 0, 24], sizes = [2, 16, 8], strides = [1, 1, 1]} : vector<2x16x32xbf16> to vector<2x16x8xbf16>
    "tpu.trace_start"() <{level = 10 : i32, message = "bqk,bkd->bqd"}> : () -> ()
    %cst_211 = arith.constant dense<0.000000e+00> : vector<2x8x8xf32>
    %643 = tpu.matmul %641, %642, %cst_211 {dimension_numbers = #tpu.dot_dimension_numbers<[2], [1], [1], [2], [0, 0, 0, 1, 1, 2], [0], [0]>} : vector<2x8x16xbf16>, vector<2x16x8xbf16>, vector<2x8x8xf32> -> vector<2x8x8xf32>
    "tpu.trace_stop"() : () -> ()
    %644 = vector.shape_cast %643 : vector<2x8x8xf32> to vector<16x8xf32>
    %645 = arith.truncf %644 : vector<16x8xf32> to vector<16x8xbf16>
    %646 = vector.extract_strided_slice %550 {offsets = [3, 0, 0], sizes = [1, 8, 32], strides = [1, 1, 1]} : vector<4x8x32xbf16> to vector<1x8x32xbf16>
    %647 = vector.shape_cast %646 : vector<1x8x32xbf16> to vector<8x32xbf16>
    %cst_212 = arith.constant dense<0.000000e+00> : vector<16x32xf32>
    %648 = tpu.matmul %645, %647, %cst_212 {dimension_numbers = #tpu.dot_dimension_numbers<[1], [0], [0], [1], [0, 0, 1, 1], [], []>} : vector<16x8xbf16>, vector<8x32xbf16>, vector<16x32xf32> -> vector<16x32xf32>
    %649 = arith.addf %624, %648 : vector<16x32xf32>
    %650 = arith.addf %508, %649 : vector<16x32xf32>
    %c1_213 = arith.constant 1 : index
    %c0_214 = arith.constant 0 : index
    %c0_215 = arith.constant 0 : index
    %651 = vector.load %arg15[%c1_213, %c0_214, %c0_215] : memref<2x1x32xf32, #tpu.memory_space<vmem>>, vector<1x1x32xf32>
    %652 = vector.shape_cast %651 : vector<1x1x32xf32> to vector<1x32xf32>
    %653 = vector.broadcast %652 : vector<1x32xf32> to vector<16x32xf32>
    %654 = arith.addf %650, %653 : vector<16x32xf32>
    %655 = vector.extract_strided_slice %4 {offsets = [1, 2, 0, 0], sizes = [1, 1, 1, 32], strides = [1, 1, 1, 1]} : vector<2x3x1x32xf32> to vector<1x1x1x32xf32>
    %656 = vector.shape_cast %655 : vector<1x1x1x32xf32> to vector<1x32xf32>
    %657 = vector.extract_strided_slice %5 {offsets = [1, 2, 0, 0], sizes = [1, 1, 1, 32], strides = [1, 1, 1, 1]} : vector<2x3x1x32xf32> to vector<1x1x1x32xf32>
    %658 = vector.shape_cast %657 : vector<1x1x1x32xf32> to vector<1x32xf32>
    %cst_216 = arith.constant dense<0.000000e+00> : vector<16xf32>
    %659 = vector.multi_reduction <add>, %654, %cst_216 [1] : vector<16x32xf32> to vector<16xf32>
    %660 = vector.shape_cast %659 : vector<16xf32> to vector<16x1xf32>
    %cst_217 = arith.constant 3.200000e+01 : f32
    %661 = vector.broadcast %cst_217 : f32 to vector<16x1xf32>
    %662 = arith.divf %660, %661 : vector<16x1xf32>
    %663 = vector.broadcast %662 : vector<16x1xf32> to vector<16x32xf32>
    %664 = arith.subf %654, %663 : vector<16x32xf32>
    %665 = arith.mulf %664, %664 : vector<16x32xf32>
    %cst_218 = arith.constant dense<0.000000e+00> : vector<16xf32>
    %666 = vector.multi_reduction <add>, %665, %cst_218 [1] : vector<16x32xf32> to vector<16xf32>
    %667 = vector.shape_cast %666 : vector<16xf32> to vector<16x1xf32>
    %cst_219 = arith.constant 3.200000e+01 : f32
    %668 = vector.broadcast %cst_219 : f32 to vector<16x1xf32>
    %669 = arith.divf %667, %668 : vector<16x1xf32>
    %670 = vector.broadcast %662 : vector<16x1xf32> to vector<16x32xf32>
    %671 = arith.subf %654, %670 : vector<16x32xf32>
    %cst_220 = arith.constant 9.99999997E-7 : f32
    %672 = vector.broadcast %cst_220 : f32 to vector<16x1xf32>
    %673 = arith.addf %669, %672 : vector<16x1xf32>
    %674 = math.rsqrt %673 : vector<16x1xf32>
    %675 = vector.broadcast %674 : vector<16x1xf32> to vector<16x32xf32>
    %676 = arith.mulf %671, %675 : vector<16x32xf32>
    %677 = vector.broadcast %656 : vector<1x32xf32> to vector<16x32xf32>
    %678 = arith.mulf %676, %677 : vector<16x32xf32>
    %679 = vector.broadcast %658 : vector<1x32xf32> to vector<16x32xf32>
    %680 = arith.addf %678, %679 : vector<16x32xf32>
    %681 = arith.truncf %680 : vector<16x32xf32> to vector<16x32xbf16>
    %c1_221 = arith.constant 1 : index
    %c0_222 = arith.constant 0 : index
    %c0_223 = arith.constant 0 : index
    %682 = vector.load %arg16[%c1_221, %c0_222, %c0_223] : memref<2x32x128xbf16, #tpu.memory_space<vmem>>, vector<1x32x128xbf16>
    %683 = vector.shape_cast %682 : vector<1x32x128xbf16> to vector<32x128xbf16>
    %cst_224 = arith.constant dense<0.000000e+00> : vector<16x128xf32>
    %684 = tpu.matmul %681, %683, %cst_224 {dimension_numbers = #tpu.dot_dimension_numbers<[1], [0], [0], [1], [0, 0, 1, 1], [], []>} : vector<16x32xbf16>, vector<32x128xbf16>, vector<16x128xf32> -> vector<16x128xf32>
    %c1_225 = arith.constant 1 : index
    %c0_226 = arith.constant 0 : index
    %c0_227 = arith.constant 0 : index
    %685 = vector.load %arg17[%c1_225, %c0_226, %c0_227] : memref<2x1x128xf32, #tpu.memory_space<vmem>>, vector<1x1x128xf32>
    %686 = vector.shape_cast %685 : vector<1x1x128xf32> to vector<1x128xf32>
    %687 = vector.broadcast %686 : vector<1x128xf32> to vector<16x128xf32>
    %688 = arith.addf %684, %687 : vector<16x128xf32>
    %cst_228 = arith.constant 5.000000e-01 : f32
    %689 = vector.broadcast %cst_228 : f32 to vector<16x128xf32>
    %690 = arith.mulf %689, %688 : vector<16x128xf32>
    %cst_229 = arith.constant 4.471500e-02 : f32
    %691 = vector.broadcast %cst_229 : f32 to vector<16x128xf32>
    %692 = arith.mulf %691, %688 : vector<16x128xf32>
    %693 = arith.mulf %692, %688 : vector<16x128xf32>
    %694 = arith.mulf %693, %688 : vector<16x128xf32>
    %695 = arith.addf %688, %694 : vector<16x128xf32>
    %cst_230 = arith.constant 0.797884583 : f32
    %696 = vector.broadcast %cst_230 : f32 to vector<16x128xf32>
    %697 = arith.mulf %696, %695 : vector<16x128xf32>
    %698 = math.tanh %697 : vector<16x128xf32>
    %cst_231 = arith.constant 1.000000e+00 : f32
    %699 = vector.broadcast %cst_231 : f32 to vector<16x128xf32>
    %700 = arith.addf %699, %698 : vector<16x128xf32>
    %701 = arith.mulf %690, %700 : vector<16x128xf32>
    %702 = arith.truncf %701 : vector<16x128xf32> to vector<16x128xbf16>
    %c1_232 = arith.constant 1 : index
    %c0_233 = arith.constant 0 : index
    %c0_234 = arith.constant 0 : index
    %703 = vector.load %arg18[%c1_232, %c0_233, %c0_234] : memref<2x128x32xbf16, #tpu.memory_space<vmem>>, vector<1x128x32xbf16>
    %704 = vector.shape_cast %703 : vector<1x128x32xbf16> to vector<128x32xbf16>
    %cst_235 = arith.constant dense<0.000000e+00> : vector<16x32xf32>
    %705 = tpu.matmul %702, %704, %cst_235 {dimension_numbers = #tpu.dot_dimension_numbers<[1], [0], [0], [1], [0, 0, 1, 1], [], []>} : vector<16x128xbf16>, vector<128x32xbf16>, vector<16x32xf32> -> vector<16x32xf32>
    %706 = arith.addf %654, %705 : vector<16x32xf32>
    %c1_236 = arith.constant 1 : index
    %c0_237 = arith.constant 0 : index
    %c0_238 = arith.constant 0 : index
    %707 = vector.load %arg19[%c1_236, %c0_237, %c0_238] : memref<2x1x32xf32, #tpu.memory_space<vmem>>, vector<1x1x32xf32>
    %708 = vector.shape_cast %707 : vector<1x1x32xf32> to vector<1x32xf32>
    %709 = vector.broadcast %708 : vector<1x32xf32> to vector<16x32xf32>
    %710 = arith.addf %706, %709 : vector<16x32xf32>
    %c0_239 = arith.constant 0 : index
    %c0_240 = arith.constant 0 : index
    %711 = vector.load %arg20[%c0_239, %c0_240] : memref<1x32xf32, #tpu.memory_space<vmem>>, vector<1x32xf32>
    %c0_241 = arith.constant 0 : index
    %c0_242 = arith.constant 0 : index
    %712 = vector.load %arg21[%c0_241, %c0_242] : memref<1x32xf32, #tpu.memory_space<vmem>>, vector<1x32xf32>
    %cst_243 = arith.constant dense<0.000000e+00> : vector<16xf32>
    %713 = vector.multi_reduction <add>, %710, %cst_243 [1] : vector<16x32xf32> to vector<16xf32>
    %714 = vector.shape_cast %713 : vector<16xf32> to vector<16x1xf32>
    %cst_244 = arith.constant 3.200000e+01 : f32
    %715 = vector.broadcast %cst_244 : f32 to vector<16x1xf32>
    %716 = arith.divf %714, %715 : vector<16x1xf32>
    %717 = vector.broadcast %716 : vector<16x1xf32> to vector<16x32xf32>
    %718 = arith.subf %710, %717 : vector<16x32xf32>
    %719 = arith.mulf %718, %718 : vector<16x32xf32>
    %cst_245 = arith.constant dense<0.000000e+00> : vector<16xf32>
    %720 = vector.multi_reduction <add>, %719, %cst_245 [1] : vector<16x32xf32> to vector<16xf32>
    %721 = vector.shape_cast %720 : vector<16xf32> to vector<16x1xf32>
    %cst_246 = arith.constant 3.200000e+01 : f32
    %722 = vector.broadcast %cst_246 : f32 to vector<16x1xf32>
    %723 = arith.divf %721, %722 : vector<16x1xf32>
    %724 = vector.broadcast %716 : vector<16x1xf32> to vector<16x32xf32>
    %725 = arith.subf %710, %724 : vector<16x32xf32>
    %cst_247 = arith.constant 9.99999997E-7 : f32
    %726 = vector.broadcast %cst_247 : f32 to vector<16x1xf32>
    %727 = arith.addf %723, %726 : vector<16x1xf32>
    %728 = math.rsqrt %727 : vector<16x1xf32>
    %729 = vector.broadcast %728 : vector<16x1xf32> to vector<16x32xf32>
    %730 = arith.mulf %725, %729 : vector<16x32xf32>
    %731 = vector.broadcast %711 : vector<1x32xf32> to vector<16x32xf32>
    %732 = arith.mulf %730, %731 : vector<16x32xf32>
    %733 = vector.broadcast %712 : vector<1x32xf32> to vector<16x32xf32>
    %734 = arith.addf %732, %733 : vector<16x32xf32>
    %735 = arith.truncf %734 : vector<16x32xf32> to vector<16x32xbf16>
    %c0_248 = arith.constant 0 : index
    %c0_249 = arith.constant 0 : index
    %736 = vector.load %arg22[%c0_248, %c0_249] : memref<32x128xbf16, #tpu.memory_space<vmem>>, vector<32x128xbf16>
    %cst_250 = arith.constant dense<0.000000e+00> : vector<16x128xf32>
    %737 = tpu.matmul %735, %736, %cst_250 {dimension_numbers = #tpu.dot_dimension_numbers<[1], [0], [0], [1], [0, 0, 1, 1], [], []>} : vector<16x32xbf16>, vector<32x128xbf16>, vector<16x128xf32> -> vector<16x128xf32>
    %c0_251 = arith.constant 0 : index
    %c0_252 = arith.constant 0 : index
    %738 = vector.load %arg23[%c0_251, %c0_252] : memref<1x128xf32, #tpu.memory_space<vmem>>, vector<1x128xf32>
    %739 = vector.broadcast %738 : vector<1x128xf32> to vector<16x128xf32>
    %740 = arith.addf %737, %739 : vector<16x128xf32>
    %cst_253 = arith.constant dense<0xFF800000> : vector<16xf32>
    %741 = vector.multi_reduction <maximumf>, %740, %cst_253 [1] : vector<16x128xf32> to vector<16xf32>
    %742 = vector.shape_cast %741 : vector<16xf32> to vector<16x1xf32>
    %743 = vector.broadcast %742 : vector<16x1xf32> to vector<16x128xf32>
    %744 = arith.subf %740, %743 : vector<16x128xf32>
    %745 = math.exp %744 : vector<16x128xf32>
    %cst_254 = arith.constant dense<0.000000e+00> : vector<16xf32>
    %746 = vector.multi_reduction <add>, %745, %cst_254 [1] : vector<16x128xf32> to vector<16xf32>
    %747 = vector.shape_cast %746 : vector<16xf32> to vector<16x1xf32>
    %748 = math.log %747 : vector<16x1xf32>
    %749 = vector.broadcast %748 : vector<16x1xf32> to vector<16x128xf32>
    %750 = arith.subf %744, %749 : vector<16x128xf32>
    %c0_255 = arith.constant 0 : index
    %c0_256 = arith.constant 0 : index
    %751 = vector.load %arg24[%c0_255, %c0_256] : memref<16x128xf32, #tpu.memory_space<vmem>>, vector<16x128xf32>
    tpu.vector_store %arg24[%c0_255, %c0_256], %750 {strides = array<i32>} : memref<16x128xf32, #tpu.memory_space<vmem>>, vector<16x128xf32>,
    return
  }
}

</mosaic_0001>

<bundles_post_ra>
// kernel: text_transformer_decoder.1
= control target key start
LH: loop header
LB: loop body
LE: loop exit
PB: predicated region body
PF: predicated region fallthrough
CT: control target
= control target key end

     0   :  { %vm133_vm0 = vcmask 261120   ;;  %v6900_v19 = vmov 0.0   ;;  %vm6901_vm1 = vmmov 0   ;;  %s6902_s28 = smov 96   ;;  %vm314_vm2 = vcmask 64512   ;;  %s8293_s30 = smov 48   ;;  %s8215_s0 = inlined_call_operand.vmem [shape: f32[2,8,32], index: 0, kind: input, shape index: {}]   ;;  %s8216_s12 = inlined_call_operand.vmem [shape: bf16[32,128], index: 12, kind: input, shape index: {}]   ;;  %s8217_s1 = inlined_call_operand.vmem [shape: bf16[32,32], index: 1, kind: input, shape index: {}]   ;;  %s8218_s6 = inlined_call_operand.vmem [shape: bf16[2,32,96], index: 6, kind: input, shape index: {}]   ;;  %s8219_s4 = inlined_call_operand.vmem [shape: f32[2,3,1,32], index: 4, kind: input, shape index: {}]   ;;  %s8220_s5 = inlined_call_operand.vmem [shape: f32[2,3,1,32], index: 5, kind: input, shape index: {}]   ;;  %s8221_s13 = inlined_call_operand.vmem [shape: f32[1,128], index: 13, kind: input, shape index: {}]   ;;  %s8222_s7 = inlined_call_operand.vmem [shape: f32[2,1,96], index: 7, kind: input, shape index: {}]   ;;  %s8223_s3 = inlined_call_operand.vmem [shape: f32[2,8,8], index: 3, kind: input, shape index: {}]   ;;  %s8224_s8 = inlined_call_operand.vmem [shape: bf16[2,4,8,32], index: 8, kind: input, shape index: {}]   ;;  %s8225_s9 = inlined_call_operand.vmem [shape: f32[2,1,32], index: 9, kind: input, shape index: {}]   ;;  %s8226_s10 = inlined_call_operand.vmem [shape: bf16[2,32,32], index: 10, kind: input, shape index: {}]   ;;  %s8227_s11 = inlined_call_operand.vmem [shape: f32[2,1,32], index: 11, kind: input, shape index: {}]   ;;  %s8228_s2 = inlined_call_operand.vmem [shape: f32[2,8,16], index: 2, kind: input, shape index: {}]   ;;  %s8229_s14 = inlined_call_operand.vmem [shape: bf16[2,4,8,32], index: 14, kind: input, shape index: {}]   ;;  %s8230_s15 = inlined_call_operand.vmem [shape: f32[2,1,32], index: 15, kind: input, shape index: {}]   ;;  %s8231_s16 = inlined_call_operand.vmem [shape: bf16[2,32,128], index: 16, kind: input, shape index: {}]   ;;  %s8232_s18 = inlined_call_operand.vmem [shape: bf16[2,128,32], index: 18, kind: input, shape index: {}]   ;;  %s8233_s17 = inlined_call_operand.vmem [shape: f32[2,1,128], index: 17, kind: input, shape index: {}]   ;;  %s8234_s19 = inlined_call_operand.vmem [shape: f32[2,1,32], index: 19, kind: input, shape index: {}]   ;;  %s8235_s22 = inlined_call_operand.vmem [shape: bf16[32,128], index: 22, kind: input, shape index: {}]   ;;  %s8236_s20 = inlined_call_operand.vmem [shape: f32[1,32], index: 20, kind: input, shape index: {}]   ;;  %s8237_s21 = inlined_call_operand.vmem [shape: f32[1,32], index: 21, kind: input, shape index: {}]   ;;  %s8238_s23 = inlined_call_operand.vmem [shape: f32[1,128], index: 23, kind: input, shape index: {}]   ;;  %s8239_s24 = inlined_call_operand.vmem [shape: f32[16,128], index: 24, kind: output, shape index: {}]  }
   0x1   :  { %8268 = sst [smem:[#allocation2_spill]] %s8215_s0  ;;  %6111 = vmatprep.subr.bf16.mxu1 %v6900_v19  ;;  %6113 = vmatprep.mubr.msk.bf16.mxu1 %vm6901_vm1, %v6900_v19  ;;  %vm442_vm3 = vcmask 1043456   ;;  %vm1629_vm4 = vcmask 130048  }
   0x2   :  { %8269 = sst [smem:[#allocation3_spill]] %s8216_s12  ;;  %s8277_s27 = sld [smem:[#allocation2_spill]] }
   0x3   :  { %8270 = sst [smem:[#allocation4_spill]] %s8217_s1  ;;  %s8278_s0 = sld [smem:[#allocation3_spill]] }
   0x4   :  { %8271 = sst [smem:[#allocation5_spill]] %s8218_s6  ;;  %s8279_s25 = sld [smem:[#allocation4_spill]] }
   0x5   :  { %8272 = sst [smem:[#allocation6_spill]] %s8219_s4  ;;  %s8254_s6 = smov 64  }
   0x6   :  { %8273 = sst [smem:[#allocation7_spill]] %s8220_s5  ;;  %s8248_s12 = smov 56  }
   0x7   :  { %8274 = sst [smem:[#allocation8_spill]] %s8221_s13  ;;  %s8262_s5 = smov 80  }
   0x8   :  { %8275 = sst [smem:[#allocation9_spill]] %s8222_s7  ;;  %v7045_v0 = vld [vmem:[%s8277_s27] sm:$0xff]  ;;  %v7050_v1 = vld [vmem:[%s8277_s27 + $0x8] sm:$0xff]  ;;  %s8280_s27 = sld [smem:[#allocation5_spill]] }
   0x9   :  { %8276 = sst [smem:[#allocation10_spill]] %s8223_s3  ;;  %v191_v2 = vsel %vm133_vm0, %v7045_v0, 0.0  ;;  %v194_v3 = vsel %vm133_vm0, %v7050_v1, 0.0  ;;  %v6690_v14 = vld [vmem:[%s8278_s0] sm:$0xff]   ;;  %v6691_v15 = vld [vmem:[%s8278_s0 + $0x8] sm:$0xff]   ;;  %s8281_s0 = sld [smem:[#allocation6_spill]] }
   0xa   :  { %192 = vadd.xlane.f32.xlu0 %v191_v2  ;;  %6089 = vmatprep.subr.bf16.mxu0 %v6690_v14  ;;  %v6692_v16 = vld [vmem:[%s8279_s25] sm:$0xff]   ;;  %v6693_v17 = vld [vmem:[%s8279_s25 + $0x8] sm:$0xff]   ;;  %s8282_s3 = sld [smem:[#allocation7_spill]]  ;;  %s8283_s4 = sld [smem:[#allocation8_spill]] }
   0xb   :  { %6090 = vmatpush3.bf16.msra.mxu0 %v6690_v14  ;;  %6093 = vmatprep.mubr.msk.bf16.mxu0 %vm133_vm0, %v6692_v16  ;;  %s8284_s26 = sld [smem:[#allocation9_spill]]  ;;  %s8285_s29 = sld [smem:[#allocation10_spill]] }
   0xc   :  { %6091 = vmatprep.subr.bf16.mxu0 %v6691_v15  ;;  %s8266_s25 = smov 88   ;;  %s8260_s13 = smov 112  }
   0xd   :  { %s8256_s1 = smov 72   ;;  %s8258_s7 = smov 104  }
   0xe   :  { %195 = vadd.xlane.f32.xlu0 %v194_v3  ;;  %v6694_v18 = vld [vmem:[%s8280_s27] sm:$0xff]   ;;  %v6695_v20 = vld [vmem:[%s8280_s27 + $0x8] sm:$0xff]  }
   0xf   :  { %6092 = vmatpush3.bf16.msra.mxu0 %v6691_v15  ;;  %v5684_v29 = vld [vmem:[%s8281_s0] ss:$0 sm:$0xff] }
  0x10   :  { %6097 = vmatprep.subr.bf16.mxu0 %v6900_v19  ;;  %v5685_v33 = vld [vmem:[%s8282_s3] ss:$0 sm:$0xff] }
  0x11   :  { %v5677_v38 = vld [vmem:[%s8283_s4] ss:$0 sm:$0xff]  ;;  %s8264_s4 = smov 120  }
  0x12   :  { %6094 = vmatmul.mubr.msk.bf16.vlgmr.msra.gmra.mrb[0].mxu0 %vm133_vm0, %v6693_v17  ;;  %v5686_v49 = vld [vmem:[%s8284_s26] ss:$0 sm:$0xff] }
  0x13   :  { %6098 = vmatpush3.bf16.msra.mxu0 %v6694_v18  ;;  %6101 = vmatprep.mubr.msk.bf16.mxu0 %vm6901_vm1, %v6900_v19  ;;  %v7130_v63 = vld [vmem:[%s8285_s29] sm:$0xff] }
  0x14   :  { %6099 = vmatprep.subr.bf16.mxu0 %v6900_v19 }
  0x17   :  { %6100 = vmatpush3.bf16.msra.mxu0 %v6695_v20 }
  0x18   :  { %6105 = vmatprep.subr.bf16.mxu0 %v6900_v19 }
  0x97   :  { %v193_v4 = vpop.xlane.xlu0 %192 }
  0x98   :  { %v198_v5 = vmul.f32 0.03125, %v193_v4 }
  0x9a   :  { %v200_v6 = vsub.f32 %v7045_v0, %v198_v5 }
  0x9b   :  { %v196_v7 = vpop.xlane.xlu0 %195 }
  0x9c   :  { %v199_v8 = vmul.f32 0.03125, %v196_v7  ;;  %v202_v9 = vmul.f32 %v200_v6, %v200_v6 }
  0x9e   :  { %v201_v10 = vsub.f32 %v7050_v1, %v199_v8  ;;  %v204_v11 = vsel %vm133_vm0, %v202_v9, 0.0 }
  0x9f   :  { %205 = vadd.xlane.f32.xlu1 %v204_v11 }
  0xa0   :  { %v203_v12 = vmul.f32 %v201_v10, %v201_v10 }
  0xa2   :  { %v207_v13 = vsel %vm133_vm0, %v203_v12, 0.0 }
  0xa3   :  { %208 = vadd.xlane.f32.xlu1 %v207_v13 }
  0xe5   :  { %v6095_v39 = vpop.f32.mrb[0].mxu0 }
  0xe6   :  { %v183_v40 = vadd.f32 %v6095_v39, %v5677_v38  ;;  %v174_v41 = vpop.f32.mrb[1].mxu0 }
  0xe7   :  { %v175_v42 = vadd.f32 %v5677_v38, %v174_v41  ;;  %v6096_v43 = vpop.f32.mrb[2].mxu0 }
  0xe8   :  { %v186_v44 = vadd.f32 %v6096_v43, %v5677_v38  ;;  %v177_v45 = vpop.f32.mrb[3].mxu0 }
  0xe9   :  { %v178_v46 = vadd.f32 %v5677_v38, %v177_v45 }
  0xea   :  { %v7100_v47 = vpack.c.bf16 %v186_v44, %v183_v40 }
  0xeb   :  { %v7102_v48 = vpack.c.bf16 %v178_v46, %v175_v42 }
 0x12c   :  { %v206_v21 = vpop.xlane.xlu1 %205 }
 0x12d   :  { %v210_v22 = vmul.f32 0.03125, %v206_v21 }
 0x12f   :  { %v212_v23 = vadd.f32 1e-06, %v210_v22 }
 0x130   :  { %v209_v24 = vpop.xlane.xlu1 %208 }
 0x131   :  { %6724 = vrsqrt.f32 %v212_v23  ;;  %v211_v25 = vmul.f32 0.03125, %v209_v24 }
 0x133   :  { %v213_v26 = vadd.f32 1e-06, %v211_v25 }
 0x135   :  { %6726 = vrsqrt.f32 %v213_v26 }
 0x13b   :  { %v6725_v27 = vpop.eup %6724 }
 0x13c   :  { %v216_v28 = vmul.f32 %v6725_v27, %v200_v6  ;;  %v7135_v6 = vld [vmem:[%s8285_s29 + $0x8] sm:$0xff] }
 0x13e   :  { %v224_v31 = vmul.f32 %v5684_v29, %v216_v28 }
 0x13f   :  { %v6727_v30 = vpop.eup %6726 }
 0x140   :  { %v217_v32 = vmul.f32 %v6727_v30, %v201_v10  ;;  %v232_v35 = vadd.f32 %v5685_v33, %v224_v31 }
 0x142   :  { %v225_v34 = vmul.f32 %v5684_v29, %v217_v32 }
 0x144   :  { %v233_v36 = vadd.f32 %v5685_v33, %v225_v34 }
 0x146   :  { %v234_v37 = vpack.c.bf16 %v233_v36, %v232_v35 }
 0x148   :  { %6102 = vmatmul.mubr.msk.bf16.vlgmr.msra.gmra.mrb[4].mxu0 %vm133_vm0, %v234_v37 }
 0x149   :  { %6107 = vmatprep.mubr.msk.bf16.mxu0 %vm6901_vm1, %v6900_v19 }
 0x21b   :  { %v295_v50 = vpop.f32.mrb[4].mxu0 }
 0x21c   :  { %v296_v51 = vadd.f32 %v5686_v49, %v295_v50  ;;  %v6103_v52 = vpop.f32.mrb[5].mxu0 }
 0x21d   :  { %v298_v53 = vpop.f32.mrb[6].mxu0 }
 0x21e   :  { %v7107_v54 = vpack.c.bf16 %v296_v51, %v296_v51  ;;  %v299_v55 = vadd.f32 %v5686_v49, %v298_v53  ;;  %v6104_v56 = vpop.f32.mrb[7].mxu0 }
 0x220   :  { %v7109_v57 = vpack.c.bf16 %v299_v55, %v299_v55  ;;  %312 = vrot.lane.b32.xlu0 %v7107_v54, %s6902_s28 }
 0x222   :  { %361 = vrot.lane.b32.xlu1 %v7109_v57, %s6902_s28 }
 0x292   :  { %v313_v58 = vpop.permute.xlu0 %312 }
 0x293   :  { %v319_v59 = vsel %vm314_vm2, %v313_v58, 0 }
 0x294   :  { %6106 = vmatpush3.bf16.xpose.msra.mxu0 %v319_v59  ;;  %v362_v60 = vpop.permute.xlu1 %361 }
 0x295   :  { %v367_v61 = vsel %vm314_vm2, %v362_v60, 0  ;;  %6117 = vmatprep.subr.bf16.mxu0 %v6900_v19 }
 0x296   :  { %6112 = vmatpush3.bf16.xpose.msra.mxu1 %v367_v61 }
 0x297   :  { %6123 = vmatprep.subr.bf16.mxu1 %v6900_v19 }
 0x29b   :  { %6108 = vmatmul.mubr.msk.bf16.vlgmr.msra.gmra.mrb[8].mxu0 %vm314_vm2, %v7107_v54 }
 0x29c   :  { %6119 = vmatprep.mubr.msk.bf16.mxu0 %vm6901_vm1, %v6900_v19 }
 0x29d   :  { %6114 = vmatmul.mubr.msk.bf16.vlgmr.msra.gmra.mrb[0].mxu1 %vm314_vm2, %v7109_v57 }
 0x29e   :  { %6125 = vmatprep.mubr.msk.bf16.mxu1 %vm6901_vm1, %v6900_v19 }
 0x36e   :  { %v355_v62 = vpop.f32.mrb[8].mxu0 }
 0x36f   :  { %v409_v2 = vmul.f32 0.35355338, %v355_v62  ;;  %v6109_v3 = vpop.f32.mrb[9].mxu0 }
 0x370   :  { %v358_v4 = vpop.f32.mrb[10].mxu0  ;;  %v403_v5 = vpop.f32.mrb[0].mxu1 }
 0x371   :  { %v410_v7 = vmul.f32 0.35355338, %v403_v5  ;;  %v6110_v8 = vpop.f32.mrb[11].mxu0  ;;  %v6115_v9 = vpop.f32.mrb[1].mxu1  ;;  %v411_v10 = vadd.f32 %v409_v2, %v7130_v63 }
 0x372   :  { %v406_v11 = vpop.f32.mrb[2].mxu1 }
 0x373   :  { %v6116_v12 = vpop.f32.mrb[3].mxu1  ;;  %v413_v13 = vsel %vm314_vm2, %v411_v10, -inf  ;;  %v412_v14 = vadd.f32 %v410_v7, %v7135_v6 }
 0x374   :  { %414 = vmax.xlane.f32.xlu1 %v413_v13 }
 0x375   :  { %v416_v15 = vsel %vm314_vm2, %v412_v14, -inf }
 0x376   :  { %417 = vmax.xlane.f32.xlu0 %v416_v15 }
 0x385   :  { %486 = vrot.lane.b32.xlu1 %v7109_v57, %s8254_s6 }
 0x389   :  { %537 = vrot.lane.b32.xlu1 %v7107_v54, %s8266_s25 }
 0x401   :  { %v415_v16 = vpop.xlane.xlu1 %414 }
 0x402   :  { %v419_v17 = vsub.f32 %v411_v10, %v415_v16 }
 0x403   :  { %v418_v18 = vpop.xlane.xlu0 %417 }
 0x404   :  { %v421_v20 = vmul.f32 1.442695, %v419_v17  ;;  %v420_v21 = vsub.f32 %v412_v14, %v418_v18 }
 0x405   :  { %v487_v22 = vpop.permute.xlu1 %486 }
 0x406   :  { %6728 = vpow2.f32 %v421_v20  ;;  %v423_v23 = vmul.f32 1.442695, %v420_v21  ;;  %v492_v24 = vsel %vm442_vm3, %v487_v22, 0 }
 0x407   :  { %6124 = vmatpush3.bf16.msra.mxu1 %v492_v24 }
 0x408   :  { %6730 = vpow2.f32 %v423_v23  ;;  %6135 = vmatprep.subr.bf16.mxu1 %v6900_v19 }
 0x409   :  { %v538_v29 = vpop.permute.xlu1 %537 }
 0x40a   :  { %v543_v40 = vsel %vm314_vm2, %v538_v29, 0 }
 0x410   :  { %v6729_v25 = vpop.eup %6728 }
 0x411   :  { %v425_v26 = vsel %vm314_vm2, %v6729_v25, 0.0 }
 0x412   :  { %v6731_v27 = vpop.eup %6730  ;;  %426 = vadd.xlane.f32.xlu0 %v425_v26 }
 0x413   :  { %v428_v28 = vsel %vm314_vm2, %v6731_v27, 0.0 }
 0x414   :  { %429 = vadd.xlane.f32.xlu1 %v428_v28 }
 0x425   :  { %587 = vrot.lane.b32.xlu1 %v7109_v57, %s8266_s25 }
 0x428   :  { %437 = vrot.lane.b32.xlu0 %v7107_v54, %s8254_s6  ;;  %s8290_s6 = smov 56  }
 0x429   :  { %585 = vrot.lane.b32.xlu1 %v7109_v57, %s8264_s4 }
 0x42c   :  { %535 = vrot.lane.b32.xlu0 %v7107_v54, %s8264_s4 }
 0x49f   :  { %v427_v30 = vpop.xlane.xlu0 %426 }
 0x4a0   :  { %6732 = vrcp.f32 %v427_v30  ;;  %v309_v30 = vld [vmem:[%s8224_s8 + $0x4] sm:$0xf] }
 0x4a1   :  { %v430_v31 = vpop.xlane.xlu1 %429 }
 0x4a2   :  { %6734 = vrcp.f32 %v430_v31 }
 0x4a3   :  { %v438_v32 = vpop.permute.xlu0 %437 }
 0x4a4   :  { %v444_v33 = vsel %vm442_vm3, %v438_v32, 0 }
 0x4a5   :  { %6118 = vmatpush3.bf16.msra.mxu0 %v444_v33  ;;  %v588_v39 = vpop.permute.xlu1 %587  ;;  %v764_v33 = vsel %vm442_vm3, %v309_v30, 0 }
 0x4a6   :  { %6129 = vmatprep.subr.bf16.mxu0 %v6900_v19  ;;  %v593_v42 = vsel %vm314_vm2, %v588_v39, 0 }
 0x4a7   :  { %v536_v43 = vpop.permute.xlu0 %535 }
 0x4a9   :  { %v586_v44 = vpop.permute.xlu1 %585 }
 0x4aa   :  { %v6733_v34 = vpop.eup %6732 }
 0x4ab   :  { %v433_v35 = vmul.f32 %v6733_v34, %v6729_v25 }
 0x4ac   :  { %v6735_v36 = vpop.eup %6734 }
 0x4ad   :  { %v435_v37 = vpack.c.bf16 %v433_v35, %v433_v35  ;;  %v434_v38 = vmul.f32 %v6735_v36, %v6731_v27  ;;  %v308_v35 = vld [vmem:[%s8224_s8] sm:$0xf] }
 0x4af   :  { %6120 = vmatmul.mubr.msk.bf16.vlgmr.msra.gmra.mrb[12].mxu0 %vm314_vm2, %v435_v37  ;;  %v436_v41 = vpack.c.bf16 %v434_v38, %v434_v38  ;;  %v811_v38 = vsel %vm442_vm3, %v308_v35, 0 }
 0x4b0   :  { %6130 = vmatpush3.bf16.xpose.msra.mxu0 %v543_v40  ;;  %6131 = vmatprep.mubr.msk.bf16.mxu0 %vm6901_vm1, %v6900_v19 }
 0x4b1   :  { %6126 = vmatmul.mubr.msk.bf16.vlgmr.msra.gmra.mrb[4].mxu1 %vm314_vm2, %v436_v41  ;;  %6141 = vmatprep.subr.bf16.mxu0 %v6900_v19 }
 0x4b2   :  { %6136 = vmatpush3.bf16.xpose.msra.mxu1 %v593_v42  ;;  %6137 = vmatprep.mubr.msk.bf16.mxu1 %vm6901_vm1, %v6900_v19 }
 0x4b3   :  { %6147 = vmatprep.subr.bf16.mxu1 %v6900_v19 }
 0x4b7   :  { %6132 = vmatmul.mubr.msk.bf16.vlgmr.msra.gmra.mrb[16].mxu0 %vm314_vm2, %v536_v43 }
 0x4b8   :  { %6143 = vmatprep.mubr.msk.bf16.mxu0 %vm6901_vm1, %v6900_v19 }
 0x4b9   :  { %6138 = vmatmul.mubr.msk.bf16.vlgmr.msra.gmra.mrb[8].mxu1 %vm314_vm2, %v586_v44 }
 0x4ba   :  { %6149 = vmatprep.mubr.msk.bf16.mxu1 %vm6901_vm1, %v6900_v19 }
 0x582   :  { %v7175_v45 = vpop.f32.mrb[12].mxu0 }
 0x583   :  { %v6121_v46 = vpop.f32.mrb[13].mxu0 }
 0x584   :  { %v483_v49 = vpop.f32.mrb[14].mxu0  ;;  %v7177_v50 = vpop.f32.mrb[4].mxu1 }
 0x585   :  { %v534_v51 = vpack.c.bf16 %v7177_v50, %v7175_v45  ;;  %v6122_v52 = vpop.f32.mrb[15].mxu0  ;;  %v6127_v53 = vpop.f32.mrb[5].mxu1 }
 0x586   :  { %v531_v55 = vpop.f32.mrb[6].mxu1 }
 0x587   :  { %v6128_v56 = vpop.f32.mrb[7].mxu1 }
 0x58a   :  { %v579_v58 = vpop.f32.mrb[16].mxu0 }
 0x58b   :  { %v635_v59 = vmul.f32 0.35355338, %v579_v58  ;;  %v6133_v60 = vpop.f32.mrb[17].mxu0 }
 0x58c   :  { %v582_v61 = vpop.f32.mrb[18].mxu0  ;;  %v629_v62 = vpop.f32.mrb[8].mxu1 }
 0x58d   :  { %v636_v2 = vmul.f32 0.35355338, %v629_v62  ;;  %v6134_v3 = vpop.f32.mrb[19].mxu0  ;;  %v6139_v4 = vpop.f32.mrb[9].mxu1  ;;  %v637_v5 = vadd.f32 %v635_v59, %v7130_v63 }
 0x58e   :  { %v632_v7 = vpop.f32.mrb[10].mxu1 }
 0x58f   :  { %v6140_v8 = vpop.f32.mrb[11].mxu1  ;;  %v639_v9 = vsel %vm314_vm2, %v637_v5, -inf  ;;  %v638_v10 = vadd.f32 %v636_v2, %v7135_v6 }
 0x590   :  { %640 = vmax.xlane.f32.xlu0 %v639_v9 }
 0x591   :  { %v642_v11 = vsel %vm314_vm2, %v638_v10, -inf }
 0x592   :  { %643 = vmax.xlane.f32.xlu1 %v642_v11 }
 0x5a3   :  { %711 = vrot.lane.b32.xlu1 %v7109_v57, %s8248_s12 }
 0x5a7   :  { %856 = vrot.lane.b32.xlu1 %v7107_v54, %s8262_s5 }
 0x5ab   :  { %906 = vrot.lane.b32.xlu1 %v7109_v57, %s8262_s5 }
 0x5af   :  { %904 = vrot.lane.b32.xlu1 %v7109_v57, %s8260_s13 }
 0x61d   :  { %v641_v12 = vpop.xlane.xlu0 %640 }
 0x61e   :  { %v645_v13 = vsub.f32 %v637_v5, %v641_v12 }
 0x61f   :  { %v644_v14 = vpop.xlane.xlu1 %643 }
 0x620   :  { %v647_v15 = vmul.f32 1.442695, %v645_v13  ;;  %v646_v16 = vsub.f32 %v638_v10, %v644_v14 }
 0x622   :  { %6736 = vpow2.f32 %v647_v15  ;;  %v649_v17 = vmul.f32 1.442695, %v646_v16 }
 0x623   :  { %v712_v18 = vpop.permute.xlu1 %711 }
 0x624   :  { %6738 = vpow2.f32 %v649_v17  ;;  %v717_v20 = vsel %vm442_vm3, %v712_v18, 0 }
 0x625   :  { %6148 = vmatpush3.bf16.msra.mxu1 %v717_v20 }
 0x626   :  { %6159 = vmatprep.subr.bf16.mxu1 %v6900_v19 }
 0x627   :  { %v857_v39 = vpop.permute.xlu1 %856 }
 0x628   :  { %v862_v53 = vsel %vm314_vm2, %v857_v39, 0 }
 0x62b   :  { %v907_v40 = vpop.permute.xlu1 %906 }
 0x62c   :  { %v6737_v21 = vpop.eup %6736  ;;  %v912_v41 = vsel %vm314_vm2, %v907_v40, 0 }
 0x62d   :  { %v651_v22 = vsel %vm314_vm2, %v6737_v21, 0.0 }
 0x62e   :  { %v6739_v23 = vpop.eup %6738  ;;  %652 = vadd.xlane.f32.xlu0 %v651_v22 }
 0x62f   :  { %v654_v24 = vsel %vm314_vm2, %v6739_v23, 0.0  ;;  %v905_v42 = vpop.permute.xlu1 %904 }
 0x632   :  { %655 = vadd.xlane.f32.xlu0 %v654_v24 }
 0x648   :  { %663 = vrot.lane.b32.xlu0 %v7107_v54, %s8248_s12  ;;  %s8250_s12 = smov 48  }
 0x64c   :  { %854 = vrot.lane.b32.xlu0 %v7107_v54, %s8260_s13 }
 0x6bb   :  { %v653_v25 = vpop.xlane.xlu0 %652 }
 0x6bc   :  { %6740 = vrcp.f32 %v653_v25 }
 0x6bf   :  { %v656_v26 = vpop.xlane.xlu0 %655 }
 0x6c0   :  { %6742 = vrcp.f32 %v656_v26 }
 0x6c3   :  { %v664_v27 = vpop.permute.xlu0 %663 }
 0x6c4   :  { %v669_v28 = vsel %vm442_vm3, %v664_v27, 0 }
 0x6c5   :  { %6142 = vmatpush3.bf16.msra.mxu0 %v669_v28 }
 0x6c6   :  { %v6741_v29 = vpop.eup %6740  ;;  %6153 = vmatprep.subr.bf16.mxu0 %v6900_v19 }
 0x6c7   :  { %v659_v31 = vmul.f32 %v6741_v29, %v6737_v21  ;;  %v855_v59 = vpop.permute.xlu0 %854 }
 0x6c9   :  { %v661_v32 = vpack.c.bf16 %v659_v31, %v659_v31 }
 0x6ca   :  { %v6743_v34 = vpop.eup %6742 }
 0x6cb   :  { %6144 = vmatmul.mubr.msk.bf16.vlgmr.msra.gmra.mrb[20].mxu0 %vm314_vm2, %v661_v32  ;;  %v660_v36 = vmul.f32 %v6743_v34, %v6739_v23 }
 0x6cc   :  { %6154 = vmatpush3.bf16.msra.mxu0 %v764_v33  ;;  %6155 = vmatprep.mubr.msk.bf16.mxu0 %vm6901_vm1, %v6900_v19 }
 0x6cd   :  { %v662_v37 = vpack.c.bf16 %v660_v36, %v660_v36  ;;  %6165 = vmatprep.subr.bf16.mxu0 %v6900_v19 }
 0x6cf   :  { %6150 = vmatmul.mubr.msk.bf16.vlgmr.msra.gmra.mrb[12].mxu1 %vm314_vm2, %v662_v37 }
 0x6d0   :  { %6160 = vmatpush3.bf16.msra.mxu1 %v811_v38  ;;  %6161 = vmatprep.mubr.msk.bf16.mxu1 %vm6901_vm1, %v6900_v19 }
 0x6d1   :  { %6171 = vmatprep.subr.bf16.mxu1 %v6900_v19 }
 0x6d7   :  { %6162 = vmatmul.mubr.msk.bf16.vlgmr.msra.gmra.mrb[16].mxu1 %vm314_vm2, %v534_v51 }
 0x6d8   :  { %6173 = vmatprep.mubr.msk.bf16.mxu1 %vm6901_vm1, %v6900_v19 }
 0x6d9   :  { %6172 = vmatpush3.bf16.xpose.msra.mxu1 %v912_v41 }
 0x6da   :  { %6183 = vmatprep.subr.bf16.mxu1 %v6900_v19 }
 0x6e0   :  { %6174 = vmatmul.mubr.msk.bf16.vlgmr.msra.gmra.mrb[20].mxu1 %vm314_vm2, %v905_v42 }
 0x6e1   :  { %6185 = vmatprep.mubr.msk.bf16.mxu1 %vm6901_vm1, %v6900_v19 }
 0x79e   :  { %v705_v43 = vpop.f32.mrb[20].mxu0 }
 0x79f   :  { %v6145_v44 = vpop.f32.mrb[21].mxu0 }
 0x7a0   :  { %v708_v46 = vpop.f32.mrb[22].mxu0 }
 0x7a1   :  { %v6146_v45 = vpop.f32.mrb[23].mxu0 }
 0x7a2   :  { %v753_v49 = vpop.f32.mrb[12].mxu1 }
 0x7a3   :  { %v759_v50 = vpack.c.bf16 %v753_v49, %v705_v43  ;;  %v6151_v51 = vpop.f32.mrb[13].mxu1 }
 0x7a4   :  { %v756_v52 = vpop.f32.mrb[14].mxu1 }
 0x7a5   :  { %v6152_v55 = vpop.f32.mrb[15].mxu1  ;;  %6156 = vmatmul.mubr.msk.bf16.vlgmr.msra.gmra.mrb[24].mxu0 %vm314_vm2, %v759_v50 }
 0x7a6   :  { %6166 = vmatpush3.bf16.xpose.msra.mxu0 %v862_v53  ;;  %6167 = vmatprep.mubr.msk.bf16.mxu0 %vm6901_vm1, %v6900_v19  ;;  %v310_v55 = vld [vmem:[%s8224_s8 + $0x8] sm:$0xf] }
 0x7a7   :  { %6177 = vmatprep.subr.bf16.mxu0 %v6900_v19 }
 0x7aa   :  { %v847_v56 = vpop.f32.mrb[16].mxu1 }
 0x7ab   :  { %v6163_v58 = vpop.f32.mrb[17].mxu1 }
 0x7ac   :  { %v850_v60 = vpop.f32.mrb[18].mxu1 }
 0x7ad   :  { %v6164_v61 = vpop.f32.mrb[19].mxu1  ;;  %6168 = vmatmul.mubr.msk.bf16.vlgmr.msra.gmra.mrb[28].mxu0 %vm314_vm2, %v855_v59 }
 0x7ae   :  { %6179 = vmatprep.mubr.msk.bf16.mxu0 %vm6901_vm1, %v6900_v19 }
 0x7b3   :  { %v948_v62 = vpop.f32.mrb[20].mxu1 }
 0x7b4   :  { %v955_v2 = vmul.f32 0.35355338, %v948_v62  ;;  %v6175_v3 = vpop.f32.mrb[21].mxu1 }
 0x7b5   :  { %v951_v4 = vpop.f32.mrb[22].mxu1 }
 0x7b6   :  { %v6176_v5 = vpop.f32.mrb[23].mxu1  ;;  %v957_v7 = vadd.f32 %v955_v2, %v7135_v6 }
 0x7b8   :  { %v961_v8 = vsel %vm314_vm2, %v957_v7, -inf }
 0x7b9   :  { %962 = vmax.xlane.f32.xlu1 %v961_v8 }
 0x7ca   :  { %1030 = vrot.lane.b32.xlu1 %v7109_v57, %s8250_s12 }
 0x7ce   :  { %1130 = vrot.lane.b32.xlu1 %v7107_v54, %s8256_s1 }
 0x7d2   :  { %1180 = vrot.lane.b32.xlu1 %v7109_v57, %s8256_s1 }
 0x7d6   :  { %1178 = vrot.lane.b32.xlu1 %v7109_v57, %s8258_s7 }
 0x846   :  { %v963_v9 = vpop.xlane.xlu1 %962 }
 0x847   :  { %v965_v12 = vsub.f32 %v957_v7, %v963_v9 }
 0x849   :  { %v968_v13 = vmul.f32 1.442695, %v965_v12 }
 0x84a   :  { %v1031_v10 = vpop.permute.xlu1 %1030 }
 0x84b   :  { %v1036_v11 = vsel %vm442_vm3, %v1031_v10, 0  ;;  %6744 = vpow2.f32 %v968_v13 }
 0x84c   :  { %6184 = vmatpush3.bf16.msra.mxu1 %v1036_v11 }
 0x84d   :  { %6195 = vmatprep.subr.bf16.mxu1 %v6900_v19 }
 0x84e   :  { %v1131_v38 = vpop.permute.xlu1 %1130 }
 0x84f   :  { %v1136_v40 = vsel %vm314_vm2, %v1131_v38, 0 }
 0x852   :  { %v1181_v4 = vpop.permute.xlu1 %1180 }
 0x853   :  { %v1186_v10 = vsel %vm314_vm2, %v1181_v4, 0 }
 0x855   :  { %v6745_v28 = vpop.eup %6744 }
 0x856   :  { %v973_v29 = vsel %vm314_vm2, %v6745_v28, 0.0 }
 0x878   :  { %v800_v14 = vpop.f32.mrb[24].mxu0 }
 0x879   :  { %v7250_v15 = vadd.f32 %v847_v56, %v800_v14  ;;  %v6157_v16 = vpop.f32.mrb[25].mxu0  ;;  %v1083_v56 = vsel %vm442_vm3, %v310_v55, 0 }
 0x87a   :  { %v803_v17 = vpop.f32.mrb[26].mxu0 }
 0x87b   :  { %v7252_v18 = vadd.f32 %v850_v60, %v803_v17  ;;  %v6158_v20 = vpop.f32.mrb[27].mxu0 }
 0x880   :  { %v898_v21 = vpop.f32.mrb[28].mxu0 }
 0x881   :  { %v954_v22 = vmul.f32 0.35355338, %v898_v21  ;;  %v6169_v23 = vpop.f32.mrb[29].mxu0 }
 0x882   :  { %v901_v24 = vpop.f32.mrb[30].mxu0 }
 0x883   :  { %v6170_v25 = vpop.f32.mrb[31].mxu0  ;;  %v956_v26 = vadd.f32 %v954_v22, %v7130_v63 }
 0x885   :  { %v958_v27 = vsel %vm314_vm2, %v956_v26, -inf }
 0x886   :  { %959 = vmax.xlane.f32.xlu0 %v958_v27 }
 0x88a   :  { %974 = vadd.xlane.f32.xlu0 %v973_v29 }
 0x913   :  { %v960_v30 = vpop.xlane.xlu0 %959 }
 0x914   :  { %v964_v31 = vsub.f32 %v956_v26, %v960_v30 }
 0x916   :  { %v966_v32 = vmul.f32 1.442695, %v964_v31 }
 0x917   :  { %v975_v33 = vpop.xlane.xlu0 %974 }
 0x918   :  { %6746 = vpow2.f32 %v966_v32 }
 0x919   :  { %6748 = vrcp.f32 %v975_v33 }
 0x922   :  { %v6747_v34 = vpop.eup %6746 }
 0x923   :  { %v6749_v35 = vpop.eup %6748  ;;  %v970_v36 = vsel %vm314_vm2, %v6747_v34, 0.0 }
 0x924   :  { %971 = vadd.xlane.f32.xlu0 %v970_v36  ;;  %v979_v37 = vmul.f32 %v6749_v35, %v6745_v28 }
 0x926   :  { %v981_v39 = vpack.c.bf16 %v979_v37, %v979_v37 }
 0x928   :  { %6186 = vmatmul.mubr.msk.bf16.vlgmr.msra.gmra.mrb[24].mxu1 %vm314_vm2, %v981_v39 }
 0x929   :  { %6196 = vmatpush3.bf16.xpose.msra.mxu1 %v1136_v40  ;;  %6197 = vmatprep.mubr.msk.bf16.mxu1 %vm6901_vm1, %v6900_v19 }
 0x92a   :  { %6207 = vmatprep.subr.bf16.mxu1 %v6900_v19 }
 0x93a   :  { %982 = vrot.lane.b32.xlu0 %v7107_v54, %s8250_s12  ;;  %s8252_s12 = smov 40  }
 0x93e   :  { %1128 = vrot.lane.b32.xlu0 %v7107_v54, %s8258_s7 }
 0x9b1   :  { %v972_v41 = vpop.xlane.xlu0 %971 }
 0x9b2   :  { %6750 = vrcp.f32 %v972_v41 }
 0x9b5   :  { %v983_v42 = vpop.permute.xlu0 %982 }
 0x9b6   :  { %v988_v43 = vsel %vm442_vm3, %v983_v42, 0 }
 0x9b7   :  { %6178 = vmatpush3.bf16.msra.mxu0 %v988_v43 }
 0x9b8   :  { %6189 = vmatprep.subr.bf16.mxu0 %v6900_v19 }
 0x9b9   :  { %v1129_v44 = vpop.permute.xlu0 %1128 }
 0x9ba   :  { %6198 = vmatmul.mubr.msk.bf16.vlgmr.msra.gmra.mrb[28].mxu1 %vm314_vm2, %v1129_v44 }
 0x9bb   :  { %6209 = vmatprep.mubr.msk.bf16.mxu1 %vm6901_vm1, %v6900_v19 }
 0x9bc   :  { %v6751_v46 = vpop.eup %6750 }
 0x9bd   :  { %v978_v45 = vmul.f32 %v6751_v46, %v6747_v34  ;;  %v311_v46 = vld [vmem:[%s8224_s8 + $0xc] sm:$0xf] }
 0x9bf   :  { %v980_v49 = vpack.c.bf16 %v978_v45, %v978_v45  ;;  %v1357_v45 = vsel %vm442_vm3, %v311_v46, 0 }
 0x9c1   :  { %6180 = vmatmul.mubr.msk.bf16.vlgmr.msra.gmra.mrb[32].mxu0 %vm314_vm2, %v980_v49 }
 0x9c2   :  { %6191 = vmatprep.mubr.msk.bf16.mxu0 %vm6901_vm1, %v6900_v19  ;;  %6190 = vmatpush3.bf16.msra.mxu0 %v1083_v56 }
 0x9c3   :  { %6201 = vmatprep.subr.bf16.mxu0 %v6900_v19 }
 0x9fb   :  { %v1072_v50 = vpop.f32.mrb[24].mxu1 }
 0x9fc   :  { %v6187_v51 = vpop.f32.mrb[25].mxu1 }
 0x9fd   :  { %v1075_v52 = vpop.f32.mrb[26].mxu1 }
 0x9fe   :  { %v6188_v53 = vpop.f32.mrb[27].mxu1 }
 0xa8d   :  { %v1172_v58 = vpop.f32.mrb[28].mxu1 }
 0xa8e   :  { %v1228_v59 = vmul.f32 0.35355338, %v1172_v58  ;;  %v6199_v60 = vpop.f32.mrb[29].mxu1 }
 0xa8f   :  { %v1175_v61 = vpop.f32.mrb[30].mxu1  ;;  %v1537_v60 = vsel %vm314_vm2, %v7102_v48, 0 }
 0xa90   :  { %v6200_v62 = vpop.f32.mrb[31].mxu1  ;;  %v1230_v2 = vadd.f32 %v1228_v59, %v7130_v63  ;;  %v1179_v63 = vpop.permute.xlu1 %1178 }
 0xa92   :  { %v1232_v3 = vsel %vm314_vm2, %v1230_v2, -inf }
 0xa93   :  { %1233 = vmax.xlane.f32.xlu0 %v1232_v3  ;;  %v5712_v3 = vld [vmem:[%s8225_s9] ss:$0 sm:$0xff] }
 0xa94   :  { %v1024_v5 = vpop.f32.mrb[32].mxu0 }
 0xa95   :  { %v1078_v7 = vpack.c.bf16 %v1072_v50, %v1024_v5  ;;  %v6181_v8 = vpop.f32.mrb[33].mxu0 }
 0xa96   :  { %v1027_v9 = vpop.f32.mrb[34].mxu0 }
 0xa97   :  { %v6182_v11 = vpop.f32.mrb[35].mxu0  ;;  %6192 = vmatmul.mubr.msk.bf16.vlgmr.msra.gmra.mrb[36].mxu0 %vm314_vm2, %v1078_v7 }
 0xa98   :  { %6202 = vmatpush3.bf16.xpose.msra.mxu0 %v1186_v10  ;;  %6203 = vmatprep.mubr.msk.bf16.mxu0 %vm6901_vm1, %v6900_v19 }
 0xa99   :  { %6213 = vmatprep.subr.bf16.mxu0 %v6900_v19 }
 0xa9f   :  { %6204 = vmatmul.mubr.msk.bf16.vlgmr.msra.gmra.mrb[40].mxu0 %vm314_vm2, %v1179_v63 }
 0xaa0   :  { %6215 = vmatprep.mubr.msk.bf16.mxu0 %vm6901_vm1, %v6900_v19 }
 0xb20   :  { %v1234_v12 = vpop.xlane.xlu0 %1233 }
 0xb21   :  { %v1238_v13 = vsub.f32 %v1230_v2, %v1234_v12 }
 0xb23   :  { %v1240_v14 = vmul.f32 1.442695, %v1238_v13 }
 0xb25   :  { %6752 = vpow2.f32 %v1240_v14 }
 0xb2f   :  { %v6753_v16 = vpop.eup %6752 }
 0xb30   :  { %v1244_v17 = vsel %vm314_vm2, %v6753_v16, 0.0 }
 0xb31   :  { %1245 = vadd.xlane.f32.xlu0 %v1244_v17 }
 0xb6a   :  { %v1119_v20 = vpop.f32.mrb[36].mxu0 }
 0xb6b   :  { %v7292_v21 = vadd.f32 %v1119_v20, %v7250_v15  ;;  %v6193_v22 = vpop.f32.mrb[37].mxu0 }
 0xb6c   :  { %v1122_v23 = vpop.f32.mrb[38].mxu0 }
 0xb6d   :  { %v7295_v24 = vadd.f32 %v1122_v23, %v7252_v18  ;;  %v6194_v25 = vpop.f32.mrb[39].mxu0 }
 0xb6e   :  { %v6697_v25 = vld [vmem:[%s8226_s10 + $0x8] sm:$0xff]  }
 0xb72   :  { %v1222_v26 = vpop.f32.mrb[40].mxu0 }
 0xb73   :  { %v1229_v27 = vmul.f32 0.35355338, %v1222_v26  ;;  %v6205_v28 = vpop.f32.mrb[41].mxu0 }
 0xb74   :  { %v1225_v29 = vpop.f32.mrb[42].mxu0 }
 0xb75   :  { %v6206_v30 = vpop.f32.mrb[43].mxu0  ;;  %v1231_v31 = vadd.f32 %v1229_v27, %v7135_v6 }
 0xb77   :  { %v1235_v32 = vsel %vm314_vm2, %v1231_v31, -inf }
 0xb78   :  { %1236 = vmax.xlane.f32.xlu1 %v1235_v32 }
 0xb89   :  { %1304 = vrot.lane.b32.xlu1 %v7109_v57, %s8252_s12 }
 0xbbe   :  { %v1246_v37 = vpop.xlane.xlu0 %1245 }
 0xc05   :  { %v1237_v15 = vpop.xlane.xlu1 %1236 }
 0xc06   :  { %v1239_v33 = vsub.f32 %v1231_v31, %v1237_v15  ;;  %v5713_v15 = vld [vmem:[%s8281_s0 + $0x1] ss:$0 sm:$0xff] }
 0xc08   :  { %v1242_v34 = vmul.f32 1.442695, %v1239_v33 }
 0xc09   :  { %v1305_v18 = vpop.permute.xlu1 %1304 }
 0xc0a   :  { %6754 = vpow2.f32 %v1242_v34  ;;  %v1310_v35 = vsel %vm442_vm3, %v1305_v18, 0 }
 0xc0b   :  { %6214 = vmatpush3.bf16.msra.mxu0 %v1310_v35  ;;  %6756 = vrcp.f32 %v1246_v37 }
 0xc0c   :  { %6225 = vmatprep.subr.bf16.mxu0 %v6900_v19 }
 0xc14   :  { %v6755_v36 = vpop.eup %6754 }
 0xc15   :  { %v1247_v6 = vsel %vm314_vm2, %v6755_v36, 0.0  ;;  %v6757_v57 = vpop.eup %6756 }
 0xc16   :  { %1248 = vadd.xlane.f32.xlu0 %v1247_v6  ;;  %v1252_v39 = vmul.f32 %v6757_v57, %v6753_v16 }
 0xc18   :  { %v1254_v42 = vpack.c.bf16 %v1252_v39, %v1252_v39  ;;  %v1583_v39 = vsel %vm314_vm2, %v7100_v47, 0 }
 0xc2c   :  { %1256 = vrot.lane.b32.xlu0 %v7107_v54, %s8252_s12  ;;  %s8286_s12 = smov 72  }
 0xca3   :  { %v1249_v38 = vpop.xlane.xlu0 %1248 }
 0xca4   :  { %6758 = vrcp.f32 %v1249_v38 }
 0xca7   :  { %v1257_v40 = vpop.permute.xlu0 %1256 }
 0xca8   :  { %v1262_v41 = vsel %vm442_vm3, %v1257_v40, 0  ;;  %v5715_v40 = vld [vmem:[%s8227_s11] ss:$0 sm:$0xff] }
 0xca9   :  { %6208 = vmatpush3.bf16.msra.mxu1 %v1262_v41 }
 0xcaa   :  { %6219 = vmatprep.subr.bf16.mxu1 %v6900_v19 }
 0xcac   :  { %6210 = vmatmul.mubr.msk.bf16.vlgmr.msra.gmra.mrb[32].mxu1 %vm314_vm2, %v1254_v42 }
 0xcad   :  { %6221 = vmatprep.mubr.msk.bf16.mxu1 %vm6901_vm1, %v6900_v19  ;;  %6220 = vmatpush3.bf16.msra.mxu1 %v1357_v45 }
 0xcae   :  { %v6759_v43 = vpop.eup %6758  ;;  %6233 = vmatprep.subr.bf16.mxu1 %v6900_v19 }
 0xcaf   :  { %v1253_v54 = vmul.f32 %v6759_v43, %v6755_v36  ;;  %v5714_v36 = vld [vmem:[%s8282_s3 + $0x1] ss:$0 sm:$0xff] }
 0xcb1   :  { %v1255_v44 = vpack.c.bf16 %v1253_v54, %v1253_v54 }
 0xcb3   :  { %6216 = vmatmul.mubr.msk.bf16.vlgmr.msra.gmra.mrb[44].mxu0 %vm314_vm2, %v1255_v44 }
 0xcb4   :  { %6229 = vmatprep.mubr.msk.bf16.mxu0 %vm6901_vm1, %v6900_v19 }
 0xd7f   :  { %v1298_v49 = vpop.f32.mrb[32].mxu1 }
 0xd80   :  { %v6211_v50 = vpop.f32.mrb[33].mxu1 }
 0xd81   :  { %v1301_v51 = vpop.f32.mrb[34].mxu1 }
 0xd82   :  { %v6212_v52 = vpop.f32.mrb[35].mxu1  ;;  %v7382_v51 = vld [vmem:[%s8228_s2] sm:$0xff] }
 0xd86   :  { %v1346_v53 = vpop.f32.mrb[44].mxu0 }
 0xd87   :  { %v1352_v55 = vpack.c.bf16 %v1346_v53, %v1298_v49  ;;  %v6217_v56 = vpop.f32.mrb[45].mxu0 }
 0xd88   :  { %v1349_v58 = vpop.f32.mrb[46].mxu0 }
 0xd89   :  { %v6218_v59 = vpop.f32.mrb[47].mxu0  ;;  %6222 = vmatmul.mubr.msk.bf16.vlgmr.msra.gmra.mrb[36].mxu1 %vm314_vm2, %v1352_v55  ;;  %v7387_v58 = vld [vmem:[%s8228_s2 + $0x8] sm:$0xff] }
 0xd8a   :  { %6234 = vmatpush3.bf16.xpose.msra.mxu1 %v1537_v60  ;;  %6235 = vmatprep.mubr.msk.bf16.mxu1 %vm6901_vm1, %v6900_v19 }
 0xd8b   :  { %6245 = vmatprep.subr.bf16.mxu1 %v6900_v19 }
 0xe5c   :  { %v1393_v61 = vpop.f32.mrb[36].mxu1 }
 0xe5d   :  { %v1400_v62 = vadd.f32 %v1393_v61, %v7292_v21  ;;  %v6223_v2 = vpop.f32.mrb[37].mxu1 }
 0xe5e   :  { %v1396_v4 = vpop.f32.mrb[38].mxu1 }
 0xe5f   :  { %v1402_v5 = vadd.f32 %v1400_v62, %v7045_v0  ;;  %v1401_v7 = vadd.f32 %v1396_v4, %v7295_v24  ;;  %v6224_v8 = vpop.f32.mrb[39].mxu1  ;;  %v6696_v24 = vld [vmem:[%s8226_s10] sm:$0xff]  }
 0xe60   :  { %6226 = vmatpush3.bf16.msra.mxu0 %v6696_v24 }
 0xe61   :  { %v7331_v9 = vadd.f32 %v5712_v3, %v1402_v5  ;;  %v1403_v10 = vadd.f32 %v1401_v7, %v7050_v1  ;;  %6227 = vmatprep.subr.bf16.mxu0 %v6900_v19 }
 0xe63   :  { %v7334_v11 = vadd.f32 %v5712_v3, %v1403_v10  ;;  %v1413_v63 = vsel %vm133_vm0, %v7331_v9, 0.0 }
 0xe64   :  { %1414 = vadd.xlane.f32.xlu1 %v1413_v63  ;;  %6228 = vmatpush3.bf16.msra.mxu0 %v6697_v25 }
 0xe65   :  { %v1416_v12 = vsel %vm133_vm0, %v7334_v11, 0.0  ;;  %6239 = vmatprep.subr.bf16.mxu0 %v6900_v19 }
 0xe66   :  { %1417 = vadd.xlane.f32.xlu0 %v1416_v12 }
 0xef1   :  { %v1415_v13 = vpop.xlane.xlu1 %1414 }
 0xef2   :  { %v1419_v14 = vmul.f32 0.03125, %v1415_v13 }
 0xef3   :  { %v1418_v0 = vpop.xlane.xlu0 %1417 }
 0xef4   :  { %v1421_v16 = vsub.f32 %v7331_v9, %v1419_v14  ;;  %v1420_v17 = vmul.f32 0.03125, %v1418_v0 }
 0xef6   :  { %v1422_v20 = vsub.f32 %v7334_v11, %v1420_v17  ;;  %v1423_v21 = vmul.f32 %v1421_v16, %v1421_v16 }
 0xef8   :  { %v1425_v1 = vsel %vm133_vm0, %v1423_v21, 0.0  ;;  %v1424_v22 = vmul.f32 %v1422_v20, %v1422_v20 }
 0xef9   :  { %1426 = vadd.xlane.f32.xlu0 %v1425_v1 }
 0xefa   :  { %v1428_v23 = vsel %vm133_vm0, %v1424_v22, 0.0 }
 0xefb   :  { %1429 = vadd.xlane.f32.xlu1 %v1428_v23 }
 0xf86   :  { %v1427_v26 = vpop.xlane.xlu0 %1426 }
 0xf87   :  { %v1431_v27 = vmul.f32 0.03125, %v1427_v26 }
 0xf88   :  { %v1430_v28 = vpop.xlane.xlu1 %1429 }
 0xf89   :  { %v1433_v29 = vadd.f32 1e-06, %v1431_v27  ;;  %v1432_v30 = vmul.f32 0.03125, %v1430_v28 }
 0xf8b   :  { %6760 = vrsqrt.f32 %v1433_v29  ;;  %v1434_v31 = vadd.f32 1e-06, %v1432_v30 }
 0xf8d   :  { %6762 = vrsqrt.f32 %v1434_v31 }
 0xf95   :  { %v6761_v32 = vpop.eup %6760 }
 0xf96   :  { %v1437_v33 = vmul.f32 %v6761_v32, %v1421_v16 }
 0xf97   :  { %v6763_v34 = vpop.eup %6762 }
 0xf98   :  { %v1445_v18 = vmul.f32 %v5713_v15, %v1437_v33  ;;  %v1438_v35 = vmul.f32 %v6763_v34, %v1422_v20 }
 0xf9a   :  { %v1446_v6 = vmul.f32 %v5713_v15, %v1438_v35  ;;  %v1453_v37 = vadd.f32 %v5714_v36, %v1445_v18 }
 0xf9c   :  { %v1454_v57 = vadd.f32 %v5714_v36, %v1446_v6 }
 0xf9e   :  { %v1455_v38 = vpack.c.bf16 %v1454_v57, %v1453_v37 }
 0xfa0   :  { %6230 = vmatmul.mubr.msk.bf16.vlgmr.msra.gmra.mrb[48].mxu0 %vm133_vm0, %v1455_v38 }
 0xfa1   :  { %6240 = vmatpush3.bf16.xpose.msra.mxu0 %v1583_v39  ;;  %6241 = vmatprep.mubr.msk.bf16.mxu0 %vm6901_vm1, %v6900_v19 }
 0xfa2   :  { %6251 = vmatprep.subr.bf16.mxu0 %v6900_v19 }
0x1073   :  { %v1516_v41 = vpop.f32.mrb[48].mxu0 }
0x1074   :  { %v1517_v42 = vadd.f32 %v5715_v40, %v1516_v41  ;;  %v6231_v43 = vpop.f32.mrb[49].mxu0 }
0x1075   :  { %v1519_v54 = vpop.f32.mrb[50].mxu0 }
0x1076   :  { %v7367_v44 = vpack.c.bf16 %v1517_v42, %v1517_v42  ;;  %v1520_v46 = vadd.f32 %v5715_v40, %v1519_v54  ;;  %v6232_v45 = vpop.f32.mrb[51].mxu0 }
0x1078   :  { %v7369_v49 = vpack.c.bf16 %v1520_v46, %v1520_v46  ;;  %6236 = vmatmul.mubr.msk.bf16.vlgmr.msra.gmra.mrb[40].mxu1 %vm314_vm2, %v7367_v44 }
0x1079   :  { %6247 = vmatprep.mubr.msk.bf16.mxu1 %vm6901_vm1, %v6900_v19 }
0x107a   :  { %6242 = vmatmul.mubr.msk.bf16.vlgmr.msra.gmra.mrb[52].mxu0 %vm314_vm2, %v7369_v49 }
0x107b   :  { %6253 = vmatprep.mubr.msk.bf16.mxu0 %vm6901_vm1, %v6900_v19 }
0x114b   :  { %v1573_v50 = vpop.f32.mrb[40].mxu1 }
0x114c   :  { %v1625_v52 = vmul.f32 0.35355338, %v1573_v50  ;;  %v6237_v53 = vpop.f32.mrb[41].mxu1 }
0x114d   :  { %v1576_v55 = vpop.f32.mrb[42].mxu1  ;;  %v1619_v56 = vpop.f32.mrb[52].mxu0 }
0x114e   :  { %v1626_v59 = vmul.f32 0.35355338, %v1619_v56  ;;  %v6238_v60 = vpop.f32.mrb[43].mxu1  ;;  %v6243_v61 = vpop.f32.mrb[53].mxu0  ;;  %v1627_v62 = vadd.f32 %v1625_v52, %v7382_v51 }
0x114f   :  { %v1622_v2 = vpop.f32.mrb[54].mxu0 }
0x1150   :  { %v6244_v3 = vpop.f32.mrb[55].mxu0  ;;  %v1630_v4 = vsel %vm1629_vm4, %v1627_v62, -inf  ;;  %v1628_v5 = vadd.f32 %v1626_v59, %v7387_v58 }
0x1151   :  { %1631 = vmax.xlane.f32.xlu0 %v1630_v4 }
0x1152   :  { %v1633_v7 = vsel %vm1629_vm4, %v1628_v5, -inf }
0x1153   :  { %1634 = vmax.xlane.f32.xlu1 %v1633_v7 }
0x1164   :  { %1702 = vrot.lane.b32.xlu1 %v7100_v47, %s6902_s28 }
0x1168   :  { %1751 = vrot.lane.b32.xlu1 %v7102_v48, %s8264_s4 }
0x11de   :  { %v1632_v8 = vpop.xlane.xlu0 %1631 }
0x11df   :  { %v1636_v10 = vsub.f32 %v1627_v62, %v1632_v8 }
0x11e0   :  { %v1635_v63 = vpop.xlane.xlu1 %1634 }
0x11e1   :  { %v1638_v12 = vmul.f32 1.442695, %v1636_v10  ;;  %v1637_v13 = vsub.f32 %v1628_v5, %v1635_v63 }
0x11e3   :  { %6764 = vpow2.f32 %v1638_v12  ;;  %v1640_v14 = vmul.f32 1.442695, %v1637_v13 }
0x11e4   :  { %v1703_v0 = vpop.permute.xlu1 %1702 }
0x11e5   :  { %6766 = vpow2.f32 %v1640_v14  ;;  %6252 = vmatpush3.bf16.msra.mxu0 %v1703_v0 }
0x11e6   :  { %6263 = vmatprep.subr.bf16.mxu0 %v6900_v19 }
0x11e8   :  { %v1752_v1 = vpop.permute.xlu1 %1751 }
0x11e9   :  { %v1757_v31 = vsel %vm314_vm2, %v1752_v1, 0 }
0x11ed   :  { %v6765_v16 = vpop.eup %6764 }
0x11ee   :  { %v1642_v17 = vsel %vm1629_vm4, %v6765_v16, 0.0 }
0x11ef   :  { %v6767_v20 = vpop.eup %6766  ;;  %1643 = vadd.xlane.f32.xlu0 %v1642_v17 }
0x11f0   :  { %v1645_v21 = vsel %vm1629_vm4, %v6767_v20, 0.0 }
0x11f1   :  { %1646 = vadd.xlane.f32.xlu1 %v1645_v21 }
0x1202   :  { %1801 = vrot.lane.b32.xlu1 %v7100_v47, %s8264_s4 }
0x1205   :  { %1655 = vrot.lane.b32.xlu0 %v7102_v48, %s6902_s28 }
0x1206   :  { %1799 = vrot.lane.b32.xlu1 %v7369_v49, %s8264_s4 }
0x1209   :  { %1749 = vrot.lane.b32.xlu0 %v7367_v44, %s8264_s4  ;;  %s8294_s4 = smov 104  }
0x127c   :  { %v1644_v22 = vpop.xlane.xlu0 %1643 }
0x127d   :  { %6768 = vrcp.f32 %v1644_v22 }
0x127e   :  { %v1647_v23 = vpop.xlane.xlu1 %1646 }
0x127f   :  { %6770 = vrcp.f32 %v1647_v23 }
0x1280   :  { %v1656_v24 = vpop.permute.xlu0 %1655 }
0x1281   :  { %6246 = vmatpush3.bf16.msra.mxu1 %v1656_v24  ;;  %v1529_v24 = vld [vmem:[%s8229_s14] sm:$0xf] }
0x1282   :  { %6257 = vmatprep.subr.bf16.mxu1 %v6900_v19  ;;  %v1802_v30 = vpop.permute.xlu1 %1801 }
0x1283   :  { %v1807_v15 = vsel %vm314_vm2, %v1802_v30, 0 }
0x1284   :  { %v1750_v33 = vpop.permute.xlu0 %1749 }
0x1286   :  { %v1800_v34 = vpop.permute.xlu1 %1799 }
0x1287   :  { %v6769_v25 = vpop.eup %6768 }
0x1288   :  { %v1650_v26 = vmul.f32 %v6769_v25, %v6765_v16 }
0x1289   :  { %v6771_v27 = vpop.eup %6770 }
0x128a   :  { %v1652_v28 = vpack.c.bf16 %v1650_v26, %v1650_v26  ;;  %v1651_v29 = vmul.f32 %v6771_v27, %v6767_v20  ;;  %v1530_v20 = vld [vmem:[%s8229_s14 + $0x4] sm:$0xf]  ;;  %v2021_v27 = vsel %vm442_vm3, %v1529_v24, 0 }
0x128b   :  { %v1974_v22 = vsel %vm442_vm3, %v1530_v20, 0 }
0x128c   :  { %6248 = vmatmul.mubr.msk.bf16.vlgmr.msra.gmra.mrb[44].mxu1 %vm1629_vm4, %v1652_v28  ;;  %v1653_v32 = vpack.c.bf16 %v1651_v29, %v1651_v29 }
0x128d   :  { %6258 = vmatpush3.bf16.xpose.msra.mxu1 %v1757_v31  ;;  %6259 = vmatprep.mubr.msk.bf16.mxu1 %vm6901_vm1, %v6900_v19 }
0x128e   :  { %6254 = vmatmul.mubr.msk.bf16.vlgmr.msra.gmra.mrb[56].mxu0 %vm1629_vm4, %v1653_v32  ;;  %6269 = vmatprep.subr.bf16.mxu1 %v6900_v19 }
0x128f   :  { %6264 = vmatpush3.bf16.xpose.msra.mxu0 %v1807_v15  ;;  %6265 = vmatprep.mubr.msk.bf16.mxu0 %vm6901_vm1, %v6900_v19 }
0x1290   :  { %6275 = vmatprep.subr.bf16.mxu0 %v6900_v19 }
0x1294   :  { %6260 = vmatmul.mubr.msk.bf16.vlgmr.msra.gmra.mrb[48].mxu1 %vm314_vm2, %v1750_v33 }
0x1295   :  { %6271 = vmatprep.mubr.msk.bf16.mxu1 %vm6901_vm1, %v6900_v19 }
0x1296   :  { %6266 = vmatmul.mubr.msk.bf16.vlgmr.msra.gmra.mrb[60].mxu0 %vm314_vm2, %v1800_v34 }
0x1297   :  { %6277 = vmatprep.mubr.msk.bf16.mxu0 %vm6901_vm1, %v6900_v19 }
0x135f   :  { %v7425_v18 = vpop.f32.mrb[44].mxu1 }
0x1360   :  { %v6249_v35 = vpop.f32.mrb[45].mxu1 }
0x1361   :  { %v1698_v36 = vpop.f32.mrb[46].mxu1  ;;  %v7427_v6 = vpop.f32.mrb[56].mxu0 }
0x1362   :  { %v1748_v37 = vpack.c.bf16 %v7427_v6, %v7425_v18  ;;  %v6250_v57 = vpop.f32.mrb[47].mxu1  ;;  %v6255_v38 = vpop.f32.mrb[57].mxu0 }
0x1363   :  { %v1745_v39 = vpop.f32.mrb[58].mxu0 }
0x1364   :  { %v6256_v40 = vpop.f32.mrb[59].mxu0 }
0x1367   :  { %v1793_v41 = vpop.f32.mrb[48].mxu1 }
0x1368   :  { %v1849_v42 = vmul.f32 0.35355338, %v1793_v41  ;;  %v6261_v43 = vpop.f32.mrb[49].mxu1 }
0x1369   :  { %v1796_v54 = vpop.f32.mrb[50].mxu1  ;;  %v1843_v46 = vpop.f32.mrb[60].mxu0 }
0x136a   :  { %v1850_v45 = vmul.f32 0.35355338, %v1843_v46  ;;  %v6262_v50 = vpop.f32.mrb[51].mxu1  ;;  %v6267_v52 = vpop.f32.mrb[61].mxu0  ;;  %v1851_v53 = vadd.f32 %v1849_v42, %v7382_v51 }
0x136b   :  { %v1846_v55 = vpop.f32.mrb[62].mxu0 }
0x136c   :  { %v6268_v56 = vpop.f32.mrb[63].mxu0  ;;  %v1853_v59 = vsel %vm1629_vm4, %v1851_v53, -inf  ;;  %v1852_v60 = vadd.f32 %v1850_v45, %v7387_v58 }
0x136d   :  { %1854 = vmax.xlane.f32.xlu0 %v1853_v59 }
0x136e   :  { %v1856_v61 = vsel %vm1629_vm4, %v1852_v60, -inf }
0x136f   :  { %1857 = vmax.xlane.f32.xlu1 %v1856_v61 }
0x1380   :  { %1923 = vrot.lane.b32.xlu1 %v7100_v47, %s8266_s25 }
0x1384   :  { %2066 = vrot.lane.b32.xlu1 %v7102_v48, %s8260_s13 }
0x1388   :  { %2116 = vrot.lane.b32.xlu1 %v7100_v47, %s8260_s13 }
0x138c   :  { %2114 = vrot.lane.b32.xlu1 %v7369_v49, %s8260_s13 }
0x13fa   :  { %v1855_v62 = vpop.xlane.xlu0 %1854 }
0x13fb   :  { %v1859_v2 = vsub.f32 %v1851_v53, %v1855_v62 }
0x13fc   :  { %v1858_v3 = vpop.xlane.xlu1 %1857 }
0x13fd   :  { %v1861_v4 = vmul.f32 1.442695, %v1859_v2  ;;  %v1860_v5 = vsub.f32 %v1852_v60, %v1858_v3 }
0x13ff   :  { %6772 = vpow2.f32 %v1861_v4  ;;  %v1863_v7 = vmul.f32 1.442695, %v1860_v5 }
0x1400   :  { %v1924_v8 = vpop.permute.xlu1 %1923 }
0x1401   :  { %6774 = vpow2.f32 %v1863_v7  ;;  %6276 = vmatpush3.bf16.msra.mxu0 %v1924_v8 }
0x1402   :  { %6287 = vmatprep.subr.bf16.mxu0 %v6900_v19 }
0x1404   :  { %v2067_v28 = vpop.permute.xlu1 %2066 }
0x1408   :  { %v2117_v29 = vpop.permute.xlu1 %2116 }
0x1409   :  { %v6773_v10 = vpop.eup %6772  ;;  %v2122_v30 = vsel %vm314_vm2, %v2117_v29, 0 }
0x140a   :  { %v1865_v63 = vsel %vm1629_vm4, %v6773_v10, 0.0 }
0x140b   :  { %v6775_v12 = vpop.eup %6774  ;;  %1866 = vadd.xlane.f32.xlu0 %v1865_v63 }
0x140c   :  { %v1868_v13 = vsel %vm1629_vm4, %v6775_v12, 0.0  ;;  %v2115_v31 = vpop.permute.xlu1 %2114 }
0x140f   :  { %1869 = vadd.xlane.f32.xlu0 %v1868_v13 }
0x1425   :  { %1877 = vrot.lane.b32.xlu0 %v7102_v48, %s8266_s25  ;;  %s8287_s25 = smov 64  }
0x1429   :  { %2064 = vrot.lane.b32.xlu0 %v7367_v44, %s8260_s13  ;;  %s8288_s13 = smov 88  }
0x1498   :  { %v1867_v14 = vpop.xlane.xlu0 %1866 }
0x1499   :  { %6776 = vrcp.f32 %v1867_v14 }
0x149c   :  { %v1870_v0 = vpop.xlane.xlu0 %1869 }
0x149d   :  { %6778 = vrcp.f32 %v1870_v0 }
0x14a0   :  { %v1878_v16 = vpop.permute.xlu0 %1877 }
0x14a1   :  { %6270 = vmatpush3.bf16.msra.mxu1 %v1878_v16 }
0x14a2   :  { %6281 = vmatprep.subr.bf16.mxu1 %v6900_v19 }
0x14a3   :  { %v6777_v17 = vpop.eup %6776 }
0x14a4   :  { %v1873_v21 = vmul.f32 %v6777_v17, %v6773_v10  ;;  %v2065_v40 = vpop.permute.xlu0 %2064 }
0x14a6   :  { %v1875_v1 = vpack.c.bf16 %v1873_v21, %v1873_v21 }
0x14a7   :  { %v6779_v23 = vpop.eup %6778 }
0x14a8   :  { %6272 = vmatmul.mubr.msk.bf16.vlgmr.msra.gmra.mrb[52].mxu1 %vm1629_vm4, %v1875_v1  ;;  %v1874_v25 = vmul.f32 %v6779_v23, %v6775_v12 }
0x14a9   :  { %6282 = vmatpush3.bf16.msra.mxu1 %v1974_v22  ;;  %6283 = vmatprep.mubr.msk.bf16.mxu1 %vm6901_vm1, %v6900_v19 }
0x14aa   :  { %v1876_v26 = vpack.c.bf16 %v1874_v25, %v1874_v25  ;;  %6293 = vmatprep.subr.bf16.mxu1 %v6900_v19 }
0x14ac   :  { %6278 = vmatmul.mubr.msk.bf16.vlgmr.msra.gmra.mrb[64].mxu0 %vm1629_vm4, %v1876_v26 }
0x14ad   :  { %6288 = vmatpush3.bf16.msra.mxu0 %v2021_v27  ;;  %6289 = vmatprep.mubr.msk.bf16.mxu0 %vm6901_vm1, %v6900_v19 }
0x14ae   :  { %6299 = vmatprep.subr.bf16.mxu0 %v6900_v19 }
0x14b4   :  { %6290 = vmatmul.mubr.msk.bf16.vlgmr.msra.gmra.mrb[68].mxu0 %vm314_vm2, %v1748_v37  ;;  %v2072_v37 = vsel %vm314_vm2, %v2067_v28, 0 }
0x14b5   :  { %6301 = vmatprep.mubr.msk.bf16.mxu0 %vm6901_vm1, %v6900_v19 }
0x14b6   :  { %6300 = vmatpush3.bf16.xpose.msra.mxu0 %v2122_v30 }
0x14b7   :  { %6311 = vmatprep.subr.bf16.mxu0 %v6900_v19 }
0x14bd   :  { %6302 = vmatmul.mubr.msk.bf16.vlgmr.msra.gmra.mrb[72].mxu0 %vm314_vm2, %v2115_v31 }
0x14be   :  { %6313 = vmatprep.mubr.msk.bf16.mxu0 %vm6901_vm1, %v6900_v19 }
0x157b   :  { %v1917_v32 = vpop.f32.mrb[52].mxu1 }
0x157c   :  { %v6273_v15 = vpop.f32.mrb[53].mxu1 }
0x157d   :  { %v1920_v33 = vpop.f32.mrb[54].mxu1 }
0x157e   :  { %v6274_v34 = vpop.f32.mrb[55].mxu1 }
0x157f   :  { %v1963_v18 = vpop.f32.mrb[64].mxu0 }
0x1580   :  { %v1969_v35 = vpack.c.bf16 %v1963_v18, %v1917_v32  ;;  %v6279_v36 = vpop.f32.mrb[65].mxu0 }
0x1581   :  { %v1966_v6 = vpop.f32.mrb[66].mxu0 }
0x1582   :  { %v6280_v57 = vpop.f32.mrb[67].mxu0  ;;  %6284 = vmatmul.mubr.msk.bf16.vlgmr.msra.gmra.mrb[56].mxu1 %vm314_vm2, %v1969_v35  ;;  %v1531_v35 = vld [vmem:[%s8229_s14 + $0x8] sm:$0xf] }
0x1583   :  { %6294 = vmatpush3.bf16.xpose.msra.mxu1 %v2072_v37  ;;  %6295 = vmatprep.mubr.msk.bf16.mxu1 %vm6901_vm1, %v6900_v19  ;;  %v2289_v36 = vsel %vm442_vm3, %v1531_v35, 0 }
0x1584   :  { %6305 = vmatprep.subr.bf16.mxu1 %v6900_v19 }
0x1587   :  { %v2057_v38 = vpop.f32.mrb[68].mxu0 }
0x1588   :  { %v6291_v39 = vpop.f32.mrb[69].mxu0 }
0x1589   :  { %v2060_v41 = vpop.f32.mrb[70].mxu0 }
0x158a   :  { %v6292_v42 = vpop.f32.mrb[71].mxu0  ;;  %6296 = vmatmul.mubr.msk.bf16.vlgmr.msra.gmra.mrb[60].mxu1 %vm314_vm2, %v2065_v40 }
0x158b   :  { %6307 = vmatprep.mubr.msk.bf16.mxu1 %vm6901_vm1, %v6900_v19 }
0x1590   :  { %v2158_v43 = vpop.f32.mrb[72].mxu0 }
0x1591   :  { %v2165_v54 = vmul.f32 0.35355338, %v2158_v43  ;;  %v6303_v46 = vpop.f32.mrb[73].mxu0 }
0x1592   :  { %v2161_v45 = vpop.f32.mrb[74].mxu0 }
0x1593   :  { %v6304_v50 = vpop.f32.mrb[75].mxu0  ;;  %v2167_v52 = vadd.f32 %v2165_v54, %v7387_v58 }
0x1595   :  { %v2171_v53 = vsel %vm1629_vm4, %v2167_v52, -inf }
0x1596   :  { %2172 = vmax.xlane.f32.xlu1 %v2171_v53 }
0x15a7   :  { %2238 = vrot.lane.b32.xlu1 %v7100_v47, %s8262_s5 }
0x15ab   :  { %2336 = vrot.lane.b32.xlu1 %v7102_v48, %s8258_s7 }
0x15af   :  { %2386 = vrot.lane.b32.xlu1 %v7100_v47, %s8258_s7 }
0x15b3   :  { %2384 = vrot.lane.b32.xlu1 %v7369_v49, %s8258_s7 }
0x1623   :  { %v2173_v55 = vpop.xlane.xlu1 %2172 }
0x1624   :  { %v2175_v59 = vsub.f32 %v2167_v52, %v2173_v55 }
0x1626   :  { %v2178_v60 = vmul.f32 1.442695, %v2175_v59 }
0x1627   :  { %v2239_v56 = vpop.permute.xlu1 %2238 }
0x1628   :  { %6312 = vmatpush3.bf16.msra.mxu0 %v2239_v56  ;;  %6780 = vpow2.f32 %v2178_v60 }
0x1629   :  { %6323 = vmatprep.subr.bf16.mxu0 %v6900_v19 }
0x162b   :  { %v2337_v25 = vpop.permute.xlu1 %2336 }
0x162c   :  { %v2342_v27 = vsel %vm314_vm2, %v2337_v25, 0 }
0x162f   :  { %v2387_v42 = vpop.permute.xlu1 %2386 }
0x1630   :  { %v2392_v50 = vsel %vm314_vm2, %v2387_v42, 0 }
0x1632   :  { %v6781_v14 = vpop.eup %6780 }
0x1633   :  { %v2183_v0 = vsel %vm1629_vm4, %v6781_v14, 0.0 }
0x1655   :  { %v2010_v61 = vpop.f32.mrb[56].mxu1 }
0x1656   :  { %v7497_v62 = vadd.f32 %v2057_v38, %v2010_v61  ;;  %v6285_v2 = vpop.f32.mrb[57].mxu1 }
0x1657   :  { %v2013_v3 = vpop.f32.mrb[58].mxu1 }
0x1658   :  { %v7499_v4 = vadd.f32 %v2060_v41, %v2013_v3  ;;  %v6286_v5 = vpop.f32.mrb[59].mxu1 }
0x165d   :  { %v2108_v7 = vpop.f32.mrb[60].mxu1 }
0x165e   :  { %v2164_v8 = vmul.f32 0.35355338, %v2108_v7  ;;  %v6297_v10 = vpop.f32.mrb[61].mxu1 }
0x165f   :  { %v2111_v49 = vpop.f32.mrb[62].mxu1 }
0x1660   :  { %v6298_v63 = vpop.f32.mrb[63].mxu1  ;;  %v2166_v12 = vadd.f32 %v2164_v8, %v7382_v51 }
0x1662   :  { %v2168_v13 = vsel %vm1629_vm4, %v2166_v12, -inf }
0x1663   :  { %2169 = vmax.xlane.f32.xlu0 %v2168_v13 }
0x1667   :  { %2184 = vadd.xlane.f32.xlu0 %v2183_v0 }
0x16f0   :  { %v2170_v16 = vpop.xlane.xlu0 %2169 }
0x16f1   :  { %v2174_v17 = vsub.f32 %v2166_v12, %v2170_v16 }
0x16f3   :  { %v2176_v20 = vmul.f32 1.442695, %v2174_v17 }
0x16f4   :  { %v2185_v21 = vpop.xlane.xlu0 %2184 }
0x16f5   :  { %6782 = vpow2.f32 %v2176_v20 }
0x16f6   :  { %6784 = vrcp.f32 %v2185_v21 }
0x16ff   :  { %v6783_v1 = vpop.eup %6782 }
0x1700   :  { %v6785_v22 = vpop.eup %6784  ;;  %v2180_v23 = vsel %vm1629_vm4, %v6783_v1, 0.0 }
0x1701   :  { %2181 = vadd.xlane.f32.xlu0 %v2180_v23  ;;  %v2189_v24 = vmul.f32 %v6785_v22, %v6781_v14 }
0x1703   :  { %v2191_v26 = vpack.c.bf16 %v2189_v24, %v2189_v24 }
0x1705   :  { %6314 = vmatmul.mubr.msk.bf16.vlgmr.msra.gmra.mrb[76].mxu0 %vm1629_vm4, %v2191_v26 }
0x1706   :  { %6324 = vmatpush3.bf16.xpose.msra.mxu0 %v2342_v27  ;;  %6325 = vmatprep.mubr.msk.bf16.mxu0 %vm6901_vm1, %v6900_v19 }
0x1707   :  { %6335 = vmatprep.subr.bf16.mxu0 %v6900_v19 }
0x1717   :  { %2192 = vrot.lane.b32.xlu0 %v7102_v48, %s8262_s5  ;;  %s8292_s5 = smov 112  }
0x171b   :  { %2334 = vrot.lane.b32.xlu0 %v7367_v44, %s8258_s7 }
0x178e   :  { %v2182_v28 = vpop.xlane.xlu0 %2181 }
0x178f   :  { %6786 = vrcp.f32 %v2182_v28 }
0x1792   :  { %v2193_v29 = vpop.permute.xlu0 %2192 }
0x1793   :  { %6306 = vmatpush3.bf16.msra.mxu1 %v2193_v29  ;;  %v1532_v29 = vld [vmem:[%s8229_s14 + $0xc] sm:$0xf] }
0x1794   :  { %6317 = vmatprep.subr.bf16.mxu1 %v6900_v19 }
0x1796   :  { %v2335_v30 = vpop.permute.xlu0 %2334 }
0x1797   :  { %6326 = vmatmul.mubr.msk.bf16.vlgmr.msra.gmra.mrb[80].mxu0 %vm314_vm2, %v2335_v30  ;;  %v2559_v30 = vsel %vm442_vm3, %v1532_v29, 0  ;;  %v5744_v29 = vld [vmem:[%s8233_s17] ss:$0 sm:$0xff] }
0x1798   :  { %6337 = vmatprep.mubr.msk.bf16.mxu0 %vm6901_vm1, %v6900_v19 }
0x1799   :  { %v6787_v31 = vpop.eup %6786 }
0x179a   :  { %v2188_v32 = vmul.f32 %v6787_v31, %v6783_v1 }
0x179c   :  { %v2190_v15 = vpack.c.bf16 %v2188_v32, %v2188_v32 }
0x179e   :  { %6308 = vmatmul.mubr.msk.bf16.vlgmr.msra.gmra.mrb[64].mxu1 %vm1629_vm4, %v2190_v15 }
0x179f   :  { %6319 = vmatprep.mubr.msk.bf16.mxu1 %vm6901_vm1, %v6900_v19  ;;  %6318 = vmatpush3.bf16.msra.mxu1 %v2289_v36 }
0x17a0   :  { %6329 = vmatprep.subr.bf16.mxu1 %v6900_v19 }
0x17d8   :  { %v2278_v44 = vpop.f32.mrb[76].mxu0 }
0x17d9   :  { %v6315_v33 = vpop.f32.mrb[77].mxu0 }
0x17da   :  { %v2281_v34 = vpop.f32.mrb[78].mxu0 }
0x17db   :  { %v6316_v18 = vpop.f32.mrb[79].mxu0 }
0x186a   :  { %v2378_v6 = vpop.f32.mrb[80].mxu0 }
0x186b   :  { %v2434_v37 = vmul.f32 0.35355338, %v2378_v6  ;;  %v6327_v57 = vpop.f32.mrb[81].mxu0 }
0x186c   :  { %v2381_v38 = vpop.f32.mrb[82].mxu0 }
0x186d   :  { %v6328_v39 = vpop.f32.mrb[83].mxu0  ;;  %v2436_v40 = vadd.f32 %v2434_v37, %v7382_v51  ;;  %v2385_v51 = vpop.permute.xlu1 %2384  ;;  %v5741_v38 = vld [vmem:[%s8230_s15] ss:$0 sm:$0xff] }
0x186f   :  { %v2438_v41 = vsel %vm1629_vm4, %v2436_v40, -inf }
0x1870   :  { %2439 = vmax.xlane.f32.xlu0 %v2438_v41 }
0x1871   :  { %v2232_v43 = vpop.f32.mrb[64].mxu1 }
0x1872   :  { %v2284_v54 = vpack.c.bf16 %v2278_v44, %v2232_v43  ;;  %v6309_v46 = vpop.f32.mrb[65].mxu1 }
0x1873   :  { %v2235_v45 = vpop.f32.mrb[66].mxu1 }
0x1874   :  { %v6310_v52 = vpop.f32.mrb[67].mxu1  ;;  %6320 = vmatmul.mubr.msk.bf16.vlgmr.msra.gmra.mrb[68].mxu1 %vm314_vm2, %v2284_v54 }
0x1875   :  { %6330 = vmatpush3.bf16.xpose.msra.mxu1 %v2392_v50  ;;  %6331 = vmatprep.mubr.msk.bf16.mxu1 %vm6901_vm1, %v6900_v19 }
0x1876   :  { %6341 = vmatprep.subr.bf16.mxu1 %v6900_v19 }
0x187c   :  { %6332 = vmatmul.mubr.msk.bf16.vlgmr.msra.gmra.mrb[72].mxu1 %vm314_vm2, %v2385_v51 }
0x187d   :  { %6343 = vmatprep.mubr.msk.bf16.mxu1 %vm6901_vm1, %v6900_v19 }
0x18fd   :  { %v2440_v53 = vpop.xlane.xlu0 %2439 }
0x18fe   :  { %v2444_v55 = vsub.f32 %v2436_v40, %v2440_v53 }
0x1900   :  { %v2446_v56 = vmul.f32 1.442695, %v2444_v55 }
0x1902   :  { %6788 = vpow2.f32 %v2446_v56 }
0x190c   :  { %v6789_v59 = vpop.eup %6788 }
0x190d   :  { %v2450_v60 = vsel %vm1629_vm4, %v6789_v59, 0.0 }
0x190e   :  { %2451 = vadd.xlane.f32.xlu0 %v2450_v60 }
0x1947   :  { %v2325_v61 = vpop.f32.mrb[68].mxu1 }
0x1948   :  { %v2332_v2 = vadd.f32 %v2325_v61, %v7497_v62  ;;  %v6321_v3 = vpop.f32.mrb[69].mxu1 }
0x1949   :  { %v2328_v5 = vpop.f32.mrb[70].mxu1  ;;  %v6699_v3 = vld [vmem:[%s8231_s16 + $0x8] sm:$0xff]  }
0x194a   :  { %v2333_v7 = vadd.f32 %v2328_v5, %v7499_v4  ;;  %v6322_v8 = vpop.f32.mrb[71].mxu1 }
0x194f   :  { %v2428_v10 = vpop.f32.mrb[72].mxu1 }
0x1950   :  { %v2435_v49 = vmul.f32 0.35355338, %v2428_v10  ;;  %v6333_v63 = vpop.f32.mrb[73].mxu1 }
0x1951   :  { %v2431_v12 = vpop.f32.mrb[74].mxu1 }
0x1952   :  { %v6334_v13 = vpop.f32.mrb[75].mxu1  ;;  %v2437_v14 = vadd.f32 %v2435_v49, %v7387_v58 }
0x1953   :  { %v5742_v13 = vld [vmem:[%s8281_s0 + $0x2] ss:$0 sm:$0xff] }
0x1954   :  { %v2441_v0 = vsel %vm1629_vm4, %v2437_v14, -inf }
0x1955   :  { %2442 = vmax.xlane.f32.xlu1 %v2441_v0 }
0x1966   :  { %2508 = vrot.lane.b32.xlu1 %v7100_v47, %s8286_s12 }
0x199b   :  { %v2452_v58 = vpop.xlane.xlu0 %2451 }
0x19e2   :  { %v2443_v16 = vpop.xlane.xlu1 %2442 }
0x19e3   :  { %v2445_v62 = vsub.f32 %v2437_v14, %v2443_v16 }
0x19e5   :  { %v2448_v17 = vmul.f32 1.442695, %v2445_v62 }
0x19e6   :  { %v2509_v20 = vpop.permute.xlu1 %2508 }
0x19e7   :  { %6790 = vpow2.f32 %v2448_v17  ;;  %6342 = vmatpush3.bf16.msra.mxu1 %v2509_v20  ;;  %v5743_v17 = vld [vmem:[%s8282_s3 + $0x2] ss:$0 sm:$0xff] }
0x19e8   :  { %6353 = vmatprep.subr.bf16.mxu1 %v6900_v19  ;;  %6792 = vrcp.f32 %v2452_v58 }
0x19f1   :  { %v6791_v4 = vpop.eup %6790 }
0x19f2   :  { %v2453_v21 = vsel %vm1629_vm4, %v6791_v4, 0.0  ;;  %v6793_v1 = vpop.eup %6792 }
0x19f3   :  { %2454 = vadd.xlane.f32.xlu0 %v2453_v21  ;;  %v2458_v23 = vmul.f32 %v6793_v1, %v6789_v59  ;;  %v6700_v1 = vld [vmem:[%s8232_s18] sm:$0xff]  }
0x19f5   :  { %v2460_v25 = vpack.c.bf16 %v2458_v23, %v2458_v23  ;;  %v6702_v23 = vld [vmem:[%s8232_s18 + $0x10] sm:$0xff]  }
0x1a09   :  { %2462 = vrot.lane.b32.xlu0 %v7102_v48, %s8286_s12 }
0x1a80   :  { %v2455_v22 = vpop.xlane.xlu0 %2454 }
0x1a81   :  { %6794 = vrcp.f32 %v2455_v22  ;;  %v6701_v22 = vld [vmem:[%s8232_s18 + $0x8] sm:$0xff]  }
0x1a84   :  { %v2463_v24 = vpop.permute.xlu0 %2462 }
0x1a85   :  { %6336 = vmatpush3.bf16.msra.mxu0 %v2463_v24  ;;  %v6703_v24 = vld [vmem:[%s8232_s18 + $0x18] sm:$0xff]  }
0x1a86   :  { %6347 = vmatprep.subr.bf16.mxu0 %v6900_v19 }
0x1a88   :  { %6338 = vmatmul.mubr.msk.bf16.vlgmr.msra.gmra.mrb[84].mxu0 %vm1629_vm4, %v2460_v25  ;;  %v6704_v25 = vld [vmem:[%s8232_s18 + $0x20] sm:$0xff]  }
0x1a89   :  { %6349 = vmatprep.mubr.msk.bf16.mxu0 %vm6901_vm1, %v6900_v19  ;;  %6348 = vmatpush3.bf16.msra.mxu0 %v2559_v30 }
0x1a8a   :  { %6361 = vmatprep.subr.bf16.mxu0 %v6900_v19 }
0x1a8b   :  { %v6795_v26 = vpop.eup %6794 }
0x1a8c   :  { %v2459_v27 = vmul.f32 %v6795_v26, %v6791_v4  ;;  %v6705_v26 = vld [vmem:[%s8232_s18 + $0x28] sm:$0xff]  }
0x1a8e   :  { %v2461_v28 = vpack.c.bf16 %v2459_v27, %v2459_v27  ;;  %v6706_v27 = vld [vmem:[%s8232_s18 + $0x30] sm:$0xff]  }
0x1a90   :  { %6344 = vmatmul.mubr.msk.bf16.vlgmr.msra.gmra.mrb[76].mxu1 %vm1629_vm4, %v2461_v28  ;;  %v6707_v28 = vld [vmem:[%s8232_s18 + $0x38] sm:$0xff]  }
0x1a91   :  { %6357 = vmatprep.mubr.msk.bf16.mxu1 %vm6901_vm1, %v6900_v19 }
0x1b5b   :  { %v2502_v31 = vpop.f32.mrb[84].mxu0 }
0x1b5c   :  { %v6339_v32 = vpop.f32.mrb[85].mxu0 }
0x1b5d   :  { %v2505_v15 = vpop.f32.mrb[86].mxu0 }
0x1b5e   :  { %v6340_v44 = vpop.f32.mrb[87].mxu0 }
0x1b63   :  { %v2548_v33 = vpop.f32.mrb[76].mxu1 }
0x1b64   :  { %v2554_v34 = vpack.c.bf16 %v2548_v33, %v2502_v31  ;;  %v6345_v18 = vpop.f32.mrb[77].mxu1 }
0x1b65   :  { %v2551_v35 = vpop.f32.mrb[78].mxu1 }
0x1b66   :  { %v6346_v36 = vpop.f32.mrb[79].mxu1  ;;  %6350 = vmatmul.mubr.msk.bf16.vlgmr.msra.gmra.mrb[88].mxu0 %vm314_vm2, %v2554_v34 }
0x1b67   :  { %6377 = vmatprep.mubr.msk.bf16.mxu0 %vm6901_vm1, %v6900_v19  ;;  %6362 = vmatpush3.bf16.msra.mxu0 %v6700_v1 }
0x1b68   :  { %6363 = vmatprep.subr.bf16.mxu0 %v6900_v19 }
0x1b6b   :  { %6364 = vmatpush3.bf16.msra.mxu0 %v6701_v22 }
0x1b6c   :  { %6365 = vmatprep.subr.bf16.mxu0 %v6900_v19 }
0x1b6f   :  { %6366 = vmatpush3.bf16.msra.mxu0 %v6702_v23 }
0x1b70   :  { %6367 = vmatprep.subr.bf16.mxu0 %v6900_v19 }
0x1b73   :  { %6368 = vmatpush3.bf16.msra.mxu0 %v6703_v24  ;;  %v5757_v24 = vld [vmem:[%s8281_s0 + $0x3] ss:$0 sm:$0xff] }
0x1b74   :  { %6369 = vmatprep.subr.bf16.mxu0 %v6900_v19 }
0x1b77   :  { %6370 = vmatpush3.bf16.msra.mxu0 %v6704_v25 }
0x1b78   :  { %6371 = vmatprep.subr.bf16.mxu0 %v6900_v19 }
0x1b7b   :  { %6372 = vmatpush3.bf16.msra.mxu0 %v6705_v26 }
0x1b7c   :  { %6373 = vmatprep.subr.bf16.mxu0 %v6900_v19 }
0x1b7f   :  { %6374 = vmatpush3.bf16.msra.mxu0 %v6706_v27 }
0x1b80   :  { %6375 = vmatprep.subr.bf16.mxu0 %v6900_v19 }
0x1b83   :  { %6376 = vmatpush3.bf16.msra.mxu0 %v6707_v28 }
0x1b84   :  { %6407 = vmatprep.subr.bf16.mxu0 %v6900_v19 }
0x1c39   :  { %v2595_v6 = vpop.f32.mrb[88].mxu0 }
0x1c3a   :  { %v2602_v37 = vadd.f32 %v2595_v6, %v2332_v2  ;;  %v6351_v57 = vpop.f32.mrb[89].mxu0  ;;  %v6698_v2 = vld [vmem:[%s8231_s16] sm:$0xff]  }
0x1c3b   :  { %v2598_v39 = vpop.f32.mrb[90].mxu0  ;;  %6354 = vmatpush3.bf16.msra.mxu1 %v6698_v2 }
0x1c3c   :  { %v2604_v40 = vadd.f32 %v2602_v37, %v7331_v9  ;;  %v2603_v41 = vadd.f32 %v2598_v39, %v2333_v7  ;;  %v6352_v42 = vpop.f32.mrb[91].mxu0  ;;  %6355 = vmatprep.subr.bf16.mxu1 %v6900_v19 }
0x1c3e   :  { %v7566_v43 = vadd.f32 %v5741_v38, %v2604_v40  ;;  %v2605_v54 = vadd.f32 %v2603_v41, %v7334_v11 }
0x1c3f   :  { %6356 = vmatpush3.bf16.msra.mxu1 %v6699_v3 }
0x1c40   :  { %v7569_v46 = vadd.f32 %v5741_v38, %v2605_v54  ;;  %v2615_v45 = vsel %vm133_vm0, %v7566_v43, 0.0  ;;  %6381 = vmatprep.subr.bf16.mxu1 %v6900_v19 }
0x1c41   :  { %2616 = vadd.xlane.f32.xlu1 %v2615_v45 }
0x1c42   :  { %v2618_v50 = vsel %vm133_vm0, %v7569_v46, 0.0 }
0x1c43   :  { %2619 = vadd.xlane.f32.xlu0 %v2618_v50 }
0x1cce   :  { %v2617_v52 = vpop.xlane.xlu1 %2616 }
0x1ccf   :  { %v2621_v51 = vmul.f32 0.03125, %v2617_v52 }
0x1cd0   :  { %v2620_v53 = vpop.xlane.xlu0 %2619 }
0x1cd1   :  { %v2623_v9 = vsub.f32 %v7566_v43, %v2621_v51  ;;  %v2622_v55 = vmul.f32 0.03125, %v2620_v53 }
0x1cd3   :  { %v2624_v56 = vsub.f32 %v7569_v46, %v2622_v55  ;;  %v2625_v59 = vmul.f32 %v2623_v9, %v2623_v9 }
0x1cd5   :  { %v2627_v11 = vsel %vm133_vm0, %v2625_v59, 0.0  ;;  %v2626_v60 = vmul.f32 %v2624_v56, %v2624_v56 }
0x1cd6   :  { %2628 = vadd.xlane.f32.xlu0 %v2627_v11 }
0x1cd7   :  { %v2630_v61 = vsel %vm133_vm0, %v2626_v60, 0.0 }
0x1cd8   :  { %2631 = vadd.xlane.f32.xlu1 %v2630_v61 }
0x1d63   :  { %v2629_v5 = vpop.xlane.xlu0 %2628 }
0x1d64   :  { %v2633_v7 = vmul.f32 0.03125, %v2629_v5 }
0x1d65   :  { %v2632_v8 = vpop.xlane.xlu1 %2631 }
0x1d66   :  { %v2635_v10 = vadd.f32 1e-06, %v2633_v7  ;;  %v2634_v49 = vmul.f32 0.03125, %v2632_v8 }
0x1d68   :  { %6796 = vrsqrt.f32 %v2635_v10  ;;  %v2636_v63 = vadd.f32 1e-06, %v2634_v49 }
0x1d6a   :  { %6798 = vrsqrt.f32 %v2636_v63 }
0x1d72   :  { %v6797_v12 = vpop.eup %6796 }
0x1d73   :  { %v2639_v14 = vmul.f32 %v6797_v12, %v2623_v9 }
0x1d74   :  { %v6799_v0 = vpop.eup %6798 }
0x1d75   :  { %v2647_v16 = vmul.f32 %v5742_v13, %v2639_v14  ;;  %v2640_v62 = vmul.f32 %v6799_v0, %v2624_v56  ;;  %v5756_v56 = vld [vmem:[%s8234_s19] ss:$0 sm:$0xff] }
0x1d77   :  { %v2648_v20 = vmul.f32 %v5742_v13, %v2640_v62  ;;  %v2655_v4 = vadd.f32 %v5743_v17, %v2647_v16  ;;  %v6708_v62 = vld [vmem:[%s8280_s27 + $0x10] sm:$0xff]  }
0x1d79   :  { %v2656_v21 = vadd.f32 %v5743_v17, %v2648_v20  ;;  %v6709_v17 = vld [vmem:[%s8280_s27 + $0x18] sm:$0xff]   ;;  %s8291_s27 = smov 80  }
0x1d7b   :  { %v2657_v58 = vpack.c.bf16 %v2656_v21, %v2655_v4 }
0x1d7d   :  { %6358 = vmatmul.mubr.msk.bf16.vlgmr.msra.gmra.mrb[80].mxu1 %vm133_vm0, %v2657_v58 }
0x1d7e   :  { %6385 = vmatprep.mubr.msk.bf16.mxu1 %vm6901_vm1, %v6900_v19  ;;  %6382 = vmatpush3.bf16.msra.mxu1 %v6708_v62 }
0x1d7f   :  { %6383 = vmatprep.subr.bf16.mxu1 %v6900_v19 }
0x1d82   :  { %6384 = vmatpush3.bf16.msra.mxu1 %v6709_v17 }
0x1d83   :  { %6389 = vmatprep.subr.bf16.mxu1 %v6900_v19 }
0x1e50   :  { %v2718_v30 = vpop.f32.mrb[80].mxu1 }
0x1e51   :  { %v2719_v31 = vadd.f32 %v5744_v29, %v2718_v30  ;;  %v6359_v32 = vpop.f32.mrb[81].mxu1 }
0x1e52   :  { %v2721_v15 = vpop.f32.mrb[82].mxu1 }
0x1e53   :  { %v2727_v44 = vmul.f32 0.044715, %v2719_v31  ;;  %v2722_v33 = vadd.f32 %v5744_v29, %v2721_v15  ;;  %v6360_v34 = vpop.f32.mrb[83].mxu1  ;;  %v2725_v45 = vmul.f32 0.5, %v2719_v31  ;;  %v5758_v29 = vld [vmem:[%s8282_s3 + $0x3] ss:$0 sm:$0xff] }
0x1e55   :  { %v2729_v18 = vmul.f32 %v2727_v44, %v2719_v31  ;;  %v2728_v35 = vmul.f32 0.044715, %v2722_v33  ;;  %v2726_v50 = vmul.f32 0.5, %v2722_v33  ;;  %v5764_v44 = vld [vmem:[%s8284_s26 + $0x1] ss:$0 sm:$0xff] }
0x1e57   :  { %v2731_v36 = vmul.f32 %v2729_v18, %v2719_v31  ;;  %v2730_v6 = vmul.f32 %v2728_v35, %v2722_v33 }
0x1e59   :  { %v2733_v37 = vadd.f32 %v2731_v36, %v2719_v31  ;;  %v2732_v57 = vmul.f32 %v2730_v6, %v2722_v33 }
0x1e5b   :  { %v2735_v38 = vmul.f32 0.7978846, %v2733_v37  ;;  %v2734_v39 = vadd.f32 %v2732_v57, %v2722_v33 }
0x1e5d   :  { %6800 = vtanh.f32 %v2735_v38  ;;  %v2736_v40 = vmul.f32 0.7978846, %v2734_v39 }
0x1e5f   :  { %6802 = vtanh.f32 %v2736_v40 }
0x1e67   :  { %v6801_v41 = vpop.eup %6800 }
0x1e68   :  { %v2739_v42 = vadd.f32 1.0, %v6801_v41 }
0x1e69   :  { %v6803_v54 = vpop.eup %6802 }
0x1e6a   :  { %v2740_v52 = vadd.f32 1.0, %v6803_v54  ;;  %v2741_v51 = vmul.f32 %v2739_v42, %v2725_v45 }
0x1e6c   :  { %v2742_v53 = vmul.f32 %v2740_v52, %v2726_v50 }
0x1e6e   :  { %v2743_v9 = vpack.c.bf16 %v2742_v53, %v2741_v51  ;;  %v7693_v51 = vld [vmem:[%s8285_s29] sm:$0xff] }
0x1e70   :  { %6378 = vmatmul.mubr.bf16.vlgmr.msra.gmra.mrb[92].mxu0 %v2743_v9 }
0x1e71   :  { %6409 = vmatprep.mubr.msk.bf16.mxu0 %vm6901_vm1, %v6900_v19 }
0x1f43   :  { %v2842_v55 = vpop.f32.mrb[92].mxu0 }
0x1f44   :  { %v2849_v59 = vadd.f32 %v2842_v55, %v7566_v43  ;;  %v6379_v11 = vpop.f32.mrb[93].mxu0 }
0x1f45   :  { %v2845_v60 = vpop.f32.mrb[94].mxu0 }
0x1f46   :  { %v7637_v61 = vadd.f32 %v5756_v56, %v2849_v59  ;;  %v2850_v2 = vadd.f32 %v2845_v60, %v7569_v46  ;;  %v6380_v3 = vpop.f32.mrb[95].mxu0 }
0x1f48   :  { %v7640_v5 = vadd.f32 %v5756_v56, %v2850_v2  ;;  %v2860_v7 = vsel %vm133_vm0, %v7637_v61, 0.0  ;;  %v7700_v2 = vld [vmem:[%s8285_s29 + $0x8] sm:$0xff]  ;;  %s8289_s29 = smov 120  }
0x1f49   :  { %2861 = vadd.xlane.f32.xlu0 %v2860_v7 }
0x1f4a   :  { %v2863_v8 = vsel %vm133_vm0, %v7640_v5, 0.0 }
0x1f4b   :  { %2864 = vadd.xlane.f32.xlu1 %v2863_v8 }
0x1fd6   :  { %v2862_v10 = vpop.xlane.xlu0 %2861 }
0x1fd7   :  { %v2866_v49 = vmul.f32 0.03125, %v2862_v10 }
0x1fd8   :  { %v2865_v43 = vpop.xlane.xlu1 %2864 }
0x1fd9   :  { %v2868_v63 = vsub.f32 %v7637_v61, %v2866_v49  ;;  %v2867_v12 = vmul.f32 0.03125, %v2865_v43 }
0x1fdb   :  { %v2869_v13 = vsub.f32 %v7640_v5, %v2867_v12  ;;  %v2870_v46 = vmul.f32 %v2868_v63, %v2868_v63 }
0x1fdd   :  { %v2872_v14 = vsel %vm133_vm0, %v2870_v46, 0.0  ;;  %v2871_v0 = vmul.f32 %v2869_v13, %v2869_v13 }
0x1fde   :  { %2873 = vadd.xlane.f32.xlu0 %v2872_v14 }
0x1fdf   :  { %v2875_v16 = vsel %vm133_vm0, %v2871_v0, 0.0 }
0x1fe0   :  { %2876 = vadd.xlane.f32.xlu1 %v2875_v16 }
0x206b   :  { %v2874_v20 = vpop.xlane.xlu0 %2873 }
0x206c   :  { %v2878_v4 = vmul.f32 0.03125, %v2874_v20 }
0x206d   :  { %v2877_v21 = vpop.xlane.xlu1 %2876 }
0x206e   :  { %v2880_v58 = vadd.f32 1e-06, %v2878_v4  ;;  %v2879_v1 = vmul.f32 0.03125, %v2877_v21 }
0x2070   :  { %6804 = vrsqrt.f32 %v2880_v58  ;;  %v2881_v22 = vadd.f32 1e-06, %v2879_v1 }
0x2072   :  { %6806 = vrsqrt.f32 %v2881_v22 }
0x207a   :  { %v6805_v23 = vpop.eup %6804 }
0x207b   :  { %v2884_v25 = vmul.f32 %v6805_v23, %v2868_v63 }
0x207c   :  { %v6807_v26 = vpop.eup %6806 }
0x207d   :  { %v2892_v27 = vmul.f32 %v5757_v24, %v2884_v25  ;;  %v2885_v28 = vmul.f32 %v6807_v26, %v2869_v13 }
0x207f   :  { %v2893_v30 = vmul.f32 %v5757_v24, %v2885_v28  ;;  %v2900_v31 = vadd.f32 %v5758_v29, %v2892_v27 }
0x2081   :  { %v2901_v32 = vadd.f32 %v5758_v29, %v2893_v30 }
0x2083   :  { %v2902_v15 = vpack.c.bf16 %v2901_v32, %v2900_v31 }
0x2085   :  { %6386 = vmatmul.mubr.msk.bf16.vlgmr.msra.gmra.mrb[84].mxu1 %vm133_vm0, %v2902_v15 }
0x2086   :  { %6391 = vmatprep.mubr.msk.bf16.mxu1 %vm6901_vm1, %v6900_v19 }
0x2158   :  { %v2965_v33 = vpop.f32.mrb[84].mxu1 }
0x2159   :  { %v2966_v34 = vadd.f32 %v5764_v44, %v2965_v33  ;;  %v6387_v18 = vpop.f32.mrb[85].mxu1 }
0x215a   :  { %v2968_v35 = vpop.f32.mrb[86].mxu1 }
0x215b   :  { %v7670_v36 = vpack.c.bf16 %v2966_v34, %v2966_v34  ;;  %v2969_v6 = vadd.f32 %v5764_v44, %v2968_v35  ;;  %v6388_v37 = vpop.f32.mrb[87].mxu1 }
0x215d   :  { %v7672_v57 = vpack.c.bf16 %v2969_v6, %v2969_v6  ;;  %2983 = vrot.lane.b32.xlu0 %v7670_v36, %s6902_s28 }
0x215f   :  { %3031 = vrot.lane.b32.xlu1 %v7672_v57, %s6902_s28 }
0x21cf   :  { %v2984_v38 = vpop.permute.xlu0 %2983 }
0x21d0   :  { %v2989_v39 = vsel %vm314_vm2, %v2984_v38, 0 }
0x21d1   :  { %6390 = vmatpush3.bf16.xpose.msra.mxu1 %v2989_v39  ;;  %v3032_v40 = vpop.permute.xlu1 %3031 }
0x21d2   :  { %6395 = vmatprep.subr.bf16.mxu1 %v6900_v19  ;;  %v3037_v41 = vsel %vm314_vm2, %v3032_v40, 0 }
0x21d8   :  { %6392 = vmatmul.mubr.msk.bf16.vlgmr.msra.gmra.mrb[88].mxu1 %vm314_vm2, %v7670_v36 }
0x21d9   :  { %6396 = vmatpush3.bf16.xpose.msra.mxu1 %v3037_v41  ;;  %6397 = vmatprep.mubr.msk.bf16.mxu1 %vm6901_vm1, %v6900_v19 }
0x21da   :  { %6401 = vmatprep.subr.bf16.mxu1 %v6900_v19 }
0x21e0   :  { %6398 = vmatmul.mubr.msk.bf16.vlgmr.msra.gmra.mrb[92].mxu1 %vm314_vm2, %v7672_v57 }
0x21e1   :  { %6403 = vmatprep.mubr.msk.bf16.mxu1 %vm6901_vm1, %v6900_v19 }
0x22ab   :  { %v3025_v42 = vpop.f32.mrb[88].mxu1 }
0x22ac   :  { %v3079_v54 = vmul.f32 0.35355338, %v3025_v42  ;;  %v6393_v45 = vpop.f32.mrb[89].mxu1 }
0x22ad   :  { %v3028_v50 = vpop.f32.mrb[90].mxu1 }
0x22ae   :  { %v6394_v52 = vpop.f32.mrb[91].mxu1  ;;  %v3081_v53 = vadd.f32 %v7693_v51, %v3079_v54 }
0x22b0   :  { %v3083_v9 = vsel %vm314_vm2, %v3081_v53, -inf }
0x22b1   :  { %3084 = vmax.xlane.f32.xlu1 %v3083_v9 }
0x22b3   :  { %v3073_v55 = vpop.f32.mrb[92].mxu1 }
0x22b4   :  { %v3080_v56 = vmul.f32 0.35355338, %v3073_v55  ;;  %v6399_v59 = vpop.f32.mrb[93].mxu1 }
0x22b5   :  { %v3076_v11 = vpop.f32.mrb[94].mxu1 }
0x22b6   :  { %v6400_v60 = vpop.f32.mrb[95].mxu1  ;;  %v3082_v3 = vadd.f32 %v7700_v2, %v3080_v56 }
0x22b8   :  { %v3086_v7 = vsel %vm314_vm2, %v3082_v3, -inf }
0x22b9   :  { %3087 = vmax.xlane.f32.xlu0 %v3086_v7 }
0x22c2   :  { %3155 = vrot.lane.b32.xlu1 %v7672_v57, %s8287_s25 }
0x22c6   :  { %3206 = vrot.lane.b32.xlu1 %v7670_v36, %s8288_s13 }
0x233e   :  { %v3085_v8 = vpop.xlane.xlu1 %3084 }
0x233f   :  { %v3089_v10 = vsub.f32 %v3081_v53, %v3085_v8 }
0x2341   :  { %v3091_v49 = vmul.f32 1.442695, %v3089_v10 }
0x2342   :  { %v3156_v43 = vpop.permute.xlu1 %3155 }
0x2343   :  { %6808 = vpow2.f32 %v3091_v49  ;;  %v3161_v63 = vsel %vm442_vm3, %v3156_v43, 0 }
0x2344   :  { %6408 = vmatpush3.bf16.msra.mxu0 %v3161_v63 }
0x2345   :  { %6419 = vmatprep.subr.bf16.mxu0 %v6900_v19 }
0x2346   :  { %v3088_v12 = vpop.xlane.xlu0 %3087  ;;  %v3207_v20 = vpop.permute.xlu1 %3206 }
0x2347   :  { %v3090_v13 = vsub.f32 %v3082_v3, %v3088_v12  ;;  %v3212_v24 = vsel %vm314_vm2, %v3207_v20, 0 }
0x2349   :  { %v3093_v46 = vmul.f32 1.442695, %v3090_v13 }
0x234b   :  { %6810 = vpow2.f32 %v3093_v46 }
0x234d   :  { %v6809_v14 = vpop.eup %6808 }
0x234e   :  { %v3095_v0 = vsel %vm314_vm2, %v6809_v14, 0.0 }
0x234f   :  { %3096 = vadd.xlane.f32.xlu0 %v3095_v0 }
0x2355   :  { %v6811_v16 = vpop.eup %6810 }
0x2356   :  { %v3098_v62 = vsel %vm314_vm2, %v6811_v16, 0.0 }
0x2357   :  { %3099 = vadd.xlane.f32.xlu1 %v3098_v62 }
0x2365   :  { %3107 = vrot.lane.b32.xlu0 %v7670_v36, %s8287_s25 }
0x2368   :  { %3256 = vrot.lane.b32.xlu1 %v7672_v57, %s8288_s13  ;;  %s6913_s13 = smov 32  }
0x2369   :  { %3204 = vrot.lane.b32.xlu0 %v7670_v36, %s8289_s29 }
0x236c   :  { %3254 = vrot.lane.b32.xlu1 %v7672_v57, %s8289_s29 }
0x23dc   :  { %v3097_v17 = vpop.xlane.xlu0 %3096 }
0x23dd   :  { %6812 = vrcp.f32 %v3097_v17 }
0x23e0   :  { %v3108_v4 = vpop.permute.xlu0 %3107 }
0x23e1   :  { %v3113_v21 = vsel %vm442_vm3, %v3108_v4, 0 }
0x23e2   :  { %6402 = vmatpush3.bf16.msra.mxu1 %v3113_v21 }
0x23e3   :  { %6413 = vmatprep.subr.bf16.mxu1 %v6900_v19 }
0x23e4   :  { %v3100_v58 = vpop.xlane.xlu1 %3099  ;;  %v3205_v29 = vpop.permute.xlu0 %3204 }
0x23e5   :  { %6814 = vrcp.f32 %v3100_v58  ;;  %v5770_v58 = vld [vmem:[%s8224_s8 + $0x10] sm:$0xf] }
0x23e7   :  { %v6813_v1 = vpop.eup %6812 }
0x23e8   :  { %v3103_v22 = vmul.f32 %v6813_v1, %v6809_v14  ;;  %v3257_v27 = vpop.permute.xlu1 %3256 }
0x23e9   :  { %v3262_v30 = vsel %vm314_vm2, %v3257_v27, 0 }
0x23ea   :  { %v3105_v23 = vpack.c.bf16 %v3103_v22, %v3103_v22 }
0x23ec   :  { %6404 = vmatmul.mubr.msk.bf16.vlgmr.msra.gmra.mrb[96].mxu1 %vm314_vm2, %v3105_v23  ;;  %v3255_v31 = vpop.permute.xlu1 %3254  ;;  %v3480_v23 = vsel %vm442_vm3, %v5770_v58, 0 }
0x23ed   :  { %6414 = vmatpush3.bf16.xpose.msra.mxu1 %v3212_v24  ;;  %6415 = vmatprep.mubr.msk.bf16.mxu1 %vm6901_vm1, %v6900_v19 }
0x23ee   :  { %6425 = vmatprep.subr.bf16.mxu1 %v6900_v19 }
0x23ef   :  { %v6815_v25 = vpop.eup %6814 }
0x23f0   :  { %v3104_v26 = vmul.f32 %v6815_v25, %v6811_v16 }
0x23f2   :  { %v3106_v28 = vpack.c.bf16 %v3104_v26, %v3104_v26 }
0x23f4   :  { %6410 = vmatmul.mubr.msk.bf16.vlgmr.msra.gmra.mrb[96].mxu0 %vm314_vm2, %v3106_v28  ;;  %6416 = vmatmul.mubr.msk.bf16.vlgmr.msra.gmra.mrb[100].mxu1 %vm314_vm2, %v3205_v29  ;;  %v5771_v28 = vld [vmem:[%s8224_s8 + $0x14] sm:$0xf] }
0x23f5   :  { %6420 = vmatpush3.bf16.xpose.msra.mxu0 %v3262_v30  ;;  %6421 = vmatprep.mubr.msk.bf16.mxu0 %vm6901_vm1, %v6900_v19  ;;  %v3433_v29 = vsel %vm442_vm3, %v5771_v28, 0 }
0x23f6   :  { %6431 = vmatprep.subr.bf16.mxu0 %v6900_v19  ;;  %6427 = vmatprep.mubr.msk.bf16.mxu1 %vm6901_vm1, %v6900_v19 }
0x23fc   :  { %6422 = vmatmul.mubr.msk.bf16.vlgmr.msra.gmra.mrb[100].mxu0 %vm314_vm2, %v3255_v31 }
0x23fd   :  { %6433 = vmatprep.mubr.msk.bf16.mxu0 %vm6901_vm1, %v6900_v19 }
0x24bf   :  { %v7738_v32 = vpop.f32.mrb[96].mxu1 }
0x24c0   :  { %v6405_v15 = vpop.f32.mrb[97].mxu1 }
0x24c1   :  { %v3152_v44 = vpop.f32.mrb[98].mxu1 }
0x24c2   :  { %v6406_v33 = vpop.f32.mrb[99].mxu1 }
0x24c7   :  { %v7740_v34 = vpop.f32.mrb[96].mxu0  ;;  %v3248_v18 = vpop.f32.mrb[100].mxu1 }
0x24c8   :  { %v3203_v35 = vpack.c.bf16 %v7740_v34, %v7738_v32  ;;  %v3304_v6 = vmul.f32 0.35355338, %v3248_v18  ;;  %v6411_v37 = vpop.f32.mrb[97].mxu0  ;;  %v6417_v38 = vpop.f32.mrb[101].mxu1 }
0x24c9   :  { %v3200_v39 = vpop.f32.mrb[98].mxu0  ;;  %v3251_v40 = vpop.f32.mrb[102].mxu1 }
0x24ca   :  { %v3306_v41 = vadd.f32 %v7693_v51, %v3304_v6  ;;  %v6412_v42 = vpop.f32.mrb[99].mxu0  ;;  %v6418_v54 = vpop.f32.mrb[103].mxu1 }
0x24cc   :  { %v3308_v45 = vsel %vm314_vm2, %v3306_v41, -inf }
0x24cd   :  { %3309 = vmax.xlane.f32.xlu0 %v3308_v45 }
0x24cf   :  { %v3298_v50 = vpop.f32.mrb[100].mxu0 }
0x24d0   :  { %v3305_v52 = vmul.f32 0.35355338, %v3298_v50  ;;  %v6423_v53 = vpop.f32.mrb[101].mxu0 }
0x24d1   :  { %v3301_v9 = vpop.f32.mrb[102].mxu0 }
0x24d2   :  { %v3307_v55 = vadd.f32 %v7700_v2, %v3305_v52  ;;  %v6424_v56 = vpop.f32.mrb[103].mxu0 }
0x24d4   :  { %v3311_v59 = vsel %vm314_vm2, %v3307_v55, -inf }
0x24d5   :  { %3312 = vmax.xlane.f32.xlu1 %v3311_v59 }
0x24e6   :  { %3380 = vrot.lane.b32.xlu1 %v7672_v57, %s8290_s6 }
0x24ea   :  { %3525 = vrot.lane.b32.xlu1 %v7670_v36, %s8291_s27 }
0x24ee   :  { %3575 = vrot.lane.b32.xlu1 %v7672_v57, %s8291_s27  ;;  %s8295_s27 = smov 40  }
0x24f2   :  { %3573 = vrot.lane.b32.xlu1 %v7672_v57, %s8292_s5 }
0x255a   :  { %v3310_v11 = vpop.xlane.xlu0 %3309 }
0x255b   :  { %v3314_v60 = vsub.f32 %v3306_v41, %v3310_v11 }
0x255d   :  { %v3316_v3 = vmul.f32 1.442695, %v3314_v60 }
0x255f   :  { %6816 = vpow2.f32 %v3316_v3 }
0x2562   :  { %v3313_v7 = vpop.xlane.xlu1 %3312 }
0x2563   :  { %v3315_v8 = vsub.f32 %v3307_v55, %v3313_v7 }
0x2565   :  { %v3318_v10 = vmul.f32 1.442695, %v3315_v8 }
0x2566   :  { %v3381_v49 = vpop.permute.xlu1 %3380 }
0x2567   :  { %6818 = vpow2.f32 %v3318_v10  ;;  %v3386_v43 = vsel %vm442_vm3, %v3381_v49, 0 }
0x2568   :  { %6432 = vmatpush3.bf16.msra.mxu0 %v3386_v43 }
0x2569   :  { %v6817_v63 = vpop.eup %6816  ;;  %6443 = vmatprep.subr.bf16.mxu0 %v6900_v19 }
0x256a   :  { %v3320_v12 = vsel %vm314_vm2, %v6817_v63, 0.0  ;;  %v3526_v24 = vpop.permute.xlu1 %3525 }
0x256b   :  { %3321 = vadd.xlane.f32.xlu0 %v3320_v12 }
0x256e   :  { %v3576_v25 = vpop.permute.xlu1 %3575 }
0x256f   :  { %v3581_v26 = vsel %vm314_vm2, %v3576_v25, 0 }
0x2571   :  { %v6819_v13 = vpop.eup %6818 }
0x2572   :  { %v3323_v46 = vsel %vm314_vm2, %v6819_v13, 0.0  ;;  %v3574_v27 = vpop.permute.xlu1 %3573 }
0x2573   :  { %3324 = vadd.xlane.f32.xlu0 %v3323_v46 }
0x2589   :  { %3332 = vrot.lane.b32.xlu0 %v7670_v36, %s8290_s6 }
0x258d   :  { %3523 = vrot.lane.b32.xlu0 %v7670_v36, %s8292_s5 }
0x25f8   :  { %v3322_v14 = vpop.xlane.xlu0 %3321 }
0x25f9   :  { %6820 = vrcp.f32 %v3322_v14 }
0x2600   :  { %v3325_v0 = vpop.xlane.xlu0 %3324 }
0x2601   :  { %6822 = vrcp.f32 %v3325_v0 }
0x2603   :  { %v6821_v16 = vpop.eup %6820 }
0x2604   :  { %v3328_v62 = vmul.f32 %v6821_v16, %v6817_v63  ;;  %v3333_v17 = vpop.permute.xlu0 %3332 }
0x2605   :  { %v3338_v20 = vsel %vm442_vm3, %v3333_v17, 0 }
0x2606   :  { %6426 = vmatpush3.bf16.msra.mxu1 %v3338_v20  ;;  %v3330_v4 = vpack.c.bf16 %v3328_v62, %v3328_v62 }
0x2607   :  { %6437 = vmatprep.subr.bf16.mxu1 %v6900_v19 }
0x2608   :  { %v3524_v39 = vpop.permute.xlu0 %3523 }
0x2609   :  { %6428 = vmatmul.mubr.msk.bf16.vlgmr.msra.gmra.mrb[104].mxu1 %vm314_vm2, %v3330_v4 }
0x260a   :  { %6439 = vmatprep.mubr.msk.bf16.mxu1 %vm6901_vm1, %v6900_v19  ;;  %6438 = vmatpush3.bf16.msra.mxu1 %v3433_v29 }
0x260b   :  { %v6823_v21 = vpop.eup %6822  ;;  %6449 = vmatprep.subr.bf16.mxu1 %v6900_v19 }
0x260c   :  { %v3329_v1 = vmul.f32 %v6823_v21, %v6819_v13 }
0x260e   :  { %v3331_v22 = vpack.c.bf16 %v3329_v1, %v3329_v1 }
0x2610   :  { %6434 = vmatmul.mubr.msk.bf16.vlgmr.msra.gmra.mrb[104].mxu0 %vm314_vm2, %v3331_v22 }
0x2611   :  { %6444 = vmatpush3.bf16.msra.mxu0 %v3480_v23  ;;  %6445 = vmatprep.mubr.msk.bf16.mxu0 %vm6901_vm1, %v6900_v19 }
0x2612   :  { %6455 = vmatprep.subr.bf16.mxu0 %v6900_v19 }
0x2618   :  { %6446 = vmatmul.mubr.msk.bf16.vlgmr.msra.gmra.mrb[108].mxu0 %vm314_vm2, %v3203_v35  ;;  %v3531_v35 = vsel %vm314_vm2, %v3526_v24, 0 }
0x2619   :  { %6457 = vmatprep.mubr.msk.bf16.mxu0 %vm6901_vm1, %v6900_v19 }
0x261a   :  { %6456 = vmatpush3.bf16.xpose.msra.mxu0 %v3581_v26 }
0x261b   :  { %6467 = vmatprep.subr.bf16.mxu0 %v6900_v19 }
0x2621   :  { %6458 = vmatmul.mubr.msk.bf16.vlgmr.msra.gmra.mrb[112].mxu0 %vm314_vm2, %v3574_v27 }
0x2622   :  { %6469 = vmatprep.mubr.msk.bf16.mxu0 %vm6901_vm1, %v6900_v19 }
0x26dc   :  { %v3374_v30 = vpop.f32.mrb[104].mxu1 }
0x26dd   :  { %v6429_v31 = vpop.f32.mrb[105].mxu1 }
0x26de   :  { %v3377_v32 = vpop.f32.mrb[106].mxu1 }
0x26df   :  { %v6430_v15 = vpop.f32.mrb[107].mxu1 }
0x26e3   :  { %v3422_v44 = vpop.f32.mrb[104].mxu0 }
0x26e4   :  { %v3428_v33 = vpack.c.bf16 %v3422_v44, %v3374_v30  ;;  %v6435_v34 = vpop.f32.mrb[105].mxu0 }
0x26e5   :  { %v3425_v18 = vpop.f32.mrb[106].mxu0 }
0x26e6   :  { %v6436_v6 = vpop.f32.mrb[107].mxu0  ;;  %6440 = vmatmul.mubr.msk.bf16.vlgmr.msra.gmra.mrb[108].mxu1 %vm314_vm2, %v3428_v33 }
0x26e7   :  { %6450 = vmatpush3.bf16.xpose.msra.mxu1 %v3531_v35  ;;  %6451 = vmatprep.mubr.msk.bf16.mxu1 %vm6901_vm1, %v6900_v19  ;;  %v5772_v6 = vld [vmem:[%s8224_s8 + $0x18] sm:$0xf] }
0x26e8   :  { %6461 = vmatprep.subr.bf16.mxu1 %v6900_v19 }
0x26eb   :  { %v3516_v37 = vpop.f32.mrb[108].mxu0 }
0x26ec   :  { %v6447_v38 = vpop.f32.mrb[109].mxu0 }
0x26ed   :  { %v3519_v40 = vpop.f32.mrb[110].mxu0 }
0x26ee   :  { %v6448_v41 = vpop.f32.mrb[111].mxu0  ;;  %6452 = vmatmul.mubr.msk.bf16.vlgmr.msra.gmra.mrb[112].mxu1 %vm314_vm2, %v3524_v39 }
0x26ef   :  { %6463 = vmatprep.mubr.msk.bf16.mxu1 %vm6901_vm1, %v6900_v19 }
0x26f4   :  { %v3617_v42 = vpop.f32.mrb[112].mxu0 }
0x26f5   :  { %v3624_v54 = vmul.f32 0.35355338, %v3617_v42  ;;  %v6459_v45 = vpop.f32.mrb[113].mxu0 }
0x26f6   :  { %v3620_v50 = vpop.f32.mrb[114].mxu0 }
0x26f7   :  { %v3626_v52 = vadd.f32 %v7700_v2, %v3624_v54  ;;  %v6460_v53 = vpop.f32.mrb[115].mxu0 }
0x26f9   :  { %v3630_v9 = vsel %vm314_vm2, %v3626_v52, -inf }
0x26fa   :  { %3631 = vmax.xlane.f32.xlu1 %v3630_v9 }
0x270b   :  { %3699 = vrot.lane.b32.xlu1 %v7672_v57, %s8293_s30 }
0x270f   :  { %3799 = vrot.lane.b32.xlu1 %v7670_v36, %s8286_s12 }
0x2713   :  { %3849 = vrot.lane.b32.xlu1 %v7672_v57, %s8286_s12 }
0x2717   :  { %3847 = vrot.lane.b32.xlu1 %v7672_v57, %s8294_s4 }
0x2787   :  { %v3632_v55 = vpop.xlane.xlu1 %3631 }
0x2788   :  { %v3634_v11 = vsub.f32 %v3626_v52, %v3632_v55 }
0x278a   :  { %v3637_v60 = vmul.f32 1.442695, %v3634_v11 }
0x278b   :  { %v3700_v56 = vpop.permute.xlu1 %3699 }
0x278c   :  { %v3705_v59 = vsel %vm442_vm3, %v3700_v56, 0  ;;  %6824 = vpow2.f32 %v3637_v60 }
0x278d   :  { %6468 = vmatpush3.bf16.msra.mxu0 %v3705_v59 }
0x278e   :  { %6479 = vmatprep.subr.bf16.mxu0 %v6900_v19 }
0x278f   :  { %v3800_v25 = vpop.permute.xlu1 %3799 }
0x2790   :  { %v3805_v27 = vsel %vm314_vm2, %v3800_v25, 0 }
0x2793   :  { %v3850_v50 = vpop.permute.xlu1 %3849 }
0x2794   :  { %v3855_v56 = vsel %vm314_vm2, %v3850_v50, 0 }
0x2796   :  { %v6825_v62 = vpop.eup %6824 }
0x2797   :  { %v3642_v17 = vsel %vm314_vm2, %v6825_v62, 0.0 }
0x27b9   :  { %v3469_v3 = vpop.f32.mrb[108].mxu1 }
0x27ba   :  { %v7813_v7 = vadd.f32 %v3516_v37, %v3469_v3  ;;  %v6441_v8 = vpop.f32.mrb[109].mxu1  ;;  %v3752_v37 = vsel %vm442_vm3, %v5772_v6, 0 }
0x27bb   :  { %v3472_v10 = vpop.f32.mrb[110].mxu1 }
0x27bc   :  { %v7815_v49 = vadd.f32 %v3519_v40, %v3472_v10  ;;  %v6442_v43 = vpop.f32.mrb[111].mxu1 }
0x27c1   :  { %v3567_v63 = vpop.f32.mrb[112].mxu1 }
0x27c2   :  { %v3623_v12 = vmul.f32 0.35355338, %v3567_v63  ;;  %v6453_v13 = vpop.f32.mrb[113].mxu1 }
0x27c3   :  { %v3570_v46 = vpop.f32.mrb[114].mxu1 }
0x27c4   :  { %v3625_v14 = vadd.f32 %v7693_v51, %v3623_v12  ;;  %v6454_v0 = vpop.f32.mrb[115].mxu1 }
0x27c6   :  { %v3627_v16 = vsel %vm314_vm2, %v3625_v14, -inf }
0x27c7   :  { %3628 = vmax.xlane.f32.xlu0 %v3627_v16 }
0x27cb   :  { %3643 = vadd.xlane.f32.xlu0 %v3642_v17 }
0x2854   :  { %v3629_v20 = vpop.xlane.xlu0 %3628 }
0x2855   :  { %v3633_v4 = vsub.f32 %v3625_v14, %v3629_v20 }
0x2857   :  { %v3635_v21 = vmul.f32 1.442695, %v3633_v4 }
0x2858   :  { %v3644_v58 = vpop.xlane.xlu0 %3643 }
0x2859   :  { %6826 = vpow2.f32 %v3635_v21 }
0x285a   :  { %6828 = vrcp.f32 %v3644_v58 }
0x2863   :  { %v6827_v1 = vpop.eup %6826 }
0x2864   :  { %v6829_v22 = vpop.eup %6828  ;;  %v3639_v23 = vsel %vm314_vm2, %v6827_v1, 0.0 }
0x2865   :  { %v3648_v24 = vmul.f32 %v6829_v22, %v6825_v62  ;;  %3640 = vadd.xlane.f32.xlu0 %v3639_v23 }
0x2867   :  { %v3650_v26 = vpack.c.bf16 %v3648_v24, %v3648_v24 }
0x2869   :  { %6470 = vmatmul.mubr.msk.bf16.vlgmr.msra.gmra.mrb[116].mxu0 %vm314_vm2, %v3650_v26 }
0x286a   :  { %6480 = vmatpush3.bf16.xpose.msra.mxu0 %v3805_v27  ;;  %6481 = vmatprep.mubr.msk.bf16.mxu0 %vm6901_vm1, %v6900_v19 }
0x286b   :  { %6491 = vmatprep.subr.bf16.mxu0 %v6900_v19 }
0x287b   :  { %3651 = vrot.lane.b32.xlu0 %v7670_v36, %s8293_s30 }
0x287f   :  { %3797 = vrot.lane.b32.xlu0 %v7670_v36, %s8294_s4 }
0x28f2   :  { %v3641_v28 = vpop.xlane.xlu0 %3640 }
0x28f3   :  { %6830 = vrcp.f32 %v3641_v28 }
0x28f6   :  { %v3652_v29 = vpop.permute.xlu0 %3651 }
0x28f7   :  { %v3657_v30 = vsel %vm442_vm3, %v3652_v29, 0 }
0x28f8   :  { %6462 = vmatpush3.bf16.msra.mxu1 %v3657_v30 }
0x28f9   :  { %6473 = vmatprep.subr.bf16.mxu1 %v6900_v19 }
0x28fa   :  { %v3798_v31 = vpop.permute.xlu0 %3797 }
0x28fb   :  { %6482 = vmatmul.mubr.msk.bf16.vlgmr.msra.gmra.mrb[120].mxu0 %vm314_vm2, %v3798_v31 }
0x28fc   :  { %6493 = vmatprep.mubr.msk.bf16.mxu0 %vm6901_vm1, %v6900_v19 }
0x28fd   :  { %v6831_v32 = vpop.eup %6830 }
0x28fe   :  { %v3647_v15 = vmul.f32 %v6831_v32, %v6827_v1  ;;  %v5773_v32 = vld [vmem:[%s8224_s8 + $0x1c] sm:$0xf] }
0x2900   :  { %v3649_v44 = vpack.c.bf16 %v3647_v15, %v3647_v15  ;;  %v4026_v15 = vsel %vm442_vm3, %v5773_v32, 0 }
0x2902   :  { %6464 = vmatmul.mubr.msk.bf16.vlgmr.msra.gmra.mrb[116].mxu1 %vm314_vm2, %v3649_v44 }
0x2903   :  { %6475 = vmatprep.mubr.msk.bf16.mxu1 %vm6901_vm1, %v6900_v19  ;;  %6474 = vmatpush3.bf16.msra.mxu1 %v3752_v37 }
0x2904   :  { %6485 = vmatprep.subr.bf16.mxu1 %v6900_v19 }
0x293c   :  { %v3741_v33 = vpop.f32.mrb[116].mxu0 }
0x293d   :  { %v6471_v34 = vpop.f32.mrb[117].mxu0 }
0x293e   :  { %v3744_v18 = vpop.f32.mrb[118].mxu0 }
0x293f   :  { %v6472_v35 = vpop.f32.mrb[119].mxu0 }
0x29ce   :  { %v3841_v38 = vpop.f32.mrb[120].mxu0 }
0x29cf   :  { %v3897_v39 = vmul.f32 0.35355338, %v3841_v38  ;;  %v6483_v40 = vpop.f32.mrb[121].mxu0 }
0x29d0   :  { %v3844_v41 = vpop.f32.mrb[122].mxu0 }
0x29d1   :  { %v3899_v42 = vadd.f32 %v7693_v51, %v3897_v39  ;;  %v6484_v54 = vpop.f32.mrb[123].mxu0  ;;  %v3848_v51 = vpop.permute.xlu1 %3847 }
0x29d2   :  { %v5795_v54 = vld [vmem:[%s8225_s9 + $0x1] ss:$0 sm:$0xff] }
0x29d3   :  { %v3901_v45 = vsel %vm314_vm2, %v3899_v42, -inf }
0x29d4   :  { %3902 = vmax.xlane.f32.xlu0 %v3901_v45 }
0x29d5   :  { %v3693_v52 = vpop.f32.mrb[116].mxu1 }
0x29d6   :  { %v3747_v53 = vpack.c.bf16 %v3741_v33, %v3693_v52  ;;  %v6465_v9 = vpop.f32.mrb[117].mxu1 }
0x29d7   :  { %v3696_v55 = vpop.f32.mrb[118].mxu1 }
0x29d8   :  { %v6466_v59 = vpop.f32.mrb[119].mxu1  ;;  %6476 = vmatmul.mubr.msk.bf16.vlgmr.msra.gmra.mrb[120].mxu1 %vm314_vm2, %v3747_v53 }
0x29d9   :  { %6486 = vmatpush3.bf16.xpose.msra.mxu1 %v3855_v56  ;;  %6487 = vmatprep.mubr.msk.bf16.mxu1 %vm6901_vm1, %v6900_v19 }
0x29da   :  { %6497 = vmatprep.subr.bf16.mxu1 %v6900_v19 }
0x29e0   :  { %6488 = vmatmul.mubr.msk.bf16.vlgmr.msra.gmra.mrb[124].mxu1 %vm314_vm2, %v3848_v51 }
0x29e1   :  { %6499 = vmatprep.mubr.msk.bf16.mxu1 %vm6901_vm1, %v6900_v19 }
0x2a61   :  { %v3903_v11 = vpop.xlane.xlu0 %3902 }
0x2a62   :  { %v3907_v60 = vsub.f32 %v3899_v42, %v3903_v11 }
0x2a64   :  { %v3909_v3 = vmul.f32 1.442695, %v3907_v60 }
0x2a66   :  { %6832 = vpow2.f32 %v3909_v3 }
0x2a70   :  { %v6833_v8 = vpop.eup %6832 }
0x2a71   :  { %v3913_v10 = vsel %vm314_vm2, %v6833_v8, 0.0 }
0x2a72   :  { %3914 = vadd.xlane.f32.xlu0 %v3913_v10 }
0x2aab   :  { %v3788_v43 = vpop.f32.mrb[120].mxu1 }
0x2aac   :  { %v3795_v63 = vadd.f32 %v3788_v43, %v7813_v7  ;;  %v6477_v12 = vpop.f32.mrb[121].mxu1 }
0x2aad   :  { %v3791_v13 = vpop.f32.mrb[122].mxu1 }
0x2aae   :  { %v3796_v46 = vadd.f32 %v3791_v13, %v7815_v49  ;;  %v6478_v14 = vpop.f32.mrb[123].mxu1  ;;  %v6710_v13 = vld [vmem:[%s8226_s10 + $0x10] sm:$0xff]  }
0x2ab3   :  { %v3891_v0 = vpop.f32.mrb[124].mxu1 }
0x2ab4   :  { %v3898_v16 = vmul.f32 0.35355338, %v3891_v0  ;;  %v6489_v62 = vpop.f32.mrb[125].mxu1 }
0x2ab5   :  { %v3894_v17 = vpop.f32.mrb[126].mxu1 }
0x2ab6   :  { %v3900_v20 = vadd.f32 %v7700_v2, %v3898_v16  ;;  %v6490_v4 = vpop.f32.mrb[127].mxu1 }
0x2ab8   :  { %v3904_v21 = vsel %vm314_vm2, %v3900_v20, -inf }
0x2ab9   :  { %3905 = vmax.xlane.f32.xlu1 %v3904_v21 }
0x2aca   :  { %3973 = vrot.lane.b32.xlu1 %v7672_v57, %s8295_s27 }
0x2aff   :  { %v3915_v24 = vpop.xlane.xlu0 %3914 }
0x2b46   :  { %v3906_v58 = vpop.xlane.xlu1 %3905 }
0x2b47   :  { %v3908_v7 = vsub.f32 %v3900_v20, %v3906_v58 }
0x2b49   :  { %v3911_v1 = vmul.f32 1.442695, %v3908_v7  ;;  %v5796_v7 = vld [vmem:[%s8281_s0 + $0x4] ss:$0 sm:$0xff] }
0x2b4a   :  { %v3974_v22 = vpop.permute.xlu1 %3973 }
0x2b4b   :  { %6834 = vpow2.f32 %v3911_v1  ;;  %v3979_v49 = vsel %vm442_vm3, %v3974_v22, 0 }
0x2b4c   :  { %6498 = vmatpush3.bf16.msra.mxu1 %v3979_v49  ;;  %6836 = vrcp.f32 %v3915_v24 }
0x2b4d   :  { %6509 = vmatprep.subr.bf16.mxu1 %v6900_v19 }
0x2b55   :  { %v6835_v23 = vpop.eup %6834 }
0x2b56   :  { %v3916_v2 = vsel %vm314_vm2, %v6835_v23, 0.0  ;;  %v6837_v57 = vpop.eup %6836 }
0x2b57   :  { %3917 = vadd.xlane.f32.xlu0 %v3916_v2  ;;  %v3921_v26 = vmul.f32 %v6837_v57, %v6833_v8  ;;  %v5797_v2 = vld [vmem:[%s8282_s3 + $0x4] ss:$0 sm:$0xff] }
0x2b59   :  { %v3923_v29 = vpack.c.bf16 %v3921_v26, %v3921_v26 }
0x2b6d   :  { %3925 = vrot.lane.b32.xlu0 %v7670_v36, %s8295_s27 }
0x2be4   :  { %v3918_v25 = vpop.xlane.xlu0 %3917 }
0x2be5   :  { %6838 = vrcp.f32 %v3918_v25 }
0x2be8   :  { %v3926_v27 = vpop.permute.xlu0 %3925 }
0x2be9   :  { %v3931_v28 = vsel %vm442_vm3, %v3926_v27, 0 }
0x2bea   :  { %6492 = vmatpush3.bf16.msra.mxu0 %v3931_v28 }
0x2beb   :  { %6503 = vmatprep.subr.bf16.mxu0 %v6900_v19 }
0x2bed   :  { %6494 = vmatmul.mubr.msk.bf16.vlgmr.msra.gmra.mrb[124].mxu0 %vm314_vm2, %v3923_v29  ;;  %v5803_v29 = vld [vmem:[%s8227_s11 + $0x1] ss:$0 sm:$0xff] }
0x2bee   :  { %6505 = vmatprep.mubr.msk.bf16.mxu0 %vm6901_vm1, %v6900_v19  ;;  %6504 = vmatpush3.bf16.msra.mxu0 %v4026_v15 }
0x2bef   :  { %v6839_v30 = vpop.eup %6838  ;;  %6517 = vmatprep.subr.bf16.mxu0 %v6900_v19 }
0x2bf0   :  { %v3922_v36 = vmul.f32 %v6839_v30, %v6835_v23 }
0x2bf2   :  { %v3924_v31 = vpack.c.bf16 %v3922_v36, %v3922_v36 }
0x2bf4   :  { %6500 = vmatmul.mubr.msk.bf16.vlgmr.msra.gmra.mrb[128].mxu1 %vm314_vm2, %v3924_v31 }
0x2bf5   :  { %6513 = vmatprep.mubr.msk.bf16.mxu1 %vm6901_vm1, %v6900_v19  ;;  %6510 = vmatpush3.bf16.msra.mxu1 %v6710_v13 }
0x2bf6   :  { %6511 = vmatprep.subr.bf16.mxu1 %v6900_v19 }
0x2cc0   :  { %v3967_v44 = vpop.f32.mrb[124].mxu0 }
0x2cc1   :  { %v6495_v33 = vpop.f32.mrb[125].mxu0 }
0x2cc2   :  { %v3970_v34 = vpop.f32.mrb[126].mxu0 }
0x2cc3   :  { %v6496_v18 = vpop.f32.mrb[127].mxu0 }
0x2cc7   :  { %v4015_v35 = vpop.f32.mrb[128].mxu1 }
0x2cc8   :  { %v4021_v6 = vpack.c.bf16 %v4015_v35, %v3967_v44  ;;  %v6501_v37 = vpop.f32.mrb[129].mxu1 }
0x2cc9   :  { %v4018_v38 = vpop.f32.mrb[130].mxu1 }
0x2cca   :  { %v6502_v39 = vpop.f32.mrb[131].mxu1  ;;  %6506 = vmatmul.mubr.msk.bf16.vlgmr.msra.gmra.mrb[128].mxu0 %vm314_vm2, %v4021_v6 }
0x2ccb   :  { %6519 = vmatprep.mubr.msk.bf16.mxu0 %vm6901_vm1, %v6900_v19  ;;  %v7941_v39 = vld [vmem:[%s8228_s2] sm:$0xff] }
0x2d9d   :  { %v4062_v40 = vpop.f32.mrb[128].mxu0 }
0x2d9e   :  { %v4069_v41 = vadd.f32 %v4062_v40, %v3795_v63  ;;  %v6507_v42 = vpop.f32.mrb[129].mxu0 }
0x2d9f   :  { %v4065_v45 = vpop.f32.mrb[130].mxu0 }
0x2da0   :  { %v4071_v50 = vadd.f32 %v4069_v41, %v7637_v61  ;;  %v4070_v52 = vadd.f32 %v4065_v45, %v3796_v46  ;;  %v6508_v53 = vpop.f32.mrb[131].mxu0  ;;  %v6711_v46 = vld [vmem:[%s8226_s10 + $0x18] sm:$0xff]   ;;  %s6916_s10 = smov 8  }
0x2da1   :  { %6512 = vmatpush3.bf16.msra.mxu1 %v6711_v46 }
0x2da2   :  { %v7885_v9 = vadd.f32 %v5795_v54, %v4071_v50  ;;  %v4072_v55 = vadd.f32 %v4070_v52, %v7640_v5  ;;  %6523 = vmatprep.subr.bf16.mxu1 %v6900_v19  ;;  %v7947_v50 = vld [vmem:[%s8228_s2 + $0x8] sm:$0xff]  ;;  %s6914_s2 = smov 24  }
0x2da4   :  { %v7888_v56 = vadd.f32 %v5795_v54, %v4072_v55  ;;  %v4083_v59 = vsel %vm133_vm0, %v7885_v9, 0.0 }
0x2da5   :  { %4084 = vadd.xlane.f32.xlu1 %v4083_v59 }
0x2da6   :  { %v4086_v51 = vsel %vm133_vm0, %v7888_v56, 0.0 }
0x2da7   :  { %4087 = vadd.xlane.f32.xlu0 %v4086_v51 }
0x2e32   :  { %v4085_v11 = vpop.xlane.xlu1 %4084 }
0x2e33   :  { %v4089_v60 = vmul.f32 0.03125, %v4085_v11 }
0x2e34   :  { %v4088_v3 = vpop.xlane.xlu0 %4087 }
0x2e35   :  { %v4091_v61 = vsub.f32 %v7885_v9, %v4089_v60  ;;  %v4090_v8 = vmul.f32 0.03125, %v4088_v3 }
0x2e37   :  { %v4092_v10 = vsub.f32 %v7888_v56, %v4090_v8  ;;  %v4093_v43 = vmul.f32 %v4091_v61, %v4091_v61 }
0x2e39   :  { %v4095_v5 = vsel %vm133_vm0, %v4093_v43, 0.0  ;;  %v4094_v63 = vmul.f32 %v4092_v10, %v4092_v10 }
0x2e3a   :  { %4096 = vadd.xlane.f32.xlu0 %v4095_v5 }
0x2e3b   :  { %v4098_v12 = vsel %vm133_vm0, %v4094_v63, 0.0 }
0x2e3c   :  { %4099 = vadd.xlane.f32.xlu1 %v4098_v12 }
0x2e4d   :  { %4254 = vrot.lane.b32.xlu1 %v7100_v47, %s8287_s25 }
0x2e50   :  { %4206 = vrot.lane.b32.xlu0 %v7102_v48, %s8287_s25  ;;  %s6915_s25 = smov 16  }
0x2ec7   :  { %v4097_v14 = vpop.xlane.xlu0 %4096 }
0x2ec8   :  { %v4101_v0 = vmul.f32 0.03125, %v4097_v14 }
0x2ec9   :  { %v4100_v16 = vpop.xlane.xlu1 %4099 }
0x2eca   :  { %v4103_v62 = vadd.f32 1e-06, %v4101_v0  ;;  %v4102_v17 = vmul.f32 0.03125, %v4100_v16 }
0x2ecb   :  { %v4207_v20 = vpop.permute.xlu0 %4206 }
0x2ecc   :  { %6840 = vrsqrt.f32 %v4103_v62  ;;  %v4104_v4 = vadd.f32 1e-06, %v4102_v17  ;;  %v4212_v21 = vsel %vm314_vm2, %v4207_v20, 0 }
0x2ecd   :  { %6518 = vmatpush3.bf16.xpose.msra.mxu0 %v4212_v21  ;;  %v4255_v26 = vpop.permute.xlu1 %4254 }
0x2ece   :  { %6842 = vrsqrt.f32 %v4104_v4  ;;  %6529 = vmatprep.subr.bf16.mxu0 %v6900_v19  ;;  %v4260_v28 = vsel %vm314_vm2, %v4255_v26, 0 }
0x2ed6   :  { %v6841_v58 = vpop.eup %6840 }
0x2ed7   :  { %v4107_v1 = vmul.f32 %v6841_v58, %v4091_v61 }
0x2ed8   :  { %v6843_v22 = vpop.eup %6842 }
0x2ed9   :  { %v4115_v49 = vmul.f32 %v5796_v7, %v4107_v1  ;;  %v4108_v23 = vmul.f32 %v6843_v22, %v4092_v10 }
0x2edb   :  { %v4116_v24 = vmul.f32 %v5796_v7, %v4108_v23  ;;  %v4123_v57 = vadd.f32 %v5797_v2, %v4115_v49 }
0x2edd   :  { %v4124_v25 = vadd.f32 %v5797_v2, %v4116_v24 }
0x2edf   :  { %v4125_v27 = vpack.c.bf16 %v4124_v25, %v4123_v57 }
0x2ee1   :  { %6514 = vmatmul.mubr.msk.bf16.vlgmr.msra.gmra.mrb[132].mxu1 %vm133_vm0, %v4125_v27 }
0x2ee2   :  { %6524 = vmatpush3.bf16.xpose.msra.mxu1 %v4260_v28  ;;  %6525 = vmatprep.mubr.msk.bf16.mxu1 %vm6901_vm1, %v6900_v19 }
0x2ee3   :  { %6535 = vmatprep.subr.bf16.mxu1 %v6900_v19 }
0x2fb4   :  { %v4188_v30 = vpop.f32.mrb[132].mxu1 }
0x2fb5   :  { %v4189_v36 = vadd.f32 %v5803_v29, %v4188_v30  ;;  %v6515_v31 = vpop.f32.mrb[133].mxu1 }
0x2fb6   :  { %v4191_v32 = vpop.f32.mrb[134].mxu1 }
0x2fb7   :  { %v7926_v15 = vpack.c.bf16 %v4189_v36, %v4189_v36  ;;  %v4192_v44 = vadd.f32 %v5803_v29, %v4191_v32  ;;  %v6516_v33 = vpop.f32.mrb[135].mxu1 }
0x2fb9   :  { %v7928_v34 = vpack.c.bf16 %v4192_v44, %v4192_v44  ;;  %6520 = vmatmul.mubr.msk.bf16.vlgmr.msra.gmra.mrb[132].mxu0 %vm314_vm2, %v7926_v15 }
0x2fba   :  { %6531 = vmatprep.mubr.msk.bf16.mxu0 %vm6901_vm1, %v6900_v19 }
0x2fbb   :  { %6526 = vmatmul.mubr.msk.bf16.vlgmr.msra.gmra.mrb[136].mxu1 %vm314_vm2, %v7928_v34 }
0x2fbc   :  { %6537 = vmatprep.mubr.msk.bf16.mxu1 %vm6901_vm1, %v6900_v19 }
0x308c   :  { %v4248_v18 = vpop.f32.mrb[132].mxu0 }
0x308d   :  { %v4302_v35 = vmul.f32 0.35355338, %v4248_v18  ;;  %v6521_v6 = vpop.f32.mrb[133].mxu0 }
0x308e   :  { %v4251_v37 = vpop.f32.mrb[134].mxu0  ;;  %v4296_v38 = vpop.f32.mrb[136].mxu1 }
0x308f   :  { %v4304_v40 = vadd.f32 %v7941_v39, %v4302_v35  ;;  %v4303_v41 = vmul.f32 0.35355338, %v4296_v38  ;;  %v6522_v42 = vpop.f32.mrb[135].mxu0  ;;  %v6527_v54 = vpop.f32.mrb[137].mxu1 }
0x3090   :  { %v4299_v45 = vpop.f32.mrb[138].mxu1 }
0x3091   :  { %v4305_v52 = vadd.f32 %v7947_v50, %v4303_v41  ;;  %v6528_v53 = vpop.f32.mrb[139].mxu1  ;;  %v4306_v55 = vsel %vm1629_vm4, %v4304_v40, -inf }
0x3092   :  { %4307 = vmax.xlane.f32.xlu1 %v4306_v55 }
0x3093   :  { %v4309_v59 = vsel %vm1629_vm4, %v4305_v52, -inf }
0x3094   :  { %4310 = vmax.xlane.f32.xlu0 %v4309_v59 }
0x30a3   :  { %4376 = vrot.lane.b32.xlu1 %v7100_v47, %s6913_s13 }
0x30a7   :  { %4425 = vrot.lane.b32.xlu1 %v7102_v48, %s8290_s6 }
0x311f   :  { %v4308_v51 = vpop.xlane.xlu1 %4307 }
0x3120   :  { %v4312_v11 = vsub.f32 %v4304_v40, %v4308_v51 }
0x3121   :  { %v4311_v60 = vpop.xlane.xlu0 %4310 }
0x3122   :  { %v4314_v3 = vmul.f32 1.442695, %v4312_v11  ;;  %v4313_v61 = vsub.f32 %v4305_v52, %v4311_v60 }
0x3123   :  { %v4377_v8 = vpop.permute.xlu1 %4376 }
0x3124   :  { %6844 = vpow2.f32 %v4314_v3  ;;  %v4316_v10 = vmul.f32 1.442695, %v4313_v61  ;;  %6536 = vmatpush3.bf16.msra.mxu1 %v4377_v8 }
0x3125   :  { %6547 = vmatprep.subr.bf16.mxu1 %v6900_v19 }
0x3126   :  { %6846 = vpow2.f32 %v4316_v10 }
0x3127   :  { %v4426_v13 = vpop.permute.xlu1 %4425 }
0x3128   :  { %v4431_v58 = vsel %vm314_vm2, %v4426_v13, 0 }
0x312e   :  { %v6845_v43 = vpop.eup %6844 }
0x312f   :  { %v4318_v5 = vsel %vm1629_vm4, %v6845_v43, 0.0 }
0x3130   :  { %v6847_v63 = vpop.eup %6846  ;;  %4319 = vadd.xlane.f32.xlu0 %v4318_v5 }
0x3131   :  { %v4321_v12 = vsel %vm1629_vm4, %v6847_v63, 0.0 }
0x3132   :  { %4322 = vadd.xlane.f32.xlu1 %v4321_v12 }
0x3143   :  { %4475 = vrot.lane.b32.xlu1 %v7100_v47, %s8290_s6 }
0x3146   :  { %4330 = vrot.lane.b32.xlu0 %v7102_v48, %s6913_s13 }
0x3147   :  { %4473 = vrot.lane.b32.xlu1 %v7928_v34, %s8289_s29 }
0x314a   :  { %4423 = vrot.lane.b32.xlu0 %v7926_v15, %s8289_s29 }
0x31bd   :  { %v4320_v46 = vpop.xlane.xlu0 %4319 }
0x31be   :  { %6848 = vrcp.f32 %v4320_v46 }
0x31bf   :  { %v4323_v14 = vpop.xlane.xlu1 %4322 }
0x31c0   :  { %6850 = vrcp.f32 %v4323_v14 }
0x31c1   :  { %v4331_v0 = vpop.permute.xlu0 %4330 }
0x31c2   :  { %6530 = vmatpush3.bf16.msra.mxu0 %v4331_v0  ;;  %v5809_v0 = vld [vmem:[%s8229_s14 + $0x10] sm:$0xf] }
0x31c3   :  { %6541 = vmatprep.subr.bf16.mxu0 %v6900_v19  ;;  %v4476_v21 = vpop.permute.xlu1 %4475 }
0x31c4   :  { %v4481_v1 = vsel %vm314_vm2, %v4476_v21, 0 }
0x31c5   :  { %v4424_v22 = vpop.permute.xlu0 %4423 }
0x31c7   :  { %v4474_v49 = vpop.permute.xlu1 %4473 }
0x31c8   :  { %v6849_v16 = vpop.eup %6848 }
0x31c9   :  { %v4326_v62 = vmul.f32 %v6849_v16, %v6845_v43 }
0x31ca   :  { %v6851_v17 = vpop.eup %6850 }
0x31cb   :  { %v4327_v20 = vmul.f32 %v6851_v17, %v6847_v63  ;;  %v4328_v4 = vpack.c.bf16 %v4326_v62, %v4326_v62  ;;  %v5810_v63 = vld [vmem:[%s8229_s14 + $0x14] sm:$0xf]  ;;  %v4695_v17 = vsel %vm442_vm3, %v5809_v0, 0 }
0x31cc   :  { %v4648_v46 = vsel %vm442_vm3, %v5810_v63, 0 }
0x31cd   :  { %6532 = vmatmul.mubr.msk.bf16.vlgmr.msra.gmra.mrb[136].mxu0 %vm1629_vm4, %v4328_v4  ;;  %v4329_v7 = vpack.c.bf16 %v4327_v20, %v4327_v20 }
0x31ce   :  { %6542 = vmatpush3.bf16.xpose.msra.mxu0 %v4431_v58  ;;  %6543 = vmatprep.mubr.msk.bf16.mxu0 %vm6901_vm1, %v6900_v19 }
0x31cf   :  { %6538 = vmatmul.mubr.msk.bf16.vlgmr.msra.gmra.mrb[140].mxu1 %vm1629_vm4, %v4329_v7  ;;  %6553 = vmatprep.subr.bf16.mxu0 %v6900_v19 }
0x31d0   :  { %6548 = vmatpush3.bf16.xpose.msra.mxu1 %v4481_v1  ;;  %6549 = vmatprep.mubr.msk.bf16.mxu1 %vm6901_vm1, %v6900_v19 }
0x31d1   :  { %6559 = vmatprep.subr.bf16.mxu1 %v6900_v19 }
0x31d5   :  { %6544 = vmatmul.mubr.msk.bf16.vlgmr.msra.gmra.mrb[140].mxu0 %vm314_vm2, %v4424_v22 }
0x31d6   :  { %6555 = vmatprep.mubr.msk.bf16.mxu0 %vm6901_vm1, %v6900_v19 }
0x31d7   :  { %6550 = vmatmul.mubr.msk.bf16.vlgmr.msra.gmra.mrb[144].mxu1 %vm314_vm2, %v4474_v49 }
0x31d8   :  { %6561 = vmatprep.mubr.msk.bf16.mxu1 %vm6901_vm1, %v6900_v19 }
0x32a0   :  { %v7982_v23 = vpop.f32.mrb[136].mxu0 }
0x32a1   :  { %v6533_v2 = vpop.f32.mrb[137].mxu0 }
0x32a2   :  { %v4373_v24 = vpop.f32.mrb[138].mxu0  ;;  %v7984_v57 = vpop.f32.mrb[140].mxu1 }
0x32a3   :  { %v4422_v25 = vpack.c.bf16 %v7984_v57, %v7982_v23  ;;  %v6534_v26 = vpop.f32.mrb[139].mxu0  ;;  %v6539_v27 = vpop.f32.mrb[141].mxu1 }
0x32a4   :  { %v4419_v28 = vpop.f32.mrb[142].mxu1 }
0x32a5   :  { %v6540_v29 = vpop.f32.mrb[143].mxu1 }
0x32a8   :  { %v4467_v30 = vpop.f32.mrb[140].mxu0 }
0x32a9   :  { %v4523_v36 = vmul.f32 0.35355338, %v4467_v30  ;;  %v6545_v31 = vpop.f32.mrb[141].mxu0 }
0x32aa   :  { %v4470_v32 = vpop.f32.mrb[142].mxu0  ;;  %v4517_v44 = vpop.f32.mrb[144].mxu1 }
0x32ab   :  { %v4525_v33 = vadd.f32 %v7941_v39, %v4523_v36  ;;  %v4524_v18 = vmul.f32 0.35355338, %v4517_v44  ;;  %v6546_v35 = vpop.f32.mrb[143].mxu0  ;;  %v6551_v6 = vpop.f32.mrb[145].mxu1 }
0x32ac   :  { %v4520_v37 = vpop.f32.mrb[146].mxu1 }
0x32ad   :  { %v4526_v38 = vadd.f32 %v7947_v50, %v4524_v18  ;;  %v6552_v40 = vpop.f32.mrb[147].mxu1  ;;  %v4527_v41 = vsel %vm1629_vm4, %v4525_v33, -inf }
0x32ae   :  { %4528 = vmax.xlane.f32.xlu0 %v4527_v41 }
0x32af   :  { %v4530_v42 = vsel %vm1629_vm4, %v4526_v38, -inf }
0x32b0   :  { %4531 = vmax.xlane.f32.xlu1 %v4530_v42 }
0x32c1   :  { %4597 = vrot.lane.b32.xlu1 %v7100_v47, %s6914_s2 }
0x32c5   :  { %4740 = vrot.lane.b32.xlu1 %v7102_v48, %s8293_s30 }
0x32c9   :  { %4790 = vrot.lane.b32.xlu1 %v7100_v47, %s8293_s30 }
0x32cd   :  { %4788 = vrot.lane.b32.xlu1 %v7928_v34, %s8292_s5 }
0x333b   :  { %v4529_v54 = vpop.xlane.xlu0 %4528 }
0x333c   :  { %v4533_v45 = vsub.f32 %v4525_v33, %v4529_v54 }
0x333d   :  { %v4532_v52 = vpop.xlane.xlu1 %4531 }
0x333e   :  { %v4535_v53 = vmul.f32 1.442695, %v4533_v45  ;;  %v4534_v55 = vsub.f32 %v4526_v38, %v4532_v52 }
0x3340   :  { %6852 = vpow2.f32 %v4535_v53  ;;  %v4537_v59 = vmul.f32 1.442695, %v4534_v55 }
0x3341   :  { %v4598_v51 = vpop.permute.xlu1 %4597 }
0x3342   :  { %6854 = vpow2.f32 %v4537_v59  ;;  %6560 = vmatpush3.bf16.msra.mxu1 %v4598_v51 }
0x3343   :  { %6571 = vmatprep.subr.bf16.mxu1 %v6900_v19 }
0x3345   :  { %v4741_v20 = vpop.permute.xlu1 %4740 }
0x3349   :  { %v4791_v4 = vpop.permute.xlu1 %4790 }
0x334a   :  { %v6853_v11 = vpop.eup %6852  ;;  %v4796_v21 = vsel %vm314_vm2, %v4791_v4, 0 }
0x334b   :  { %v4539_v60 = vsel %vm1629_vm4, %v6853_v11, 0.0 }
0x334c   :  { %v6855_v3 = vpop.eup %6854  ;;  %4540 = vadd.xlane.f32.xlu0 %v4539_v60 }
0x334d   :  { %v4542_v61 = vsel %vm1629_vm4, %v6855_v3, 0.0  ;;  %v4789_v58 = vpop.permute.xlu1 %4788 }
0x3350   :  { %4543 = vadd.xlane.f32.xlu0 %v4542_v61 }
0x3366   :  { %4551 = vrot.lane.b32.xlu0 %v7102_v48, %s6914_s2 }
0x336a   :  { %4738 = vrot.lane.b32.xlu0 %v7926_v15, %s8292_s5 }
0x33d9   :  { %v4541_v8 = vpop.xlane.xlu0 %4540 }
0x33da   :  { %6856 = vrcp.f32 %v4541_v8 }
0x33dd   :  { %v4544_v10 = vpop.xlane.xlu0 %4543 }
0x33de   :  { %6858 = vrcp.f32 %v4544_v10 }
0x33e1   :  { %v4552_v43 = vpop.permute.xlu0 %4551 }
0x33e2   :  { %6554 = vmatpush3.bf16.msra.mxu0 %v4552_v43 }
0x33e3   :  { %6565 = vmatprep.subr.bf16.mxu0 %v6900_v19 }
0x33e4   :  { %v6857_v5 = vpop.eup %6856 }
0x33e5   :  { %v4547_v12 = vmul.f32 %v6857_v5, %v6853_v11  ;;  %v4739_v29 = vpop.permute.xlu0 %4738 }
0x33e7   :  { %v4549_v13 = vpack.c.bf16 %v4547_v12, %v4547_v12 }
0x33e8   :  { %v6859_v14 = vpop.eup %6858 }
0x33e9   :  { %v4548_v16 = vmul.f32 %v6859_v14, %v6855_v3  ;;  %6556 = vmatmul.mubr.msk.bf16.vlgmr.msra.gmra.mrb[144].mxu0 %vm1629_vm4, %v4549_v13 }
0x33ea   :  { %6566 = vmatpush3.bf16.msra.mxu0 %v4648_v46  ;;  %6567 = vmatprep.mubr.msk.bf16.mxu0 %vm6901_vm1, %v6900_v19 }
0x33eb   :  { %v4550_v62 = vpack.c.bf16 %v4548_v16, %v4548_v16  ;;  %6577 = vmatprep.subr.bf16.mxu0 %v6900_v19 }
0x33ed   :  { %6562 = vmatmul.mubr.msk.bf16.vlgmr.msra.gmra.mrb[148].mxu1 %vm1629_vm4, %v4550_v62 }
0x33ee   :  { %6572 = vmatpush3.bf16.msra.mxu1 %v4695_v17  ;;  %6573 = vmatprep.mubr.msk.bf16.mxu1 %vm6901_vm1, %v6900_v19 }
0x33ef   :  { %6583 = vmatprep.subr.bf16.mxu1 %v6900_v19 }
0x33f5   :  { %6574 = vmatmul.mubr.msk.bf16.vlgmr.msra.gmra.mrb[152].mxu1 %vm314_vm2, %v4422_v25  ;;  %v4746_v25 = vsel %vm314_vm2, %v4741_v20, 0 }
0x33f6   :  { %6585 = vmatprep.mubr.msk.bf16.mxu1 %vm6901_vm1, %v6900_v19 }
0x33f7   :  { %6584 = vmatpush3.bf16.xpose.msra.mxu1 %v4796_v21 }
0x33f8   :  { %6595 = vmatprep.subr.bf16.mxu1 %v6900_v19 }
0x33fe   :  { %6586 = vmatmul.mubr.msk.bf16.vlgmr.msra.gmra.mrb[156].mxu1 %vm314_vm2, %v4789_v58 }
0x33ff   :  { %6597 = vmatprep.mubr.msk.bf16.mxu1 %vm6901_vm1, %v6900_v19 }
0x34bc   :  { %v4591_v7 = vpop.f32.mrb[144].mxu0 }
0x34bd   :  { %v6557_v1 = vpop.f32.mrb[145].mxu0 }
0x34be   :  { %v4594_v22 = vpop.f32.mrb[146].mxu0 }
0x34bf   :  { %v6558_v49 = vpop.f32.mrb[147].mxu0 }
0x34c0   :  { %v4637_v23 = vpop.f32.mrb[148].mxu1 }
0x34c1   :  { %v4643_v2 = vpack.c.bf16 %v4637_v23, %v4591_v7  ;;  %v6563_v24 = vpop.f32.mrb[149].mxu1 }
0x34c2   :  { %v4640_v57 = vpop.f32.mrb[150].mxu1 }
0x34c3   :  { %v6564_v26 = vpop.f32.mrb[151].mxu1  ;;  %6568 = vmatmul.mubr.msk.bf16.vlgmr.msra.gmra.mrb[148].mxu0 %vm314_vm2, %v4643_v2  ;;  %v5811_v2 = vld [vmem:[%s8229_s14 + $0x18] sm:$0xf] }
0x34c4   :  { %6578 = vmatpush3.bf16.xpose.msra.mxu0 %v4746_v25  ;;  %6579 = vmatprep.mubr.msk.bf16.mxu0 %vm6901_vm1, %v6900_v19  ;;  %v4963_v24 = vsel %vm442_vm3, %v5811_v2, 0 }
0x34c5   :  { %6589 = vmatprep.subr.bf16.mxu0 %v6900_v19 }
0x34c8   :  { %v4731_v27 = vpop.f32.mrb[152].mxu1 }
0x34c9   :  { %v6575_v28 = vpop.f32.mrb[153].mxu1 }
0x34ca   :  { %v4734_v30 = vpop.f32.mrb[154].mxu1 }
0x34cb   :  { %v6576_v36 = vpop.f32.mrb[155].mxu1  ;;  %6580 = vmatmul.mubr.msk.bf16.vlgmr.msra.gmra.mrb[152].mxu0 %vm314_vm2, %v4739_v29 }
0x34cc   :  { %6591 = vmatprep.mubr.msk.bf16.mxu0 %vm6901_vm1, %v6900_v19 }
0x34d1   :  { %v4832_v31 = vpop.f32.mrb[156].mxu1 }
0x34d2   :  { %v4839_v32 = vmul.f32 0.35355338, %v4832_v31  ;;  %v6587_v44 = vpop.f32.mrb[157].mxu1 }
0x34d3   :  { %v4835_v33 = vpop.f32.mrb[158].mxu1 }
0x34d4   :  { %v4841_v18 = vadd.f32 %v7947_v50, %v4839_v32  ;;  %v6588_v35 = vpop.f32.mrb[159].mxu1 }
0x34d6   :  { %v4845_v6 = vsel %vm1629_vm4, %v4841_v18, -inf }
0x34d7   :  { %4846 = vmax.xlane.f32.xlu1 %v4845_v6 }
0x34e8   :  { %4912 = vrot.lane.b32.xlu1 %v7100_v47, %s6915_s25 }
0x34ec   :  { %5010 = vrot.lane.b32.xlu1 %v7102_v48, %s8295_s27 }
0x34f0   :  { %5060 = vrot.lane.b32.xlu1 %v7100_v47, %s8295_s27 }
0x34f4   :  { %5058 = vrot.lane.b32.xlu1 %v7928_v34, %s8294_s4 }
0x3564   :  { %v4847_v37 = vpop.xlane.xlu1 %4846 }
0x3565   :  { %v4849_v40 = vsub.f32 %v4841_v18, %v4847_v37 }
0x3567   :  { %v4852_v41 = vmul.f32 1.442695, %v4849_v40 }
0x3568   :  { %v4913_v38 = vpop.permute.xlu1 %4912 }
0x3569   :  { %6596 = vmatpush3.bf16.msra.mxu1 %v4913_v38  ;;  %6860 = vpow2.f32 %v4852_v41 }
0x356a   :  { %6607 = vmatprep.subr.bf16.mxu1 %v6900_v19 }
0x356c   :  { %v5011_v16 = vpop.permute.xlu1 %5010 }
0x356d   :  { %v5016_v17 = vsel %vm314_vm2, %v5011_v16, 0 }
0x3570   :  { %v5061_v36 = vpop.permute.xlu1 %5060 }
0x3571   :  { %v5066_v18 = vsel %vm314_vm2, %v5061_v36, 0 }
0x3573   :  { %v6861_v8 = vpop.eup %6860 }
0x3574   :  { %v4857_v10 = vsel %vm1629_vm4, %v6861_v8, 0.0 }
0x3596   :  { %v4684_v42 = vpop.f32.mrb[148].mxu0 }
0x3597   :  { %v8052_v54 = vadd.f32 %v4731_v27, %v4684_v42  ;;  %v6569_v45 = vpop.f32.mrb[149].mxu0 }
0x3598   :  { %v4687_v52 = vpop.f32.mrb[150].mxu0 }
0x3599   :  { %v8054_v53 = vadd.f32 %v4734_v30, %v4687_v52  ;;  %v6570_v55 = vpop.f32.mrb[151].mxu0 }
0x359e   :  { %v4782_v59 = vpop.f32.mrb[152].mxu0 }
0x359f   :  { %v4838_v51 = vmul.f32 0.35355338, %v4782_v59  ;;  %v6581_v11 = vpop.f32.mrb[153].mxu0 }
0x35a0   :  { %v4785_v34 = vpop.f32.mrb[154].mxu0 }
0x35a1   :  { %v4840_v60 = vadd.f32 %v7941_v39, %v4838_v51  ;;  %v6582_v3 = vpop.f32.mrb[155].mxu0 }
0x35a3   :  { %v4842_v61 = vsel %vm1629_vm4, %v4840_v60, -inf }
0x35a4   :  { %4843 = vmax.xlane.f32.xlu0 %v4842_v61 }
0x35a8   :  { %4858 = vadd.xlane.f32.xlu0 %v4857_v10 }
0x3631   :  { %v4844_v43 = vpop.xlane.xlu0 %4843 }
0x3632   :  { %v4848_v5 = vsub.f32 %v4840_v60, %v4844_v43 }
0x3634   :  { %v4850_v63 = vmul.f32 1.442695, %v4848_v5 }
0x3635   :  { %v4859_v12 = vpop.xlane.xlu0 %4858 }
0x3636   :  { %6862 = vpow2.f32 %v4850_v63 }
0x3637   :  { %6864 = vrcp.f32 %v4859_v12 }
0x3640   :  { %v6863_v13 = vpop.eup %6862 }
0x3641   :  { %v6865_v46 = vpop.eup %6864  ;;  %v4854_v14 = vsel %vm1629_vm4, %v6863_v13, 0.0 }
0x3642   :  { %v4863_v0 = vmul.f32 %v6865_v46, %v6861_v8  ;;  %4855 = vadd.xlane.f32.xlu0 %v4854_v14 }
0x3644   :  { %v4865_v62 = vpack.c.bf16 %v4863_v0, %v4863_v0 }
0x3646   :  { %6598 = vmatmul.mubr.msk.bf16.vlgmr.msra.gmra.mrb[160].mxu1 %vm1629_vm4, %v4865_v62 }
0x3647   :  { %6608 = vmatpush3.bf16.xpose.msra.mxu1 %v5016_v17  ;;  %6609 = vmatprep.mubr.msk.bf16.mxu1 %vm6901_vm1, %v6900_v19 }
0x3648   :  { %6619 = vmatprep.subr.bf16.mxu1 %v6900_v19 }
0x3658   :  { %4866 = vrot.lane.b32.xlu0 %v7102_v48, %s6915_s25 }
0x365c   :  { %5008 = vrot.lane.b32.xlu0 %v7926_v15, %s8294_s4 }
0x36cf   :  { %v4856_v20 = vpop.xlane.xlu0 %4855 }
0x36d0   :  { %6866 = vrcp.f32 %v4856_v20 }
0x36d3   :  { %v4867_v4 = vpop.permute.xlu0 %4866 }
0x36d4   :  { %6590 = vmatpush3.bf16.msra.mxu0 %v4867_v4 }
0x36d5   :  { %6601 = vmatprep.subr.bf16.mxu0 %v6900_v19 }
0x36d7   :  { %v5009_v21 = vpop.permute.xlu0 %5008 }
0x36d8   :  { %6610 = vmatmul.mubr.msk.bf16.vlgmr.msra.gmra.mrb[164].mxu1 %vm314_vm2, %v5009_v21 }
0x36d9   :  { %6621 = vmatprep.mubr.msk.bf16.mxu1 %vm6901_vm1, %v6900_v19 }
0x36da   :  { %v6867_v58 = vpop.eup %6866 }
0x36db   :  { %v4862_v7 = vmul.f32 %v6867_v58, %v6863_v13 }
0x36dd   :  { %v4864_v1 = vpack.c.bf16 %v4862_v7, %v4862_v7 }
0x36df   :  { %6592 = vmatmul.mubr.msk.bf16.vlgmr.msra.gmra.mrb[156].mxu0 %vm1629_vm4, %v4864_v1 }
0x36e0   :  { %6603 = vmatprep.mubr.msk.bf16.mxu0 %vm6901_vm1, %v6900_v19  ;;  %6602 = vmatpush3.bf16.msra.mxu0 %v4963_v24 }
0x36e1   :  { %6613 = vmatprep.subr.bf16.mxu0 %v6900_v19 }
0x3719   :  { %v4952_v15 = vpop.f32.mrb[160].mxu1 }
0x371a   :  { %v6599_v22 = vpop.f32.mrb[161].mxu1 }
0x371b   :  { %v4955_v49 = vpop.f32.mrb[162].mxu1 }
0x371c   :  { %v6600_v23 = vpop.f32.mrb[163].mxu1 }
0x37ab   :  { %v5052_v57 = vpop.f32.mrb[164].mxu1 }
0x37ac   :  { %v5108_v25 = vmul.f32 0.35355338, %v5052_v57  ;;  %v6611_v26 = vpop.f32.mrb[165].mxu1 }
0x37ad   :  { %v5055_v27 = vpop.f32.mrb[166].mxu1 }
0x37ae   :  { %v5110_v28 = vadd.f32 %v7941_v39, %v5108_v25  ;;  %v6612_v29 = vpop.f32.mrb[167].mxu1  ;;  %v5059_v39 = vpop.permute.xlu1 %5058  ;;  %v5834_v25 = vld [vmem:[%s8230_s15 + $0x1] ss:$0 sm:$0xff] }
0x37b0   :  { %v5112_v30 = vsel %vm1629_vm4, %v5110_v28, -inf }
0x37b1   :  { %5113 = vmax.xlane.f32.xlu0 %v5112_v30 }
0x37b2   :  { %v4906_v31 = vpop.f32.mrb[156].mxu0 }
0x37b3   :  { %v4958_v32 = vpack.c.bf16 %v4952_v15, %v4906_v31  ;;  %v6593_v44 = vpop.f32.mrb[157].mxu0 }
0x37b4   :  { %v4909_v33 = vpop.f32.mrb[158].mxu0 }
0x37b5   :  { %v6594_v35 = vpop.f32.mrb[159].mxu0  ;;  %6604 = vmatmul.mubr.msk.bf16.vlgmr.msra.gmra.mrb[160].mxu0 %vm314_vm2, %v4958_v32 }
0x37b6   :  { %6614 = vmatpush3.bf16.xpose.msra.mxu0 %v5066_v18  ;;  %6615 = vmatprep.mubr.msk.bf16.mxu0 %vm6901_vm1, %v6900_v19 }
0x37b7   :  { %6625 = vmatprep.subr.bf16.mxu0 %v6900_v19 }
0x37bd   :  { %6616 = vmatmul.mubr.msk.bf16.vlgmr.msra.gmra.mrb[164].mxu0 %vm314_vm2, %v5059_v39 }
0x37be   :  { %6627 = vmatprep.mubr.msk.bf16.mxu0 %vm6901_vm1, %v6900_v19 }
0x383e   :  { %v5114_v6 = vpop.xlane.xlu0 %5113 }
0x383f   :  { %v5118_v37 = vsub.f32 %v5110_v28, %v5114_v6 }
0x3841   :  { %v5120_v38 = vmul.f32 1.442695, %v5118_v37 }
0x3843   :  { %6868 = vpow2.f32 %v5120_v38 }
0x384d   :  { %v6869_v40 = vpop.eup %6868 }
0x384e   :  { %v5124_v41 = vsel %vm1629_vm4, %v6869_v40, 0.0 }
0x384f   :  { %5125 = vadd.xlane.f32.xlu0 %v5124_v41  ;;  %v6712_v41 = vld [vmem:[%s8231_s16 + $0x10] sm:$0xff]  }
0x3888   :  { %v4999_v42 = vpop.f32.mrb[160].mxu0 }
0x3889   :  { %v5006_v45 = vadd.f32 %v4999_v42, %v8052_v54  ;;  %v6605_v52 = vpop.f32.mrb[161].mxu0  ;;  %v6713_v42 = vld [vmem:[%s8231_s16 + $0x18] sm:$0xff]  }
0x388a   :  { %v5002_v55 = vpop.f32.mrb[162].mxu0 }
0x388b   :  { %v5007_v59 = vadd.f32 %v5002_v55, %v8054_v53  ;;  %v6606_v51 = vpop.f32.mrb[163].mxu0 }
0x3890   :  { %v5102_v11 = vpop.f32.mrb[164].mxu0 }
0x3891   :  { %v5109_v34 = vmul.f32 0.35355338, %v5102_v11  ;;  %v6617_v60 = vpop.f32.mrb[165].mxu0 }
0x3892   :  { %v5105_v3 = vpop.f32.mrb[166].mxu0  ;;  %v5835_v60 = vld [vmem:[%s8281_s0 + $0x5] ss:$0 sm:$0xff] }
0x3893   :  { %v5111_v61 = vadd.f32 %v7947_v50, %v5109_v34  ;;  %v6618_v8 = vpop.f32.mrb[167].mxu0 }
0x3895   :  { %v5115_v10 = vsel %vm1629_vm4, %v5111_v61, -inf }
0x3896   :  { %5116 = vmax.xlane.f32.xlu1 %v5115_v10 }
0x38a7   :  { %5182 = vrot.lane.b32.xlu1 %v7100_v47, %s6916_s10 }
0x38dc   :  { %v5126_v50 = vpop.xlane.xlu0 %5125 }
0x3923   :  { %v5117_v43 = vpop.xlane.xlu1 %5116 }
0x3924   :  { %v5119_v54 = vsub.f32 %v5111_v61, %v5117_v43  ;;  %v5836_v43 = vld [vmem:[%s8282_s3 + $0x5] ss:$0 sm:$0xff] }
0x3926   :  { %v5122_v5 = vmul.f32 1.442695, %v5119_v54 }
0x3927   :  { %v5183_v63 = vpop.permute.xlu1 %5182 }
0x3928   :  { %6870 = vpow2.f32 %v5122_v5  ;;  %6626 = vmatpush3.bf16.msra.mxu0 %v5183_v63 }
0x3929   :  { %6637 = vmatprep.subr.bf16.mxu0 %v6900_v19  ;;  %6872 = vrcp.f32 %v5126_v50  ;;  %v6715_v50 = vld [vmem:[%s8232_s18 + $0x48] sm:$0xff]  }
0x3932   :  { %v6871_v53 = vpop.eup %6870 }
0x3933   :  { %v5127_v12 = vsel %vm1629_vm4, %v6871_v53, 0.0  ;;  %v6873_v13 = vpop.eup %6872 }
0x3934   :  { %5128 = vadd.xlane.f32.xlu0 %v5127_v12  ;;  %v5132_v47 = vmul.f32 %v6873_v13, %v6869_v40  ;;  %v6714_v12 = vld [vmem:[%s8232_s18 + $0x40] sm:$0xff]   ;;  %v6716_v13 = vld [vmem:[%s8232_s18 + $0x50] sm:$0xff]  }
0x3936   :  { %v5134_v0 = vpack.c.bf16 %v5132_v47, %v5132_v47  ;;  %v6718_v47 = vld [vmem:[%s8232_s18 + $0x60] sm:$0xff]  }
0x394a   :  { %5136 = vrot.lane.b32.xlu0 %v7102_v48, %s6916_s10  ;;  %v5812_v48 = vld [vmem:[%s8229_s14 + $0x1c] sm:$0xf] }
0x394b   :  { %v5233_v20 = vsel %vm442_vm3, %v5812_v48, 0 }
0x39c1   :  { %v5129_v46 = vpop.xlane.xlu0 %5128 }
0x39c2   :  { %6874 = vrcp.f32 %v5129_v46  ;;  %v6717_v46 = vld [vmem:[%s8232_s18 + $0x58] sm:$0xff]  }
0x39c5   :  { %v5137_v14 = vpop.permute.xlu0 %5136 }
0x39c6   :  { %6620 = vmatpush3.bf16.msra.mxu1 %v5137_v14  ;;  %v6719_v14 = vld [vmem:[%s8232_s18 + $0x68] sm:$0xff]  }
0x39c7   :  { %6631 = vmatprep.subr.bf16.mxu1 %v6900_v19 }
0x39c9   :  { %6622 = vmatmul.mubr.msk.bf16.vlgmr.msra.gmra.mrb[168].mxu1 %vm1629_vm4, %v5134_v0  ;;  %v6720_v0 = vld [vmem:[%s8232_s18 + $0x70] sm:$0xff]  }
0x39ca   :  { %6633 = vmatprep.mubr.msk.bf16.mxu1 %vm6901_vm1, %v6900_v19  ;;  %6632 = vmatpush3.bf16.msra.mxu1 %v5233_v20 }
0x39cb   :  { %6645 = vmatprep.subr.bf16.mxu1 %v6900_v19 }
0x39cc   :  { %v6875_v16 = vpop.eup %6874 }
0x39cd   :  { %v5133_v62 = vmul.f32 %v6875_v16, %v6871_v53  ;;  %v6721_v16 = vld [vmem:[%s8232_s18 + $0x78] sm:$0xff]  }
0x39cf   :  { %v5135_v17 = vpack.c.bf16 %v5133_v62, %v5133_v62  ;;  %v5842_v62 = vld [vmem:[%s8233_s17 + $0x1] ss:$0 sm:$0xff] }
0x39d1   :  { %6628 = vmatmul.mubr.msk.bf16.vlgmr.msra.gmra.mrb[168].mxu0 %vm1629_vm4, %v5135_v17 }
0x39d2   :  { %6641 = vmatprep.mubr.msk.bf16.mxu0 %vm6901_vm1, %v6900_v19  ;;  %6638 = vmatpush3.bf16.msra.mxu0 %v6712_v41 }
0x39d3   :  { %6639 = vmatprep.subr.bf16.mxu0 %v6900_v19 }
0x39d6   :  { %6640 = vmatpush3.bf16.msra.mxu0 %v6713_v42 }
0x39d7   :  { %6665 = vmatprep.subr.bf16.mxu0 %v6900_v19 }
0x3a9c   :  { %v5176_v4 = vpop.f32.mrb[168].mxu1 }
0x3a9d   :  { %v6623_v21 = vpop.f32.mrb[169].mxu1 }
0x3a9e   :  { %v5179_v58 = vpop.f32.mrb[170].mxu1 }
0x3a9f   :  { %v6624_v7 = vpop.f32.mrb[171].mxu1 }
0x3aa4   :  { %v5222_v1 = vpop.f32.mrb[168].mxu0 }
0x3aa5   :  { %v5228_v15 = vpack.c.bf16 %v5222_v1, %v5176_v4  ;;  %v6629_v22 = vpop.f32.mrb[169].mxu0 }
0x3aa6   :  { %v5225_v49 = vpop.f32.mrb[170].mxu0 }
0x3aa7   :  { %v6630_v23 = vpop.f32.mrb[171].mxu0  ;;  %6634 = vmatmul.mubr.msk.bf16.vlgmr.msra.gmra.mrb[172].mxu1 %vm314_vm2, %v5228_v15 }
0x3aa8   :  { %6661 = vmatprep.mubr.msk.bf16.mxu1 %vm6901_vm1, %v6900_v19  ;;  %6646 = vmatpush3.bf16.msra.mxu1 %v6714_v12 }
0x3aa9   :  { %6647 = vmatprep.subr.bf16.mxu1 %v6900_v19 }
0x3aac   :  { %6648 = vmatpush3.bf16.msra.mxu1 %v6715_v50  ;;  %v5872_v50 = vld [vmem:[%s8236_s20] ss:$0 sm:$0xff] }
0x3aad   :  { %6649 = vmatprep.subr.bf16.mxu1 %v6900_v19 }
0x3ab0   :  { %6650 = vmatpush3.bf16.msra.mxu1 %v6716_v13 }
0x3ab1   :  { %6651 = vmatprep.subr.bf16.mxu1 %v6900_v19 }
0x3ab4   :  { %6652 = vmatpush3.bf16.msra.mxu1 %v6717_v46 }
0x3ab5   :  { %6653 = vmatprep.subr.bf16.mxu1 %v6900_v19 }
0x3ab8   :  { %6654 = vmatpush3.bf16.msra.mxu1 %v6718_v47 }
0x3ab9   :  { %6655 = vmatprep.subr.bf16.mxu1 %v6900_v19 }
0x3abc   :  { %6656 = vmatpush3.bf16.msra.mxu1 %v6719_v14 }
0x3abd   :  { %6657 = vmatprep.subr.bf16.mxu1 %v6900_v19 }
0x3ac0   :  { %6658 = vmatpush3.bf16.msra.mxu1 %v6720_v0 }
0x3ac1   :  { %6659 = vmatprep.subr.bf16.mxu1 %v6900_v19 }
0x3ac4   :  { %6660 = vmatpush3.bf16.msra.mxu1 %v6721_v16 }
0x3b7a   :  { %v5269_v2 = vpop.f32.mrb[172].mxu1 }
0x3b7b   :  { %v5276_v24 = vadd.f32 %v5269_v2, %v5006_v45  ;;  %v6635_v57 = vpop.f32.mrb[173].mxu1 }
0x3b7c   :  { %v5272_v26 = vpop.f32.mrb[174].mxu1 }
0x3b7d   :  { %v5278_v27 = vadd.f32 %v5276_v24, %v7885_v9  ;;  %v5277_v28 = vadd.f32 %v5272_v26, %v5007_v59  ;;  %v6636_v29 = vpop.f32.mrb[175].mxu1 }
0x3b7f   :  { %v8119_v30 = vadd.f32 %v5834_v25, %v5278_v27  ;;  %v5279_v36 = vadd.f32 %v5277_v28, %v7888_v56 }
0x3b81   :  { %v8122_v31 = vadd.f32 %v5834_v25, %v5279_v36  ;;  %v5290_v32 = vsel %vm133_vm0, %v8119_v30, 0.0 }
0x3b82   :  { %5291 = vadd.xlane.f32.xlu1 %v5290_v32 }
0x3b83   :  { %v5293_v44 = vsel %vm133_vm0, %v8122_v31, 0.0 }
0x3b84   :  { %5294 = vadd.xlane.f32.xlu0 %v5293_v44 }
0x3c0f   :  { %v5292_v33 = vpop.xlane.xlu1 %5291 }
0x3c10   :  { %v5296_v18 = vmul.f32 0.03125, %v5292_v33 }
0x3c11   :  { %v5295_v35 = vpop.xlane.xlu0 %5294 }
0x3c12   :  { %v5298_v9 = vsub.f32 %v8119_v30, %v5296_v18  ;;  %v5297_v39 = vmul.f32 0.03125, %v5295_v35 }
0x3c14   :  { %v5299_v6 = vsub.f32 %v8122_v31, %v5297_v39  ;;  %v5300_v37 = vmul.f32 %v5298_v9, %v5298_v9 }
0x3c16   :  { %v5302_v56 = vsel %vm133_vm0, %v5300_v37, 0.0  ;;  %v5301_v38 = vmul.f32 %v5299_v6, %v5299_v6 }
0x3c17   :  { %5303 = vadd.xlane.f32.xlu0 %v5302_v56 }
0x3c18   :  { %v5305_v40 = vsel %vm133_vm0, %v5301_v38, 0.0 }
0x3c19   :  { %5306 = vadd.xlane.f32.xlu1 %v5305_v40 }
0x3ca4   :  { %v5304_v45 = vpop.xlane.xlu0 %5303 }
0x3ca5   :  { %v5308_v52 = vmul.f32 0.03125, %v5304_v45 }
0x3ca6   :  { %v5307_v55 = vpop.xlane.xlu1 %5306 }
0x3ca7   :  { %v5310_v59 = vadd.f32 1e-06, %v5308_v52  ;;  %v5309_v51 = vmul.f32 0.03125, %v5307_v55 }
0x3ca9   :  { %6876 = vrsqrt.f32 %v5310_v59  ;;  %v5311_v11 = vadd.f32 1e-06, %v5309_v51 }
0x3cab   :  { %6878 = vrsqrt.f32 %v5311_v11 }
0x3cb3   :  { %v6877_v34 = vpop.eup %6876 }
0x3cb4   :  { %v5314_v3 = vmul.f32 %v6877_v34, %v5298_v9  ;;  %v5871_v9 = vld [vmem:[%s8234_s19 + $0x1] ss:$0 sm:$0xff] }
0x3cb5   :  { %v6879_v61 = vpop.eup %6878 }
0x3cb6   :  { %v5322_v8 = vmul.f32 %v5835_v60, %v5314_v3  ;;  %v5315_v10 = vmul.f32 %v6879_v61, %v5299_v6  ;;  %v6722_v61 = vld [vmem:[%s8235_s22] sm:$0xff]  }
0x3cb8   :  { %v5323_v54 = vmul.f32 %v5835_v60, %v5315_v10  ;;  %v5330_v5 = vadd.f32 %v5836_v43, %v5322_v8  ;;  %v6723_v8 = vld [vmem:[%s8235_s22 + $0x8] sm:$0xff]  }
0x3cba   :  { %v5331_v63 = vadd.f32 %v5836_v43, %v5323_v54 }
0x3cbc   :  { %v5332_v53 = vpack.c.bf16 %v5331_v63, %v5330_v5 }
0x3cbe   :  { %6642 = vmatmul.mubr.msk.bf16.vlgmr.msra.gmra.mrb[172].mxu0 %vm133_vm0, %v5332_v53 }
0x3cbf   :  { %6669 = vmatprep.mubr.msk.bf16.mxu0 %vm6901_vm1, %v6900_v19  ;;  %6666 = vmatpush3.bf16.msra.mxu0 %v6722_v61 }
0x3cc0   :  { %6667 = vmatprep.subr.bf16.mxu0 %v6900_v19  ;;  %v5873_v19 = vld [vmem:[%s8237_s21] ss:$0 sm:$0xff] }
0x3cc3   :  { %6668 = vmatpush3.bf16.msra.mxu0 %v6723_v8 }
0x3d91   :  { %v5395_v17 = vpop.f32.mrb[172].mxu0 }
0x3d92   :  { %v5396_v48 = vadd.f32 %v5842_v62, %v5395_v17  ;;  %v6643_v20 = vpop.f32.mrb[173].mxu0 }
0x3d93   :  { %v5398_v4 = vpop.f32.mrb[174].mxu0 }
0x3d94   :  { %v5404_v21 = vmul.f32 0.044715, %v5396_v48  ;;  %v5399_v58 = vadd.f32 %v5842_v62, %v5398_v4  ;;  %v6644_v7 = vpop.f32.mrb[175].mxu0  ;;  %v5402_v29 = vmul.f32 0.5, %v5396_v48 }
0x3d96   :  { %v5406_v1 = vmul.f32 %v5404_v21, %v5396_v48  ;;  %v5405_v15 = vmul.f32 0.044715, %v5399_v58  ;;  %v5403_v36 = vmul.f32 0.5, %v5399_v58 }
0x3d98   :  { %v5408_v22 = vmul.f32 %v5406_v1, %v5396_v48  ;;  %v5407_v49 = vmul.f32 %v5405_v15, %v5399_v58 }
0x3d9a   :  { %v5410_v23 = vadd.f32 %v5408_v22, %v5396_v48  ;;  %v5409_v2 = vmul.f32 %v5407_v49, %v5399_v58  ;;  %v5874_v48 = vld [vmem:[%s8238_s23] ss:$0 sm:$0xff] }
0x3d9c   :  { %v5412_v24 = vmul.f32 0.7978846, %v5410_v23  ;;  %v5411_v57 = vadd.f32 %v5409_v2, %v5399_v58 }
0x3d9e   :  { %6880 = vtanh.f32 %v5412_v24  ;;  %v5413_v25 = vmul.f32 0.7978846, %v5411_v57 }
0x3da0   :  { %6882 = vtanh.f32 %v5413_v25 }
0x3da8   :  { %v6881_v26 = vpop.eup %6880 }
0x3da9   :  { %v5416_v27 = vadd.f32 1.0, %v6881_v26 }
0x3daa   :  { %v6883_v28 = vpop.eup %6882 }
0x3dab   :  { %v5417_v32 = vadd.f32 1.0, %v6883_v28  ;;  %v5418_v44 = vmul.f32 %v5416_v27, %v5402_v29 }
0x3dad   :  { %v5419_v33 = vmul.f32 %v5417_v32, %v5403_v36 }
0x3daf   :  { %v5420_v18 = vpack.c.bf16 %v5419_v33, %v5418_v44 }
0x3db1   :  { %6662 = vmatmul.mubr.bf16.vlgmr.msra.gmra.mrb[176].mxu1 %v5420_v18 }
0x3e84   :  { %v5520_v35 = vpop.f32.mrb[176].mxu1 }
0x3e85   :  { %v5527_v39 = vadd.f32 %v5520_v35, %v8119_v30  ;;  %v6663_v6 = vpop.f32.mrb[177].mxu1 }
0x3e86   :  { %v5523_v37 = vpop.f32.mrb[178].mxu1 }
0x3e87   :  { %v5537_v56 = vadd.f32 %v5871_v9, %v5527_v39  ;;  %v5528_v38 = vadd.f32 %v5523_v37, %v8122_v31  ;;  %v6664_v40 = vpop.f32.mrb[179].mxu1 }
0x3e89   :  { %v5538_v41 = vadd.f32 %v5871_v9, %v5528_v38  ;;  %v5541_v42 = vsel %vm133_vm0, %v5537_v56, 0.0 }
0x3e8a   :  { %5542 = vadd.xlane.f32.xlu0 %v5541_v42 }
0x3e8b   :  { %v5544_v45 = vsel %vm133_vm0, %v5538_v41, 0.0 }
0x3e8c   :  { %5545 = vadd.xlane.f32.xlu1 %v5544_v45 }
0x3f17   :  { %v5543_v52 = vpop.xlane.xlu0 %5542 }
0x3f18   :  { %v5547_v55 = vmul.f32 0.03125, %v5543_v52 }
0x3f19   :  { %v5546_v59 = vpop.xlane.xlu1 %5545 }
0x3f1a   :  { %v5549_v51 = vsub.f32 %v5537_v56, %v5547_v55  ;;  %v5548_v11 = vmul.f32 0.03125, %v5546_v59 }
0x3f1c   :  { %v5550_v34 = vsub.f32 %v5538_v41, %v5548_v11  ;;  %v5551_v30 = vmul.f32 %v5549_v51, %v5549_v51 }
0x3f1e   :  { %v5553_v60 = vsel %vm133_vm0, %v5551_v30, 0.0  ;;  %v5552_v3 = vmul.f32 %v5550_v34, %v5550_v34 }
0x3f1f   :  { %5554 = vadd.xlane.f32.xlu0 %v5553_v60 }
0x3f20   :  { %v5556_v31 = vsel %vm133_vm0, %v5552_v3, 0.0 }
0x3f21   :  { %5557 = vadd.xlane.f32.xlu1 %v5556_v31 }
0x3fac   :  { %v5555_v10 = vpop.xlane.xlu0 %5554 }
0x3fad   :  { %v5559_v43 = vmul.f32 0.03125, %v5555_v10 }
0x3fae   :  { %v5558_v54 = vpop.xlane.xlu1 %5557 }
0x3faf   :  { %v5561_v5 = vadd.f32 1e-06, %v5559_v43  ;;  %v5560_v63 = vmul.f32 0.03125, %v5558_v54 }
0x3fb1   :  { %6884 = vrsqrt.f32 %v5561_v5  ;;  %v5562_v53 = vadd.f32 1e-06, %v5560_v63 }
0x3fb3   :  { %6886 = vrsqrt.f32 %v5562_v53 }
0x3fbb   :  { %v6885_v12 = vpop.eup %6884 }
0x3fbc   :  { %v5565_v13 = vmul.f32 %v6885_v12, %v5549_v51 }
0x3fbd   :  { %v6887_v46 = vpop.eup %6886 }
0x3fbe   :  { %v5573_v47 = vmul.f32 %v5872_v50, %v5565_v13  ;;  %v5566_v14 = vmul.f32 %v6887_v46, %v5550_v34 }
0x3fc0   :  { %v5574_v0 = vmul.f32 %v5872_v50, %v5566_v14  ;;  %v5581_v16 = vadd.f32 %v5873_v19, %v5573_v47 }
0x3fc2   :  { %v5582_v62 = vadd.f32 %v5873_v19, %v5574_v0 }
0x3fc4   :  { %v5583_v17 = vpack.c.bf16 %v5582_v62, %v5581_v16 }
0x3fc6   :  { %6670 = vmatmul.mubr.msk.bf16.vlgmr.msra.gmra.mrb[176].mxu0 %vm133_vm0, %v5583_v17 }
0x4099   :  { %v5644_v20 = vpop.f32.mrb[176].mxu0 }
0x409a   :  { %v5645_v4 = vadd.f32 %v5874_v48, %v5644_v20  ;;  %v6671_v21 = vpop.f32.mrb[177].mxu0 }
0x409b   :  { %v5647_v58 = vpop.f32.mrb[178].mxu0 }
0x409c   :  { %v5648_v7 = vadd.f32 %v5874_v48, %v5647_v58  ;;  %5651 = vmax.xlane.f32.xlu0 %v5645_v4  ;;  %v6672_v1 = vpop.f32.mrb[179].mxu0 }
0x409e   :  { %5653 = vmax.xlane.f32.xlu1 %v5648_v7 }
0x4129   :  { %v5652_v15 = vpop.xlane.xlu0 %5651 }
0x412a   :  { %v5655_v22 = vsub.f32 %v5645_v4, %v5652_v15 }
0x412b   :  { %v5654_v49 = vpop.xlane.xlu1 %5653 }
0x412c   :  { %v5657_v23 = vmul.f32 1.442695, %v5655_v22  ;;  %v5656_v2 = vsub.f32 %v5648_v7, %v5654_v49 }
0x412e   :  { %6888 = vpow2.f32 %v5657_v23  ;;  %v5659_v24 = vmul.f32 1.442695, %v5656_v2 }
0x4130   :  { %6890 = vpow2.f32 %v5659_v24 }
0x4138   :  { %v6889_v57 = vpop.eup %6888 }
0x4139   :  { %5661 = vadd.xlane.f32.xlu0 %v6889_v57 }
0x413a   :  { %v6891_v25 = vpop.eup %6890 }
0x413b   :  { %5663 = vadd.xlane.f32.xlu1 %v6891_v25 }
0x41c6   :  { %v5662_v26 = vpop.xlane.xlu0 %5661 }
0x41c7   :  { %6892 = vlog2.f32 %v5662_v26 }
0x41c8   :  { %v5664_v27 = vpop.xlane.xlu1 %5663 }
0x41c9   :  { %6894 = vlog2.f32 %v5664_v27 }
0x41d1   :  { %v6893_v28 = vpop.eup %6892 }
0x41d2   :  { %v5666_v29 = vmul.f32 0.6931472, %v6893_v28 }
0x41d3   :  { %v6895_v36 = vpop.eup %6894 }
0x41d4   :  { %v5669_v32 = vsub.f32 %v5655_v22, %v5666_v29  ;;  %v5668_v44 = vmul.f32 0.6931472, %v6895_v36 }
0x41d6   :  { %5671 = vst [vmem:[%s8239_s24] sm:$0xff] %v5669_v32  ;;  %v5670_v33 = vsub.f32 %v5656_v2, %v5668_v44 }
0x41d8   :  { %5672 = vst [vmem:[%s8239_s24 + $0x8] sm:$0xff] %v5670_v33 }

</bundles_post_ra>
